<compile_context>
chip_gen: v7x
topology: tpu7x:2x2x1
jax: 0.10.0
libtpu: 0.0.40
codegen_flags: <defaults>
</compile_context>

<pallas_src>
import functools
import math

import jax
import jax.numpy as jnp
from jax.experimental import pallas as pl
from jax.experimental.pallas import tpu as pltpu


NEG_BIG = -1e9  # large finite negative bias; masked logits underflow to exactly 0 in softmax


# ----------------------------- in-kernel helpers -----------------------------

def _softmax_last(s):
    m = jnp.max(s, axis=-1, keepdims=True)
    e = jnp.exp(s - m)
    # approx reciprocal runs on the EUP slot (otherwise idle next to the VPU-heavy softmax/LN math)
    return e * pl.reciprocal(jnp.sum(e, axis=-1, keepdims=True), approx=True)


def _layernorm(x, gamma, beta, eps=1e-5):
    # gamma/beta: [1, E]; x: [N, E]  (biased variance, like torch.nn.LayerNorm)
    mu = jnp.mean(x, axis=-1, keepdims=True)
    var = jnp.mean((x - mu) ** 2, axis=-1, keepdims=True)
    return (x - mu) * jax.lax.rsqrt(var + eps) * gamma + beta


# ----------------------------- fused kernel -----------------------------

def fused_encoder_kernel(x_ref, mask_ref,
                         wqkv_ref, wo_ref, g_ref, b_ref,
                         w1_ref, b1_ref, w2_ref, b2_ref,
                         qp_ref, wkvp_ref, wop_ref,
                         out_ref, *,
                         num_heads, latent_dim, num_layers, pool_row):
    H, D = num_heads, latent_dim
    HD = H * D
    scale = 1.0 / math.sqrt(D)

    x = x_ref[0]                      # [Np, E]
    m = mask_ref[0]                   # [Np, Np]
    # Additive attention bias computed ONCE per sample, reused across all layers & heads.
    bias = jnp.where(m > 0, 0.0, NEG_BIG).astype(jnp.float32)           # [Np, Np]
    pool_bias = bias[pool_row:pool_row + 1, :]                          # [1, Np] == mask[:, -1:]

    # All layers unrolled inside a single kernel invocation; weights resident in VMEM.
    for l in range(num_layers):
        gamma = g_ref[l]              # [1, E]
        beta = b_ref[l]               # [1, E]

        # ---- fused QKV projection: one wide MXU matmul instead of 3*H narrow ones ----
        qkv = jnp.dot(x, wqkv_ref[l], preferred_element_type=jnp.float32)   # [Np, 3*HD]
        q = qkv[:, 0 * HD:1 * HD]
        k = qkv[:, 1 * HD:2 * HD]
        v = qkv[:, 2 * HD:3 * HD]

        # ---- per-head attention on static lane slices (only the tiny score/PV matmuls) ----
        heads = []
        for h in range(H):
            qh = q[:, h * D:(h + 1) * D]
            kh = k[:, h * D:(h + 1) * D]
            vh = v[:, h * D:(h + 1) * D]
            s = jnp.dot(qh, kh.T, preferred_element_type=jnp.float32) * scale + bias
            p = _softmax_last(s)
            heads.append(jnp.dot(p, vh, preferred_element_type=jnp.float32))     # [Np, D]
        attn = jnp.dot(jnp.concatenate(heads, axis=1), wo_ref[l],
                       preferred_element_type=jnp.float32)                       # [Np, E]

        # ---- residual + LN, MLP, residual + same LN ----
        x1 = _layernorm(x + attn, gamma, beta)
        hid = jnp.maximum(
            jnp.dot(x1, w1_ref[l], preferred_element_type=jnp.float32) + b1_ref[l], 0.0)
        o2 = jnp.dot(hid, w2_ref[l], preferred_element_type=jnp.float32) + b2_ref[l]
        x = _layernorm(x1 + o2, gamma, beta)

    # ---- attention pooling epilogue (fused: no extra pallas_call / HBM round-trip) ----
    kv = jnp.dot(x, wkvp_ref[...], preferred_element_type=jnp.float32)   # [Np, 2*HD]
    kp = kv[:, :HD]
    vp = kv[:, HD:]
    qflat = qp_ref[...]                                                  # [1, HD]
    pooled_heads = []
    for h in range(H):
        qh = qflat[:, h * D:(h + 1) * D]                                 # [1, D]
        kh = kp[:, h * D:(h + 1) * D]
        vh = vp[:, h * D:(h + 1) * D]
        s = jnp.dot(qh, kh.T, preferred_element_type=jnp.float32) * scale + pool_bias   # [1, Np]
        p = _softmax_last(s)
        pooled_heads.append(jnp.dot(p, vh, preferred_element_type=jnp.float32))         # [1, D]
    pooled = jnp.dot(jnp.concatenate(pooled_heads, axis=1), wop_ref[...],
                     preferred_element_type=jnp.float32)                 # [1, E]
    out_ref[0] = pooled.astype(out_ref.dtype)


# ----------------------------- weight packing -----------------------------

def _flat_heads_in(w):
    # [H, E, D] -> [E, H*D], columns grouped by head (so Q[:, h*D:(h+1)*D] == x @ w[h])
    H, E, D = w.shape
    return jnp.transpose(w, (1, 0, 2)).reshape(E, H * D)


def _pack_params(params):
    blocks = params["blocks"]
    H, E, D = blocks[0]["wq"].shape
    packed = dict(
        wqkv=jnp.stack([jnp.concatenate(
            [_flat_heads_in(b["wq"]), _flat_heads_in(b["wk"]), _flat_heads_in(b["wv"])],
            axis=1) for b in blocks]),                                   # [L, E, 3*H*D]
        wo=jnp.stack([b["wo"].reshape(H * D, E) for b in blocks]),       # [L, H*D, E]
        ln_g=jnp.stack([b["ln_g"] for b in blocks]),                     # [L, 1, E]
        ln_b=jnp.stack([b["ln_b"] for b in blocks]),                     # [L, 1, E]
        w1=jnp.stack([b["w1"] for b in blocks]),                         # [L, E, Hd]
        b1=jnp.stack([b["b1"] for b in blocks]),                         # [L, 1, Hd]
        w2=jnp.stack([b["w2"] for b in blocks]),                         # [L, Hd, E]
        b2=jnp.stack([b["b2"] for b in blocks]),                         # [L, 1, E]
    )
    pool = params["pool"]
    packed["q_pool"] = pool["q"].reshape(1, H * D)                       # [1, H*D]
    packed["wkv_pool"] = jnp.concatenate(
        [_flat_heads_in(pool["wk"]), _flat_heads_in(pool["wv"])], axis=1)  # [E, 2*H*D]
    packed["wo_pool"] = pool["wo"].reshape(H * D, E)                     # [H*D, E]
    return packed


# ----------------------------- pallas_call wrapper -----------------------------

def transformer_encoder(x, mask, params):
    """x: [B, N, C], mask: [B, N, N] -> [B, C]  (default forward path of the PyTorch module)."""
    B, N, C = x.shape
    blocks = params["blocks"]
    L = len(blocks)
    H, E, D = blocks[0]["wq"].shape
    Hd = blocks[0]["w1"].shape[1]
    HD = H * D
    assert E == C

    # task-embedding token + mask row/col of ones (matches the torch.cat logic)
    mask = jnp.concatenate([jnp.ones((B, 1, N), mask.dtype), mask], axis=1)        # [B, N+1, N]
    mask = jnp.concatenate([jnp.ones((B, N + 1, 1), mask.dtype), mask], axis=2)    # [B, N+1, N+1]
    te = jnp.broadcast_to(params["task_embedding"], (B, 1, C))
    x = jnp.concatenate([te, x], axis=1)                                           # [B, N+1, C]
    N1 = N + 1

    # Pad tokens up to a multiple of 8 sublanes; pad keys carry mask=0 so they never contribute.
    Np = ((N1 + 7) // 8) * 8
    if Np != N1:
        x = jnp.pad(x, ((0, 0), (0, Np - N1), (0, 0)))
        mask = jnp.pad(mask, ((0, 0), (0, Np - N1), (0, Np - N1)))

    p = _pack_params(params)

    kernel = functools.partial(fused_encoder_kernel, num_heads=H, latent_dim=D,
                               num_layers=L, pool_row=N1 - 1)

    # Rough cost hint so XLA schedules the surrounding concats/pads around the custom call.
    flops_layer = (2 * Np * E * 3 * HD + 4 * H * Np * Np * D + 2 * Np * HD * E
                   + 2 * Np * E * Hd + 2 * Np * Hd * E)
    flops_pool = 2 * Np * E * 2 * HD + 4 * H * Np * D + 2 * HD * E
    flops = B * (L * flops_layer + flops_pool)
    transc = B * (L * H * Np * Np + H * Np)
    weight_bytes = 4 * (L * (E * 3 * HD + HD * E + 2 * E + E * Hd + Hd + Hd * E + E)
                        + HD + E * 2 * HD + HD * E)
    bytes_accessed = 4 * B * (Np * E + Np * Np + E) + weight_bytes

    def wspec3(shape):
        return pl.BlockSpec(shape, lambda b: (0, 0, 0))

    def wspec2(shape):
        return pl.BlockSpec(shape, lambda b: (0, 0))

    out = pl.pallas_call(
        kernel,
        out_shape=jax.ShapeDtypeStruct((B, 1, E), x.dtype),
        grid_spec=pltpu.PrefetchScalarGridSpec(
            num_scalar_prefetch=0,
            grid=(B,),
            in_specs=[
                pl.BlockSpec((1, Np, E), lambda b: (b, 0, 0)),     # x (one sample per step)
                pl.BlockSpec((1, Np, Np), lambda b: (b, 0, 0)),    # mask (loaded once per sample)
                wspec3((L, E, 3 * HD)),                            # fused QKV weights, all layers
                wspec3((L, HD, E)),                                # output projection, all layers
                wspec3((L, 1, E)),                                 # LN gamma
                wspec3((L, 1, E)),                                 # LN beta
                wspec3((L, E, Hd)),                                # MLP w1
                wspec3((L, 1, Hd)),                                # MLP b1
                wspec3((L, Hd, E)),                                # MLP w2
                wspec3((L, 1, E)),                                 # MLP b2
                wspec2((1, HD)),                                   # pooling query
                wspec2((E, 2 * HD)),                               # pooling fused K|V weights
                wspec2((HD, E)),                                   # pooling output projection
            ],
            out_specs=pl.BlockSpec((1, 1, E), lambda b: (b, 0, 0)),
        ),
        compiler_params=pltpu.CompilerParams(
            dimension_semantics=("parallel",)),   # batch axis shards across v7x's 2 TensorCores
        cost_estimate=pl.CostEstimate(
            flops=flops, transcendentals=transc, bytes_accessed=bytes_accessed),
    )(x, mask, p["wqkv"], p["wo"], p["ln_g"], p["ln_b"],
      p["w1"], p["b1"], p["w2"], p["b2"],
      p["q_pool"], p["wkv_pool"], p["wo_pool"])

    # TODO(synk): progressive_TN / enable_TN_progressive branches are host-side training-schedule
    # control flow over the same block math; only the default inference path is implemented here.
    return out[:, 0, :]   # global_mlp is None (mlp_cfg=None)


# ----------------------------- pure-JAX reference (for correctness check) -----------------------------

def reference_encoder(x, mask, params):
    B, N, C = x.shape
    mask = jnp.concatenate([jnp.ones((B, 1, N), mask.dtype), mask], axis=1)
    mask = jnp.concatenate([jnp.ones((B, N + 1, 1), mask.dtype), mask], axis=2)
    te = jnp.broadcast_to(params["task_embedding"], (B, 1, C))
    x = jnp.concatenate([te, x], axis=1)
    D = params["latent_dim"]
    scale = 1.0 / math.sqrt(D)

    def softmax(s):
        s = s - jnp.max(s, axis=-1, keepdims=True)
        e = jnp.exp(s)
        return e / jnp.sum(e, axis=-1, keepdims=True)

    def ln(v, g, b, eps=1e-5):
        mu = jnp.mean(v, axis=-1, keepdims=True)
        var = jnp.mean((v - mu) ** 2, axis=-1, keepdims=True)
        return (v - mu) / jnp.sqrt(var + eps) * g + b

    for p in params["blocks"]:
        q = jnp.einsum('bne,hed->bhnd', x, p["wq"])
        k = jnp.einsum('bne,hed->bhnd', x, p["wk"])
        v = jnp.einsum('bne,hed->bhnd', x, p["wv"])
        s = jnp.einsum('bhnd,bhmd->bhnm', q, k) * scale
        s = jnp.where(mask[:, None, :, :] > 0, s, NEG_BIG)
        pr = softmax(s)
        o = jnp.einsum('bhnm,bhmd->bhnd', pr, v)
        attn = jnp.einsum('bhnd,hde->bne', o, p["wo"])
        x1 = ln(x + attn, p["ln_g"], p["ln_b"])
        hid = jnp.maximum(jnp.einsum('bne,eh->bnh', x1, p["w1"]) + p["b1"], 0.0)
        o2 = jnp.einsum('bnh,he->bne', hid, p["w2"]) + p["b2"]
        x = ln(x1 + o2, p["ln_g"], p["ln_b"])

    pp = params["pool"]
    k = jnp.einsum('bne,hed->bhnd', x, pp["wk"])
    v = jnp.einsum('bne,hed->bhnd', x, pp["wv"])
    s = jnp.einsum('hqd,bhnd->bhqn', pp["q"], k) * scale
    pm = mask[:, -1:, :]
    s = jnp.where(pm[:, None, :, :] > 0, s, NEG_BIG)
    pr = softmax(s)
    o = jnp.einsum('bhqn,bhnd->bhqd', pr, v)
    return jnp.einsum('bhqd,hde->bqe', o, pp["wo"])[:, 0, :]


# ----------------------------- deterministic parameter init -----------------------------

def _xavier_normal(key, shape):
    fan_in, fan_out = shape[-2], shape[-1]
    std = math.sqrt(2.0 / (fan_in + fan_out))
    return std * jax.random.normal(key, shape, dtype=jnp.float32)


def init_params(key, embed_dim, num_heads, latent_dim, mlp_hidden, num_blocks):
    keys = jax.random.split(key, 3 + num_blocks)
    params = {
        "latent_dim": latent_dim,
        "task_embedding": _xavier_normal(keys[0], (1, 1, embed_dim)),
    }
    blocks = []
    for i in range(num_blocks):
        ks = jax.random.split(keys[3 + i], 8)
        blocks.append({
            "wq": _xavier_normal(ks[0], (num_heads, embed_dim, latent_dim)),
            "wk": _xavier_normal(ks[1], (num_heads, embed_dim, latent_dim)),
            "wv": _xavier_normal(ks[2], (num_heads, embed_dim, latent_dim)),
            "wo": _xavier_normal(ks[3], (num_heads, latent_dim, embed_dim)),
            "ln_g": jnp.ones((1, embed_dim), jnp.float32),
            "ln_b": jnp.zeros((1, embed_dim), jnp.float32),
            "w1": _xavier_normal(ks[4], (embed_dim, mlp_hidden)),
            "b1": 0.01 * jax.random.normal(ks[5], (1, mlp_hidden), jnp.float32),
            "w2": _xavier_normal(ks[6], (mlp_hidden, embed_dim)),
            "b2": 0.01 * jax.random.normal(ks[7], (1, embed_dim), jnp.float32),
        })
    params["blocks"] = blocks
    kp = jax.random.split(keys[1], 4)
    params["pool"] = {
        "q": _xavier_normal(kp[0], (num_heads, 1, latent_dim)),   # torch shape [1,H,1,D], reshaped
        "wk": _xavier_normal(kp[1], (num_heads, embed_dim, latent_dim)),
        "wv": _xavier_normal(kp[2], (num_heads, embed_dim, latent_dim)),
        "wo": _xavier_normal(kp[3], (num_heads, latent_dim, embed_dim)),
    }
    return params


# ----------------------------- main -----------------------------

if __name__ == "__main__":
    B, N, E = 2, 8, 32          # batch, seq length, embed_dim
    H, D, Hd = 4, 8, 64         # num_heads, latent_dim (per head), mlp hidden
    num_blocks = 2              # small for the test (module default is 6)

    key = jax.random.PRNGKey(0)
    k_param, k_x = jax.random.split(key)
    params = init_params(k_param, E, H, D, Hd, num_blocks)

    x = jax.random.normal(k_x, (B, N, E), dtype=jnp.float32)
    # padding-style mask: batch 0 has all N tokens valid, batch 1 has last 3 padded
    lengths = jnp.array([N, N - 3])
    key_valid = (jnp.arange(N)[None, :] < lengths[:, None]).astype(jnp.float32)   # [B, N]
    mask = jnp.broadcast_to(key_valid[:, None, :], (B, N, N)).astype(jnp.float32) # [B, N, N]

    out = transformer_encoder(x, mask, params)
    out = jax.block_until_ready(out)

    assert out.shape == (B, E), out.shape
    assert bool(jnp.all(jnp.isfinite(out)))

    # correctness check vs. pure-JAX reference (loose tolerance: approx reciprocal on EUP)
    ref = reference_encoder(x, mask, params)
    assert bool(jnp.allclose(out, ref, atol=5e-2, rtol=5e-2)), \
        float(jnp.max(jnp.abs(out - ref)))

    print("KERNEL_OK")
</pallas_src>

<mosaic_0001>
module attributes {stable_mosaic.version = 11 : i64} {
  func.func @fused_encoder_kernel(%arg0: i32, %arg1: memref<1x16x32xf32, #tpu.memory_space<vmem>>, %arg2: memref<1x16x16xf32, #tpu.memory_space<vmem>>, %arg3: memref<2x32x96xf32, #tpu.memory_space<vmem>>, %arg4: memref<2x32x32xf32, #tpu.memory_space<vmem>>, %arg5: memref<2x1x32xf32, #tpu.memory_space<vmem>>, %arg6: memref<2x1x32xf32, #tpu.memory_space<vmem>>, %arg7: memref<2x32x64xf32, #tpu.memory_space<vmem>>, %arg8: memref<2x1x64xf32, #tpu.memory_space<vmem>>, %arg9: memref<2x64x32xf32, #tpu.memory_space<vmem>>, %arg10: memref<2x1x32xf32, #tpu.memory_space<vmem>>, %arg11: memref<1x32xf32, #tpu.memory_space<vmem>>, %arg12: memref<32x64xf32, #tpu.memory_space<vmem>>, %arg13: memref<32x32xf32, #tpu.memory_space<vmem>>, %arg14: memref<1x1x32xf32, #tpu.memory_space<vmem>>) attributes {dimension_semantics = [#tpu.dimension_semantics<parallel>], iteration_bounds = array<i64: 2>, scalar_prefetch = 0 : i64, scratch_operands = 0 : i64, tpu.core_type = #tpu.core_type<tc>, window_params = [{transform_indices = @transform_0, window_bounds = array<i64: 1, 16, 32>}, {transform_indices = @transform_1, window_bounds = array<i64: 1, 16, 16>}, {pipeline_mode = #tpu.pipeline_mode<synchronous>, transform_indices = @transform_2, window_bounds = array<i64: 2, 32, 96>}, {pipeline_mode = #tpu.pipeline_mode<synchronous>, transform_indices = @transform_3, window_bounds = array<i64: 2, 32, 32>}, {pipeline_mode = #tpu.pipeline_mode<synchronous>, transform_indices = @transform_4, window_bounds = array<i64: 2, 1, 32>}, {pipeline_mode = #tpu.pipeline_mode<synchronous>, transform_indices = @transform_5, window_bounds = array<i64: 2, 1, 32>}, {pipeline_mode = #tpu.pipeline_mode<synchronous>, transform_indices = @transform_6, window_bounds = array<i64: 2, 32, 64>}, {pipeline_mode = #tpu.pipeline_mode<synchronous>, transform_indices = @transform_7, window_bounds = array<i64: 2, 1, 64>}, {pipeline_mode = #tpu.pipeline_mode<synchronous>, transform_indices = @transform_8, window_bounds = array<i64: 2, 64, 32>}, {pipeline_mode = #tpu.pipeline_mode<synchronous>, transform_indices = @transform_9, window_bounds = array<i64: 2, 1, 32>}, {pipeline_mode = #tpu.pipeline_mode<synchronous>, transform_indices = @transform_10, window_bounds = array<i64: 1, 32>}, {pipeline_mode = #tpu.pipeline_mode<synchronous>, transform_indices = @transform_11, window_bounds = array<i64: 32, 64>}, {pipeline_mode = #tpu.pipeline_mode<synchronous>, transform_indices = @transform_12, window_bounds = array<i64: 32, 32>}, {transform_indices = @transform_13, window_bounds = array<i64: 1, 1, 32>}]} {
    %c0 = arith.constant 0 : index
    %c0_0 = arith.constant 0 : index
    %c0_1 = arith.constant 0 : index
    %0 = vector.load %arg1[%c0, %c0_0, %c0_1] : memref<1x16x32xf32, #tpu.memory_space<vmem>>, vector<1x16x32xf32>
    %1 = vector.shape_cast %0 : vector<1x16x32xf32> to vector<16x32xf32>
    %c0_2 = arith.constant 0 : index
    %c0_3 = arith.constant 0 : index
    %c0_4 = arith.constant 0 : index
    %2 = vector.load %arg2[%c0_2, %c0_3, %c0_4] : memref<1x16x16xf32, #tpu.memory_space<vmem>>, vector<1x16x16xf32>
    %3 = vector.shape_cast %2 : vector<1x16x16xf32> to vector<16x16xf32>
    %cst = arith.constant 0.000000e+00 : f32
    %4 = vector.broadcast %cst : f32 to vector<16x16xf32>
    %5 = arith.cmpf ogt, %3, %4 : vector<16x16xf32>
    %cst_5 = arith.constant 0.000000e+00 : f32
    %cst_6 = arith.constant -1.000000e+09 : f32
    %6 = vector.broadcast %cst_5 : f32 to vector<16x16xf32>
    %7 = vector.broadcast %cst_6 : f32 to vector<16x16xf32>
    %8 = arith.select %5, %6, %7 : vector<16x16xi1>, vector<16x16xf32>
    %9 = vector.extract_strided_slice %8 {offsets = [8, 0], sizes = [1, 16], strides = [1, 1]} : vector<16x16xf32> to vector<1x16xf32>
    %c0_7 = arith.constant 0 : index
    %c0_8 = arith.constant 0 : index
    %c0_9 = arith.constant 0 : index
    %10 = vector.load %arg5[%c0_7, %c0_8, %c0_9] : memref<2x1x32xf32, #tpu.memory_space<vmem>>, vector<1x1x32xf32>
    %11 = vector.shape_cast %10 : vector<1x1x32xf32> to vector<1x32xf32>
    %c0_10 = arith.constant 0 : index
    %c0_11 = arith.constant 0 : index
    %c0_12 = arith.constant 0 : index
    %12 = vector.load %arg6[%c0_10, %c0_11, %c0_12] : memref<2x1x32xf32, #tpu.memory_space<vmem>>, vector<1x1x32xf32>
    %13 = vector.shape_cast %12 : vector<1x1x32xf32> to vector<1x32xf32>
    %c0_13 = arith.constant 0 : index
    %c0_14 = arith.constant 0 : index
    %c0_15 = arith.constant 0 : index
    %14 = vector.load %arg3[%c0_13, %c0_14, %c0_15] : memref<2x32x96xf32, #tpu.memory_space<vmem>>, vector<1x32x96xf32>
    %15 = vector.shape_cast %14 : vector<1x32x96xf32> to vector<32x96xf32>
    %cst_16 = arith.constant dense<0.000000e+00> : vector<16x96xf32>
    %16 = tpu.matmul %1, %15, %cst_16 {dimension_numbers = #tpu.dot_dimension_numbers<[1], [0], [0], [1], [0, 0, 1, 1], [], []>} : vector<16x32xf32>, vector<32x96xf32>, vector<16x96xf32> -> vector<16x96xf32>
    %17 = vector.extract_strided_slice %16 {offsets = [0, 0], sizes = [16, 32], strides = [1, 1]} : vector<16x96xf32> to vector<16x32xf32>
    %18 = vector.extract_strided_slice %16 {offsets = [0, 32], sizes = [16, 32], strides = [1, 1]} : vector<16x96xf32> to vector<16x32xf32>
    %19 = vector.extract_strided_slice %16 {offsets = [0, 64], sizes = [16, 32], strides = [1, 1]} : vector<16x96xf32> to vector<16x32xf32>
    %20 = vector.extract_strided_slice %17 {offsets = [0, 0], sizes = [16, 8], strides = [1, 1]} : vector<16x32xf32> to vector<16x8xf32>
    %21 = vector.extract_strided_slice %18 {offsets = [0, 0], sizes = [16, 8], strides = [1, 1]} : vector<16x32xf32> to vector<16x8xf32>
    %22 = vector.extract_strided_slice %19 {offsets = [0, 0], sizes = [16, 8], strides = [1, 1]} : vector<16x32xf32> to vector<16x8xf32>
    %23 = tpu.transpose %21, [1, 0] : vector<16x8xf32> -> vector<8x16xf32>
    %cst_17 = arith.constant dense<0.000000e+00> : vector<16x16xf32>
    %24 = tpu.matmul %20, %23, %cst_17 {dimension_numbers = #tpu.dot_dimension_numbers<[1], [0], [0], [1], [0, 0, 1, 1], [], []>} : vector<16x8xf32>, vector<8x16xf32>, vector<16x16xf32> -> vector<16x16xf32>
    %cst_18 = arith.constant 0.353553385 : f32
    %25 = vector.broadcast %cst_18 : f32 to vector<16x16xf32>
    %26 = arith.mulf %24, %25 : vector<16x16xf32>
    %27 = arith.addf %26, %8 : vector<16x16xf32>
    %cst_19 = arith.constant dense<0xFF800000> : vector<16xf32>
    %28 = vector.multi_reduction <maximumf>, %27, %cst_19 [1] : vector<16x16xf32> to vector<16xf32>
    %29 = vector.shape_cast %28 : vector<16xf32> to vector<16x1xf32>
    %30 = vector.broadcast %29 : vector<16x1xf32> to vector<16x16xf32>
    %31 = arith.subf %27, %30 : vector<16x16xf32>
    %32 = math.exp %31 : vector<16x16xf32>
    %cst_20 = arith.constant dense<0.000000e+00> : vector<16xf32>
    %33 = vector.multi_reduction <add>, %32, %cst_20 [1] : vector<16x16xf32> to vector<16xf32>
    %34 = vector.shape_cast %33 : vector<16xf32> to vector<16x1xf32>
    %35 = tpu.reciprocal %34 {approx = true} : vector<16x1xf32> -> vector<16x1xf32>
    %36 = vector.broadcast %35 : vector<16x1xf32> to vector<16x16xf32>
    %37 = arith.mulf %32, %36 : vector<16x16xf32>
    %cst_21 = arith.constant dense<0.000000e+00> : vector<16x8xf32>
    %38 = tpu.matmul %37, %22, %cst_21 {dimension_numbers = #tpu.dot_dimension_numbers<[1], [0], [0], [1], [0, 0, 1, 1], [], []>} : vector<16x16xf32>, vector<16x8xf32>, vector<16x8xf32> -> vector<16x8xf32>
    %39 = vector.extract_strided_slice %17 {offsets = [0, 8], sizes = [16, 8], strides = [1, 1]} : vector<16x32xf32> to vector<16x8xf32>
    %40 = vector.extract_strided_slice %18 {offsets = [0, 8], sizes = [16, 8], strides = [1, 1]} : vector<16x32xf32> to vector<16x8xf32>
    %41 = vector.extract_strided_slice %19 {offsets = [0, 8], sizes = [16, 8], strides = [1, 1]} : vector<16x32xf32> to vector<16x8xf32>
    %42 = tpu.transpose %40, [1, 0] : vector<16x8xf32> -> vector<8x16xf32>
    %cst_22 = arith.constant dense<0.000000e+00> : vector<16x16xf32>
    %43 = tpu.matmul %39, %42, %cst_22 {dimension_numbers = #tpu.dot_dimension_numbers<[1], [0], [0], [1], [0, 0, 1, 1], [], []>} : vector<16x8xf32>, vector<8x16xf32>, vector<16x16xf32> -> vector<16x16xf32>
    %cst_23 = arith.constant 0.353553385 : f32
    %44 = vector.broadcast %cst_23 : f32 to vector<16x16xf32>
    %45 = arith.mulf %43, %44 : vector<16x16xf32>
    %46 = arith.addf %45, %8 : vector<16x16xf32>
    %cst_24 = arith.constant dense<0xFF800000> : vector<16xf32>
    %47 = vector.multi_reduction <maximumf>, %46, %cst_24 [1] : vector<16x16xf32> to vector<16xf32>
    %48 = vector.shape_cast %47 : vector<16xf32> to vector<16x1xf32>
    %49 = vector.broadcast %48 : vector<16x1xf32> to vector<16x16xf32>
    %50 = arith.subf %46, %49 : vector<16x16xf32>
    %51 = math.exp %50 : vector<16x16xf32>
    %cst_25 = arith.constant dense<0.000000e+00> : vector<16xf32>
    %52 = vector.multi_reduction <add>, %51, %cst_25 [1] : vector<16x16xf32> to vector<16xf32>
    %53 = vector.shape_cast %52 : vector<16xf32> to vector<16x1xf32>
    %54 = tpu.reciprocal %53 {approx = true} : vector<16x1xf32> -> vector<16x1xf32>
    %55 = vector.broadcast %54 : vector<16x1xf32> to vector<16x16xf32>
    %56 = arith.mulf %51, %55 : vector<16x16xf32>
    %cst_26 = arith.constant dense<0.000000e+00> : vector<16x8xf32>
    %57 = tpu.matmul %56, %41, %cst_26 {dimension_numbers = #tpu.dot_dimension_numbers<[1], [0], [0], [1], [0, 0, 1, 1], [], []>} : vector<16x16xf32>, vector<16x8xf32>, vector<16x8xf32> -> vector<16x8xf32>
    %58 = vector.extract_strided_slice %17 {offsets = [0, 16], sizes = [16, 8], strides = [1, 1]} : vector<16x32xf32> to vector<16x8xf32>
    %59 = vector.extract_strided_slice %18 {offsets = [0, 16], sizes = [16, 8], strides = [1, 1]} : vector<16x32xf32> to vector<16x8xf32>
    %60 = vector.extract_strided_slice %19 {offsets = [0, 16], sizes = [16, 8], strides = [1, 1]} : vector<16x32xf32> to vector<16x8xf32>
    %61 = tpu.transpose %59, [1, 0] : vector<16x8xf32> -> vector<8x16xf32>
    %cst_27 = arith.constant dense<0.000000e+00> : vector<16x16xf32>
    %62 = tpu.matmul %58, %61, %cst_27 {dimension_numbers = #tpu.dot_dimension_numbers<[1], [0], [0], [1], [0, 0, 1, 1], [], []>} : vector<16x8xf32>, vector<8x16xf32>, vector<16x16xf32> -> vector<16x16xf32>
    %cst_28 = arith.constant 0.353553385 : f32
    %63 = vector.broadcast %cst_28 : f32 to vector<16x16xf32>
    %64 = arith.mulf %62, %63 : vector<16x16xf32>
    %65 = arith.addf %64, %8 : vector<16x16xf32>
    %cst_29 = arith.constant dense<0xFF800000> : vector<16xf32>
    %66 = vector.multi_reduction <maximumf>, %65, %cst_29 [1] : vector<16x16xf32> to vector<16xf32>
    %67 = vector.shape_cast %66 : vector<16xf32> to vector<16x1xf32>
    %68 = vector.broadcast %67 : vector<16x1xf32> to vector<16x16xf32>
    %69 = arith.subf %65, %68 : vector<16x16xf32>
    %70 = math.exp %69 : vector<16x16xf32>
    %cst_30 = arith.constant dense<0.000000e+00> : vector<16xf32>
    %71 = vector.multi_reduction <add>, %70, %cst_30 [1] : vector<16x16xf32> to vector<16xf32>
    %72 = vector.shape_cast %71 : vector<16xf32> to vector<16x1xf32>
    %73 = tpu.reciprocal %72 {approx = true} : vector<16x1xf32> -> vector<16x1xf32>
    %74 = vector.broadcast %73 : vector<16x1xf32> to vector<16x16xf32>
    %75 = arith.mulf %70, %74 : vector<16x16xf32>
    %cst_31 = arith.constant dense<0.000000e+00> : vector<16x8xf32>
    %76 = tpu.matmul %75, %60, %cst_31 {dimension_numbers = #tpu.dot_dimension_numbers<[1], [0], [0], [1], [0, 0, 1, 1], [], []>} : vector<16x16xf32>, vector<16x8xf32>, vector<16x8xf32> -> vector<16x8xf32>
    %77 = vector.extract_strided_slice %17 {offsets = [0, 24], sizes = [16, 8], strides = [1, 1]} : vector<16x32xf32> to vector<16x8xf32>
    %78 = vector.extract_strided_slice %18 {offsets = [0, 24], sizes = [16, 8], strides = [1, 1]} : vector<16x32xf32> to vector<16x8xf32>
    %79 = vector.extract_strided_slice %19 {offsets = [0, 24], sizes = [16, 8], strides = [1, 1]} : vector<16x32xf32> to vector<16x8xf32>
    %80 = tpu.transpose %78, [1, 0] : vector<16x8xf32> -> vector<8x16xf32>
    %cst_32 = arith.constant dense<0.000000e+00> : vector<16x16xf32>
    %81 = tpu.matmul %77, %80, %cst_32 {dimension_numbers = #tpu.dot_dimension_numbers<[1], [0], [0], [1], [0, 0, 1, 1], [], []>} : vector<16x8xf32>, vector<8x16xf32>, vector<16x16xf32> -> vector<16x16xf32>
    %cst_33 = arith.constant 0.353553385 : f32
    %82 = vector.broadcast %cst_33 : f32 to vector<16x16xf32>
    %83 = arith.mulf %81, %82 : vector<16x16xf32>
    %84 = arith.addf %83, %8 : vector<16x16xf32>
    %cst_34 = arith.constant dense<0xFF800000> : vector<16xf32>
    %85 = vector.multi_reduction <maximumf>, %84, %cst_34 [1] : vector<16x16xf32> to vector<16xf32>
    %86 = vector.shape_cast %85 : vector<16xf32> to vector<16x1xf32>
    %87 = vector.broadcast %86 : vector<16x1xf32> to vector<16x16xf32>
    %88 = arith.subf %84, %87 : vector<16x16xf32>
    %89 = math.exp %88 : vector<16x16xf32>
    %cst_35 = arith.constant dense<0.000000e+00> : vector<16xf32>
    %90 = vector.multi_reduction <add>, %89, %cst_35 [1] : vector<16x16xf32> to vector<16xf32>
    %91 = vector.shape_cast %90 : vector<16xf32> to vector<16x1xf32>
    %92 = tpu.reciprocal %91 {approx = true} : vector<16x1xf32> -> vector<16x1xf32>
    %93 = vector.broadcast %92 : vector<16x1xf32> to vector<16x16xf32>
    %94 = arith.mulf %89, %93 : vector<16x16xf32>
    %cst_36 = arith.constant dense<0.000000e+00> : vector<16x8xf32>
    %95 = tpu.matmul %94, %79, %cst_36 {dimension_numbers = #tpu.dot_dimension_numbers<[1], [0], [0], [1], [0, 0, 1, 1], [], []>} : vector<16x16xf32>, vector<16x8xf32>, vector<16x8xf32> -> vector<16x8xf32>
    %96 = tpu.concatenate %38, %57, %76, %95 in 1 : vector<16x8xf32>, vector<16x8xf32>, vector<16x8xf32>, vector<16x8xf32> -> vector<16x32xf32>
    %c0_37 = arith.constant 0 : index
    %c0_38 = arith.constant 0 : index
    %c0_39 = arith.constant 0 : index
    %97 = vector.load %arg4[%c0_37, %c0_38, %c0_39] : memref<2x32x32xf32, #tpu.memory_space<vmem>>, vector<1x32x32xf32>
    %98 = vector.shape_cast %97 : vector<1x32x32xf32> to vector<32x32xf32>
    %cst_40 = arith.constant dense<0.000000e+00> : vector<16x32xf32>
    %99 = tpu.matmul %96, %98, %cst_40 {dimension_numbers = #tpu.dot_dimension_numbers<[1], [0], [0], [1], [0, 0, 1, 1], [], []>} : vector<16x32xf32>, vector<32x32xf32>, vector<16x32xf32> -> vector<16x32xf32>
    %100 = arith.addf %1, %99 : vector<16x32xf32>
    %cst_41 = arith.constant dense<0.000000e+00> : vector<16xf32>
    %101 = vector.multi_reduction <add>, %100, %cst_41 [1] : vector<16x32xf32> to vector<16xf32>
    %102 = vector.shape_cast %101 : vector<16xf32> to vector<16x1xf32>
    %cst_42 = arith.constant 3.200000e+01 : f32
    %103 = vector.broadcast %cst_42 : f32 to vector<16x1xf32>
    %104 = arith.divf %102, %103 : vector<16x1xf32>
    %105 = vector.broadcast %104 : vector<16x1xf32> to vector<16x32xf32>
    %106 = arith.subf %100, %105 : vector<16x32xf32>
    %107 = arith.mulf %106, %106 : vector<16x32xf32>
    %cst_43 = arith.constant dense<0.000000e+00> : vector<16xf32>
    %108 = vector.multi_reduction <add>, %107, %cst_43 [1] : vector<16x32xf32> to vector<16xf32>
    %109 = vector.shape_cast %108 : vector<16xf32> to vector<16x1xf32>
    %cst_44 = arith.constant 3.200000e+01 : f32
    %110 = vector.broadcast %cst_44 : f32 to vector<16x1xf32>
    %111 = arith.divf %109, %110 : vector<16x1xf32>
    %112 = vector.broadcast %104 : vector<16x1xf32> to vector<16x32xf32>
    %113 = arith.subf %100, %112 : vector<16x32xf32>
    %cst_45 = arith.constant 9.99999974E-6 : f32
    %114 = vector.broadcast %cst_45 : f32 to vector<16x1xf32>
    %115 = arith.addf %111, %114 : vector<16x1xf32>
    %116 = math.rsqrt %115 : vector<16x1xf32>
    %117 = vector.broadcast %116 : vector<16x1xf32> to vector<16x32xf32>
    %118 = arith.mulf %113, %117 : vector<16x32xf32>
    %119 = vector.broadcast %11 : vector<1x32xf32> to vector<16x32xf32>
    %120 = arith.mulf %118, %119 : vector<16x32xf32>
    %121 = vector.broadcast %13 : vector<1x32xf32> to vector<16x32xf32>
    %122 = arith.addf %120, %121 : vector<16x32xf32>
    %c0_46 = arith.constant 0 : index
    %c0_47 = arith.constant 0 : index
    %c0_48 = arith.constant 0 : index
    %123 = vector.load %arg7[%c0_46, %c0_47, %c0_48] : memref<2x32x64xf32, #tpu.memory_space<vmem>>, vector<1x32x64xf32>
    %124 = vector.shape_cast %123 : vector<1x32x64xf32> to vector<32x64xf32>
    %cst_49 = arith.constant dense<0.000000e+00> : vector<16x64xf32>
    %125 = tpu.matmul %122, %124, %cst_49 {dimension_numbers = #tpu.dot_dimension_numbers<[1], [0], [0], [1], [0, 0, 1, 1], [], []>} : vector<16x32xf32>, vector<32x64xf32>, vector<16x64xf32> -> vector<16x64xf32>
    %c0_50 = arith.constant 0 : index
    %c0_51 = arith.constant 0 : index
    %c0_52 = arith.constant 0 : index
    %126 = vector.load %arg8[%c0_50, %c0_51, %c0_52] : memref<2x1x64xf32, #tpu.memory_space<vmem>>, vector<1x1x64xf32>
    %127 = vector.shape_cast %126 : vector<1x1x64xf32> to vector<1x64xf32>
    %128 = vector.broadcast %127 : vector<1x64xf32> to vector<16x64xf32>
    %129 = arith.addf %125, %128 : vector<16x64xf32>
    %cst_53 = arith.constant 0.000000e+00 : f32
    %130 = vector.broadcast %cst_53 : f32 to vector<16x64xf32>
    %131 = arith.maximumf %129, %130 : vector<16x64xf32>
    %c0_54 = arith.constant 0 : index
    %c0_55 = arith.constant 0 : index
    %c0_56 = arith.constant 0 : index
    %132 = vector.load %arg9[%c0_54, %c0_55, %c0_56] : memref<2x64x32xf32, #tpu.memory_space<vmem>>, vector<1x64x32xf32>
    %133 = vector.shape_cast %132 : vector<1x64x32xf32> to vector<64x32xf32>
    %cst_57 = arith.constant dense<0.000000e+00> : vector<16x32xf32>
    %134 = tpu.matmul %131, %133, %cst_57 {dimension_numbers = #tpu.dot_dimension_numbers<[1], [0], [0], [1], [0, 0, 1, 1], [], []>} : vector<16x64xf32>, vector<64x32xf32>, vector<16x32xf32> -> vector<16x32xf32>
    %c0_58 = arith.constant 0 : index
    %c0_59 = arith.constant 0 : index
    %c0_60 = arith.constant 0 : index
    %135 = vector.load %arg10[%c0_58, %c0_59, %c0_60] : memref<2x1x32xf32, #tpu.memory_space<vmem>>, vector<1x1x32xf32>
    %136 = vector.shape_cast %135 : vector<1x1x32xf32> to vector<1x32xf32>
    %137 = vector.broadcast %136 : vector<1x32xf32> to vector<16x32xf32>
    %138 = arith.addf %134, %137 : vector<16x32xf32>
    %139 = arith.addf %122, %138 : vector<16x32xf32>
    %cst_61 = arith.constant dense<0.000000e+00> : vector<16xf32>
    %140 = vector.multi_reduction <add>, %139, %cst_61 [1] : vector<16x32xf32> to vector<16xf32>
    %141 = vector.shape_cast %140 : vector<16xf32> to vector<16x1xf32>
    %cst_62 = arith.constant 3.200000e+01 : f32
    %142 = vector.broadcast %cst_62 : f32 to vector<16x1xf32>
    %143 = arith.divf %141, %142 : vector<16x1xf32>
    %144 = vector.broadcast %143 : vector<16x1xf32> to vector<16x32xf32>
    %145 = arith.subf %139, %144 : vector<16x32xf32>
    %146 = arith.mulf %145, %145 : vector<16x32xf32>
    %cst_63 = arith.constant dense<0.000000e+00> : vector<16xf32>
    %147 = vector.multi_reduction <add>, %146, %cst_63 [1] : vector<16x32xf32> to vector<16xf32>
    %148 = vector.shape_cast %147 : vector<16xf32> to vector<16x1xf32>
    %cst_64 = arith.constant 3.200000e+01 : f32
    %149 = vector.broadcast %cst_64 : f32 to vector<16x1xf32>
    %150 = arith.divf %148, %149 : vector<16x1xf32>
    %151 = vector.broadcast %143 : vector<16x1xf32> to vector<16x32xf32>
    %152 = arith.subf %139, %151 : vector<16x32xf32>
    %cst_65 = arith.constant 9.99999974E-6 : f32
    %153 = vector.broadcast %cst_65 : f32 to vector<16x1xf32>
    %154 = arith.addf %150, %153 : vector<16x1xf32>
    %155 = math.rsqrt %154 : vector<16x1xf32>
    %156 = vector.broadcast %155 : vector<16x1xf32> to vector<16x32xf32>
    %157 = arith.mulf %152, %156 : vector<16x32xf32>
    %158 = vector.broadcast %11 : vector<1x32xf32> to vector<16x32xf32>
    %159 = arith.mulf %157, %158 : vector<16x32xf32>
    %160 = vector.broadcast %13 : vector<1x32xf32> to vector<16x32xf32>
    %161 = arith.addf %159, %160 : vector<16x32xf32>
    %c1 = arith.constant 1 : index
    %c0_66 = arith.constant 0 : index
    %c0_67 = arith.constant 0 : index
    %162 = vector.load %arg5[%c1, %c0_66, %c0_67] : memref<2x1x32xf32, #tpu.memory_space<vmem>>, vector<1x1x32xf32>
    %163 = vector.shape_cast %162 : vector<1x1x32xf32> to vector<1x32xf32>
    %c1_68 = arith.constant 1 : index
    %c0_69 = arith.constant 0 : index
    %c0_70 = arith.constant 0 : index
    %164 = vector.load %arg6[%c1_68, %c0_69, %c0_70] : memref<2x1x32xf32, #tpu.memory_space<vmem>>, vector<1x1x32xf32>
    %165 = vector.shape_cast %164 : vector<1x1x32xf32> to vector<1x32xf32>
    %c1_71 = arith.constant 1 : index
    %c0_72 = arith.constant 0 : index
    %c0_73 = arith.constant 0 : index
    %166 = vector.load %arg3[%c1_71, %c0_72, %c0_73] : memref<2x32x96xf32, #tpu.memory_space<vmem>>, vector<1x32x96xf32>
    %167 = vector.shape_cast %166 : vector<1x32x96xf32> to vector<32x96xf32>
    %cst_74 = arith.constant dense<0.000000e+00> : vector<16x96xf32>
    %168 = tpu.matmul %161, %167, %cst_74 {dimension_numbers = #tpu.dot_dimension_numbers<[1], [0], [0], [1], [0, 0, 1, 1], [], []>} : vector<16x32xf32>, vector<32x96xf32>, vector<16x96xf32> -> vector<16x96xf32>
    %169 = vector.extract_strided_slice %168 {offsets = [0, 0], sizes = [16, 32], strides = [1, 1]} : vector<16x96xf32> to vector<16x32xf32>
    %170 = vector.extract_strided_slice %168 {offsets = [0, 32], sizes = [16, 32], strides = [1, 1]} : vector<16x96xf32> to vector<16x32xf32>
    %171 = vector.extract_strided_slice %168 {offsets = [0, 64], sizes = [16, 32], strides = [1, 1]} : vector<16x96xf32> to vector<16x32xf32>
    %172 = vector.extract_strided_slice %169 {offsets = [0, 0], sizes = [16, 8], strides = [1, 1]} : vector<16x32xf32> to vector<16x8xf32>
    %173 = vector.extract_strided_slice %170 {offsets = [0, 0], sizes = [16, 8], strides = [1, 1]} : vector<16x32xf32> to vector<16x8xf32>
    %174 = vector.extract_strided_slice %171 {offsets = [0, 0], sizes = [16, 8], strides = [1, 1]} : vector<16x32xf32> to vector<16x8xf32>
    %175 = tpu.transpose %173, [1, 0] : vector<16x8xf32> -> vector<8x16xf32>
    %cst_75 = arith.constant dense<0.000000e+00> : vector<16x16xf32>
    %176 = tpu.matmul %172, %175, %cst_75 {dimension_numbers = #tpu.dot_dimension_numbers<[1], [0], [0], [1], [0, 0, 1, 1], [], []>} : vector<16x8xf32>, vector<8x16xf32>, vector<16x16xf32> -> vector<16x16xf32>
    %cst_76 = arith.constant 0.353553385 : f32
    %177 = vector.broadcast %cst_76 : f32 to vector<16x16xf32>
    %178 = arith.mulf %176, %177 : vector<16x16xf32>
    %179 = arith.addf %178, %8 : vector<16x16xf32>
    %cst_77 = arith.constant dense<0xFF800000> : vector<16xf32>
    %180 = vector.multi_reduction <maximumf>, %179, %cst_77 [1] : vector<16x16xf32> to vector<16xf32>
    %181 = vector.shape_cast %180 : vector<16xf32> to vector<16x1xf32>
    %182 = vector.broadcast %181 : vector<16x1xf32> to vector<16x16xf32>
    %183 = arith.subf %179, %182 : vector<16x16xf32>
    %184 = math.exp %183 : vector<16x16xf32>
    %cst_78 = arith.constant dense<0.000000e+00> : vector<16xf32>
    %185 = vector.multi_reduction <add>, %184, %cst_78 [1] : vector<16x16xf32> to vector<16xf32>
    %186 = vector.shape_cast %185 : vector<16xf32> to vector<16x1xf32>
    %187 = tpu.reciprocal %186 {approx = true} : vector<16x1xf32> -> vector<16x1xf32>
    %188 = vector.broadcast %187 : vector<16x1xf32> to vector<16x16xf32>
    %189 = arith.mulf %184, %188 : vector<16x16xf32>
    %cst_79 = arith.constant dense<0.000000e+00> : vector<16x8xf32>
    %190 = tpu.matmul %189, %174, %cst_79 {dimension_numbers = #tpu.dot_dimension_numbers<[1], [0], [0], [1], [0, 0, 1, 1], [], []>} : vector<16x16xf32>, vector<16x8xf32>, vector<16x8xf32> -> vector<16x8xf32>
    %191 = vector.extract_strided_slice %169 {offsets = [0, 8], sizes = [16, 8], strides = [1, 1]} : vector<16x32xf32> to vector<16x8xf32>
    %192 = vector.extract_strided_slice %170 {offsets = [0, 8], sizes = [16, 8], strides = [1, 1]} : vector<16x32xf32> to vector<16x8xf32>
    %193 = vector.extract_strided_slice %171 {offsets = [0, 8], sizes = [16, 8], strides = [1, 1]} : vector<16x32xf32> to vector<16x8xf32>
    %194 = tpu.transpose %192, [1, 0] : vector<16x8xf32> -> vector<8x16xf32>
    %cst_80 = arith.constant dense<0.000000e+00> : vector<16x16xf32>
    %195 = tpu.matmul %191, %194, %cst_80 {dimension_numbers = #tpu.dot_dimension_numbers<[1], [0], [0], [1], [0, 0, 1, 1], [], []>} : vector<16x8xf32>, vector<8x16xf32>, vector<16x16xf32> -> vector<16x16xf32>
    %cst_81 = arith.constant 0.353553385 : f32
    %196 = vector.broadcast %cst_81 : f32 to vector<16x16xf32>
    %197 = arith.mulf %195, %196 : vector<16x16xf32>
    %198 = arith.addf %197, %8 : vector<16x16xf32>
    %cst_82 = arith.constant dense<0xFF800000> : vector<16xf32>
    %199 = vector.multi_reduction <maximumf>, %198, %cst_82 [1] : vector<16x16xf32> to vector<16xf32>
    %200 = vector.shape_cast %199 : vector<16xf32> to vector<16x1xf32>
    %201 = vector.broadcast %200 : vector<16x1xf32> to vector<16x16xf32>
    %202 = arith.subf %198, %201 : vector<16x16xf32>
    %203 = math.exp %202 : vector<16x16xf32>
    %cst_83 = arith.constant dense<0.000000e+00> : vector<16xf32>
    %204 = vector.multi_reduction <add>, %203, %cst_83 [1] : vector<16x16xf32> to vector<16xf32>
    %205 = vector.shape_cast %204 : vector<16xf32> to vector<16x1xf32>
    %206 = tpu.reciprocal %205 {approx = true} : vector<16x1xf32> -> vector<16x1xf32>
    %207 = vector.broadcast %206 : vector<16x1xf32> to vector<16x16xf32>
    %208 = arith.mulf %203, %207 : vector<16x16xf32>
    %cst_84 = arith.constant dense<0.000000e+00> : vector<16x8xf32>
    %209 = tpu.matmul %208, %193, %cst_84 {dimension_numbers = #tpu.dot_dimension_numbers<[1], [0], [0], [1], [0, 0, 1, 1], [], []>} : vector<16x16xf32>, vector<16x8xf32>, vector<16x8xf32> -> vector<16x8xf32>
    %210 = vector.extract_strided_slice %169 {offsets = [0, 16], sizes = [16, 8], strides = [1, 1]} : vector<16x32xf32> to vector<16x8xf32>
    %211 = vector.extract_strided_slice %170 {offsets = [0, 16], sizes = [16, 8], strides = [1, 1]} : vector<16x32xf32> to vector<16x8xf32>
    %212 = vector.extract_strided_slice %171 {offsets = [0, 16], sizes = [16, 8], strides = [1, 1]} : vector<16x32xf32> to vector<16x8xf32>
    %213 = tpu.transpose %211, [1, 0] : vector<16x8xf32> -> vector<8x16xf32>
    %cst_85 = arith.constant dense<0.000000e+00> : vector<16x16xf32>
    %214 = tpu.matmul %210, %213, %cst_85 {dimension_numbers = #tpu.dot_dimension_numbers<[1], [0], [0], [1], [0, 0, 1, 1], [], []>} : vector<16x8xf32>, vector<8x16xf32>, vector<16x16xf32> -> vector<16x16xf32>
    %cst_86 = arith.constant 0.353553385 : f32
    %215 = vector.broadcast %cst_86 : f32 to vector<16x16xf32>
    %216 = arith.mulf %214, %215 : vector<16x16xf32>
    %217 = arith.addf %216, %8 : vector<16x16xf32>
    %cst_87 = arith.constant dense<0xFF800000> : vector<16xf32>
    %218 = vector.multi_reduction <maximumf>, %217, %cst_87 [1] : vector<16x16xf32> to vector<16xf32>
    %219 = vector.shape_cast %218 : vector<16xf32> to vector<16x1xf32>
    %220 = vector.broadcast %219 : vector<16x1xf32> to vector<16x16xf32>
    %221 = arith.subf %217, %220 : vector<16x16xf32>
    %222 = math.exp %221 : vector<16x16xf32>
    %cst_88 = arith.constant dense<0.000000e+00> : vector<16xf32>
    %223 = vector.multi_reduction <add>, %222, %cst_88 [1] : vector<16x16xf32> to vector<16xf32>
    %224 = vector.shape_cast %223 : vector<16xf32> to vector<16x1xf32>
    %225 = tpu.reciprocal %224 {approx = true} : vector<16x1xf32> -> vector<16x1xf32>
    %226 = vector.broadcast %225 : vector<16x1xf32> to vector<16x16xf32>
    %227 = arith.mulf %222, %226 : vector<16x16xf32>
    %cst_89 = arith.constant dense<0.000000e+00> : vector<16x8xf32>
    %228 = tpu.matmul %227, %212, %cst_89 {dimension_numbers = #tpu.dot_dimension_numbers<[1], [0], [0], [1], [0, 0, 1, 1], [], []>} : vector<16x16xf32>, vector<16x8xf32>, vector<16x8xf32> -> vector<16x8xf32>
    %229 = vector.extract_strided_slice %169 {offsets = [0, 24], sizes = [16, 8], strides = [1, 1]} : vector<16x32xf32> to vector<16x8xf32>
    %230 = vector.extract_strided_slice %170 {offsets = [0, 24], sizes = [16, 8], strides = [1, 1]} : vector<16x32xf32> to vector<16x8xf32>
    %231 = vector.extract_strided_slice %171 {offsets = [0, 24], sizes = [16, 8], strides = [1, 1]} : vector<16x32xf32> to vector<16x8xf32>
    %232 = tpu.transpose %230, [1, 0] : vector<16x8xf32> -> vector<8x16xf32>
    %cst_90 = arith.constant dense<0.000000e+00> : vector<16x16xf32>
    %233 = tpu.matmul %229, %232, %cst_90 {dimension_numbers = #tpu.dot_dimension_numbers<[1], [0], [0], [1], [0, 0, 1, 1], [], []>} : vector<16x8xf32>, vector<8x16xf32>, vector<16x16xf32> -> vector<16x16xf32>
    %cst_91 = arith.constant 0.353553385 : f32
    %234 = vector.broadcast %cst_91 : f32 to vector<16x16xf32>
    %235 = arith.mulf %233, %234 : vector<16x16xf32>
    %236 = arith.addf %235, %8 : vector<16x16xf32>
    %cst_92 = arith.constant dense<0xFF800000> : vector<16xf32>
    %237 = vector.multi_reduction <maximumf>, %236, %cst_92 [1] : vector<16x16xf32> to vector<16xf32>
    %238 = vector.shape_cast %237 : vector<16xf32> to vector<16x1xf32>
    %239 = vector.broadcast %238 : vector<16x1xf32> to vector<16x16xf32>
    %240 = arith.subf %236, %239 : vector<16x16xf32>
    %241 = math.exp %240 : vector<16x16xf32>
    %cst_93 = arith.constant dense<0.000000e+00> : vector<16xf32>
    %242 = vector.multi_reduction <add>, %241, %cst_93 [1] : vector<16x16xf32> to vector<16xf32>
    %243 = vector.shape_cast %242 : vector<16xf32> to vector<16x1xf32>
    %244 = tpu.reciprocal %243 {approx = true} : vector<16x1xf32> -> vector<16x1xf32>
    %245 = vector.broadcast %244 : vector<16x1xf32> to vector<16x16xf32>
    %246 = arith.mulf %241, %245 : vector<16x16xf32>
    %cst_94 = arith.constant dense<0.000000e+00> : vector<16x8xf32>
    %247 = tpu.matmul %246, %231, %cst_94 {dimension_numbers = #tpu.dot_dimension_numbers<[1], [0], [0], [1], [0, 0, 1, 1], [], []>} : vector<16x16xf32>, vector<16x8xf32>, vector<16x8xf32> -> vector<16x8xf32>
    %248 = tpu.concatenate %190, %209, %228, %247 in 1 : vector<16x8xf32>, vector<16x8xf32>, vector<16x8xf32>, vector<16x8xf32> -> vector<16x32xf32>
    %c1_95 = arith.constant 1 : index
    %c0_96 = arith.constant 0 : index
    %c0_97 = arith.constant 0 : index
    %249 = vector.load %arg4[%c1_95, %c0_96, %c0_97] : memref<2x32x32xf32, #tpu.memory_space<vmem>>, vector<1x32x32xf32>
    %250 = vector.shape_cast %249 : vector<1x32x32xf32> to vector<32x32xf32>
    %cst_98 = arith.constant dense<0.000000e+00> : vector<16x32xf32>
    %251 = tpu.matmul %248, %250, %cst_98 {dimension_numbers = #tpu.dot_dimension_numbers<[1], [0], [0], [1], [0, 0, 1, 1], [], []>} : vector<16x32xf32>, vector<32x32xf32>, vector<16x32xf32> -> vector<16x32xf32>
    %252 = arith.addf %161, %251 : vector<16x32xf32>
    %cst_99 = arith.constant dense<0.000000e+00> : vector<16xf32>
    %253 = vector.multi_reduction <add>, %252, %cst_99 [1] : vector<16x32xf32> to vector<16xf32>
    %254 = vector.shape_cast %253 : vector<16xf32> to vector<16x1xf32>
    %cst_100 = arith.constant 3.200000e+01 : f32
    %255 = vector.broadcast %cst_100 : f32 to vector<16x1xf32>
    %256 = arith.divf %254, %255 : vector<16x1xf32>
    %257 = vector.broadcast %256 : vector<16x1xf32> to vector<16x32xf32>
    %258 = arith.subf %252, %257 : vector<16x32xf32>
    %259 = arith.mulf %258, %258 : vector<16x32xf32>
    %cst_101 = arith.constant dense<0.000000e+00> : vector<16xf32>
    %260 = vector.multi_reduction <add>, %259, %cst_101 [1] : vector<16x32xf32> to vector<16xf32>
    %261 = vector.shape_cast %260 : vector<16xf32> to vector<16x1xf32>
    %cst_102 = arith.constant 3.200000e+01 : f32
    %262 = vector.broadcast %cst_102 : f32 to vector<16x1xf32>
    %263 = arith.divf %261, %262 : vector<16x1xf32>
    %264 = vector.broadcast %256 : vector<16x1xf32> to vector<16x32xf32>
    %265 = arith.subf %252, %264 : vector<16x32xf32>
    %cst_103 = arith.constant 9.99999974E-6 : f32
    %266 = vector.broadcast %cst_103 : f32 to vector<16x1xf32>
    %267 = arith.addf %263, %266 : vector<16x1xf32>
    %268 = math.rsqrt %267 : vector<16x1xf32>
    %269 = vector.broadcast %268 : vector<16x1xf32> to vector<16x32xf32>
    %270 = arith.mulf %265, %269 : vector<16x32xf32>
    %271 = vector.broadcast %163 : vector<1x32xf32> to vector<16x32xf32>
    %272 = arith.mulf %270, %271 : vector<16x32xf32>
    %273 = vector.broadcast %165 : vector<1x32xf32> to vector<16x32xf32>
    %274 = arith.addf %272, %273 : vector<16x32xf32>
    %c1_104 = arith.constant 1 : index
    %c0_105 = arith.constant 0 : index
    %c0_106 = arith.constant 0 : index
    %275 = vector.load %arg7[%c1_104, %c0_105, %c0_106] : memref<2x32x64xf32, #tpu.memory_space<vmem>>, vector<1x32x64xf32>
    %276 = vector.shape_cast %275 : vector<1x32x64xf32> to vector<32x64xf32>
    %cst_107 = arith.constant dense<0.000000e+00> : vector<16x64xf32>
    %277 = tpu.matmul %274, %276, %cst_107 {dimension_numbers = #tpu.dot_dimension_numbers<[1], [0], [0], [1], [0, 0, 1, 1], [], []>} : vector<16x32xf32>, vector<32x64xf32>, vector<16x64xf32> -> vector<16x64xf32>
    %c1_108 = arith.constant 1 : index
    %c0_109 = arith.constant 0 : index
    %c0_110 = arith.constant 0 : index
    %278 = vector.load %arg8[%c1_108, %c0_109, %c0_110] : memref<2x1x64xf32, #tpu.memory_space<vmem>>, vector<1x1x64xf32>
    %279 = vector.shape_cast %278 : vector<1x1x64xf32> to vector<1x64xf32>
    %280 = vector.broadcast %279 : vector<1x64xf32> to vector<16x64xf32>
    %281 = arith.addf %277, %280 : vector<16x64xf32>
    %cst_111 = arith.constant 0.000000e+00 : f32
    %282 = vector.broadcast %cst_111 : f32 to vector<16x64xf32>
    %283 = arith.maximumf %281, %282 : vector<16x64xf32>
    %c1_112 = arith.constant 1 : index
    %c0_113 = arith.constant 0 : index
    %c0_114 = arith.constant 0 : index
    %284 = vector.load %arg9[%c1_112, %c0_113, %c0_114] : memref<2x64x32xf32, #tpu.memory_space<vmem>>, vector<1x64x32xf32>
    %285 = vector.shape_cast %284 : vector<1x64x32xf32> to vector<64x32xf32>
    %cst_115 = arith.constant dense<0.000000e+00> : vector<16x32xf32>
    %286 = tpu.matmul %283, %285, %cst_115 {dimension_numbers = #tpu.dot_dimension_numbers<[1], [0], [0], [1], [0, 0, 1, 1], [], []>} : vector<16x64xf32>, vector<64x32xf32>, vector<16x32xf32> -> vector<16x32xf32>
    %c1_116 = arith.constant 1 : index
    %c0_117 = arith.constant 0 : index
    %c0_118 = arith.constant 0 : index
    %287 = vector.load %arg10[%c1_116, %c0_117, %c0_118] : memref<2x1x32xf32, #tpu.memory_space<vmem>>, vector<1x1x32xf32>
    %288 = vector.shape_cast %287 : vector<1x1x32xf32> to vector<1x32xf32>
    %289 = vector.broadcast %288 : vector<1x32xf32> to vector<16x32xf32>
    %290 = arith.addf %286, %289 : vector<16x32xf32>
    %291 = arith.addf %274, %290 : vector<16x32xf32>
    %cst_119 = arith.constant dense<0.000000e+00> : vector<16xf32>
    %292 = vector.multi_reduction <add>, %291, %cst_119 [1] : vector<16x32xf32> to vector<16xf32>
    %293 = vector.shape_cast %292 : vector<16xf32> to vector<16x1xf32>
    %cst_120 = arith.constant 3.200000e+01 : f32
    %294 = vector.broadcast %cst_120 : f32 to vector<16x1xf32>
    %295 = arith.divf %293, %294 : vector<16x1xf32>
    %296 = vector.broadcast %295 : vector<16x1xf32> to vector<16x32xf32>
    %297 = arith.subf %291, %296 : vector<16x32xf32>
    %298 = arith.mulf %297, %297 : vector<16x32xf32>
    %cst_121 = arith.constant dense<0.000000e+00> : vector<16xf32>
    %299 = vector.multi_reduction <add>, %298, %cst_121 [1] : vector<16x32xf32> to vector<16xf32>
    %300 = vector.shape_cast %299 : vector<16xf32> to vector<16x1xf32>
    %cst_122 = arith.constant 3.200000e+01 : f32
    %301 = vector.broadcast %cst_122 : f32 to vector<16x1xf32>
    %302 = arith.divf %300, %301 : vector<16x1xf32>
    %303 = vector.broadcast %295 : vector<16x1xf32> to vector<16x32xf32>
    %304 = arith.subf %291, %303 : vector<16x32xf32>
    %cst_123 = arith.constant 9.99999974E-6 : f32
    %305 = vector.broadcast %cst_123 : f32 to vector<16x1xf32>
    %306 = arith.addf %302, %305 : vector<16x1xf32>
    %307 = math.rsqrt %306 : vector<16x1xf32>
    %308 = vector.broadcast %307 : vector<16x1xf32> to vector<16x32xf32>
    %309 = arith.mulf %304, %308 : vector<16x32xf32>
    %310 = vector.broadcast %163 : vector<1x32xf32> to vector<16x32xf32>
    %311 = arith.mulf %309, %310 : vector<16x32xf32>
    %312 = vector.broadcast %165 : vector<1x32xf32> to vector<16x32xf32>
    %313 = arith.addf %311, %312 : vector<16x32xf32>
    %c0_124 = arith.constant 0 : index
    %c0_125 = arith.constant 0 : index
    %314 = vector.load %arg12[%c0_124, %c0_125] : memref<32x64xf32, #tpu.memory_space<vmem>>, vector<32x64xf32>
    %cst_126 = arith.constant dense<0.000000e+00> : vector<16x64xf32>
    %315 = tpu.matmul %313, %314, %cst_126 {dimension_numbers = #tpu.dot_dimension_numbers<[1], [0], [0], [1], [0, 0, 1, 1], [], []>} : vector<16x32xf32>, vector<32x64xf32>, vector<16x64xf32> -> vector<16x64xf32>
    %316 = vector.extract_strided_slice %315 {offsets = [0, 0], sizes = [16, 32], strides = [1, 1]} : vector<16x64xf32> to vector<16x32xf32>
    %317 = vector.extract_strided_slice %315 {offsets = [0, 32], sizes = [16, 32], strides = [1, 1]} : vector<16x64xf32> to vector<16x32xf32>
    %c0_127 = arith.constant 0 : index
    %c0_128 = arith.constant 0 : index
    %318 = vector.load %arg11[%c0_127, %c0_128] : memref<1x32xf32, #tpu.memory_space<vmem>>, vector<1x32xf32>
    %319 = vector.extract_strided_slice %318 {offsets = [0, 0], sizes = [1, 8], strides = [1, 1]} : vector<1x32xf32> to vector<1x8xf32>
    %320 = vector.extract_strided_slice %316 {offsets = [0, 0], sizes = [16, 8], strides = [1, 1]} : vector<16x32xf32> to vector<16x8xf32>
    %321 = vector.extract_strided_slice %317 {offsets = [0, 0], sizes = [16, 8], strides = [1, 1]} : vector<16x32xf32> to vector<16x8xf32>
    %322 = tpu.transpose %320, [1, 0] : vector<16x8xf32> -> vector<8x16xf32>
    %cst_129 = arith.constant dense<0.000000e+00> : vector<1x16xf32>
    %323 = tpu.matmul %319, %322, %cst_129 {dimension_numbers = #tpu.dot_dimension_numbers<[1], [0], [0], [1], [0, 0, 1, 1], [], []>} : vector<1x8xf32>, vector<8x16xf32>, vector<1x16xf32> -> vector<1x16xf32>
    %cst_130 = arith.constant 0.353553385 : f32
    %324 = vector.broadcast %cst_130 : f32 to vector<1x16xf32>
    %325 = arith.mulf %323, %324 : vector<1x16xf32>
    %326 = arith.addf %325, %9 : vector<1x16xf32>
    %cst_131 = arith.constant dense<0xFF800000> : vector<1xf32>
    %327 = vector.multi_reduction <maximumf>, %326, %cst_131 [1] : vector<1x16xf32> to vector<1xf32>
    %328 = vector.shape_cast %327 : vector<1xf32> to vector<1x1xf32>
    %329 = vector.broadcast %328 : vector<1x1xf32> to vector<1x16xf32>
    %330 = arith.subf %326, %329 : vector<1x16xf32>
    %331 = math.exp %330 : vector<1x16xf32>
    %cst_132 = arith.constant dense<0.000000e+00> : vector<1xf32>
    %332 = vector.multi_reduction <add>, %331, %cst_132 [1] : vector<1x16xf32> to vector<1xf32>
    %333 = vector.shape_cast %332 : vector<1xf32> to vector<1x1xf32>
    %334 = tpu.reciprocal %333 {approx = true} : vector<1x1xf32> -> vector<1x1xf32>
    %335 = vector.broadcast %334 : vector<1x1xf32> to vector<1x16xf32>
    %336 = arith.mulf %331, %335 : vector<1x16xf32>
    %cst_133 = arith.constant dense<0.000000e+00> : vector<1x8xf32>
    %337 = tpu.matmul %336, %321, %cst_133 {dimension_numbers = #tpu.dot_dimension_numbers<[1], [0], [0], [1], [0, 0, 1, 1], [], []>} : vector<1x16xf32>, vector<16x8xf32>, vector<1x8xf32> -> vector<1x8xf32>
    %338 = vector.extract_strided_slice %318 {offsets = [0, 8], sizes = [1, 8], strides = [1, 1]} : vector<1x32xf32> to vector<1x8xf32>
    %339 = vector.extract_strided_slice %316 {offsets = [0, 8], sizes = [16, 8], strides = [1, 1]} : vector<16x32xf32> to vector<16x8xf32>
    %340 = vector.extract_strided_slice %317 {offsets = [0, 8], sizes = [16, 8], strides = [1, 1]} : vector<16x32xf32> to vector<16x8xf32>
    %341 = tpu.transpose %339, [1, 0] : vector<16x8xf32> -> vector<8x16xf32>
    %cst_134 = arith.constant dense<0.000000e+00> : vector<1x16xf32>
    %342 = tpu.matmul %338, %341, %cst_134 {dimension_numbers = #tpu.dot_dimension_numbers<[1], [0], [0], [1], [0, 0, 1, 1], [], []>} : vector<1x8xf32>, vector<8x16xf32>, vector<1x16xf32> -> vector<1x16xf32>
    %cst_135 = arith.constant 0.353553385 : f32
    %343 = vector.broadcast %cst_135 : f32 to vector<1x16xf32>
    %344 = arith.mulf %342, %343 : vector<1x16xf32>
    %345 = arith.addf %344, %9 : vector<1x16xf32>
    %cst_136 = arith.constant dense<0xFF800000> : vector<1xf32>
    %346 = vector.multi_reduction <maximumf>, %345, %cst_136 [1] : vector<1x16xf32> to vector<1xf32>
    %347 = vector.shape_cast %346 : vector<1xf32> to vector<1x1xf32>
    %348 = vector.broadcast %347 : vector<1x1xf32> to vector<1x16xf32>
    %349 = arith.subf %345, %348 : vector<1x16xf32>
    %350 = math.exp %349 : vector<1x16xf32>
    %cst_137 = arith.constant dense<0.000000e+00> : vector<1xf32>
    %351 = vector.multi_reduction <add>, %350, %cst_137 [1] : vector<1x16xf32> to vector<1xf32>
    %352 = vector.shape_cast %351 : vector<1xf32> to vector<1x1xf32>
    %353 = tpu.reciprocal %352 {approx = true} : vector<1x1xf32> -> vector<1x1xf32>
    %354 = vector.broadcast %353 : vector<1x1xf32> to vector<1x16xf32>
    %355 = arith.mulf %350, %354 : vector<1x16xf32>
    %cst_138 = arith.constant dense<0.000000e+00> : vector<1x8xf32>
    %356 = tpu.matmul %355, %340, %cst_138 {dimension_numbers = #tpu.dot_dimension_numbers<[1], [0], [0], [1], [0, 0, 1, 1], [], []>} : vector<1x16xf32>, vector<16x8xf32>, vector<1x8xf32> -> vector<1x8xf32>
    %357 = vector.extract_strided_slice %318 {offsets = [0, 16], sizes = [1, 8], strides = [1, 1]} : vector<1x32xf32> to vector<1x8xf32>
    %358 = vector.extract_strided_slice %316 {offsets = [0, 16], sizes = [16, 8], strides = [1, 1]} : vector<16x32xf32> to vector<16x8xf32>
    %359 = vector.extract_strided_slice %317 {offsets = [0, 16], sizes = [16, 8], strides = [1, 1]} : vector<16x32xf32> to vector<16x8xf32>
    %360 = tpu.transpose %358, [1, 0] : vector<16x8xf32> -> vector<8x16xf32>
    %cst_139 = arith.constant dense<0.000000e+00> : vector<1x16xf32>
    %361 = tpu.matmul %357, %360, %cst_139 {dimension_numbers = #tpu.dot_dimension_numbers<[1], [0], [0], [1], [0, 0, 1, 1], [], []>} : vector<1x8xf32>, vector<8x16xf32>, vector<1x16xf32> -> vector<1x16xf32>
    %cst_140 = arith.constant 0.353553385 : f32
    %362 = vector.broadcast %cst_140 : f32 to vector<1x16xf32>
    %363 = arith.mulf %361, %362 : vector<1x16xf32>
    %364 = arith.addf %363, %9 : vector<1x16xf32>
    %cst_141 = arith.constant dense<0xFF800000> : vector<1xf32>
    %365 = vector.multi_reduction <maximumf>, %364, %cst_141 [1] : vector<1x16xf32> to vector<1xf32>
    %366 = vector.shape_cast %365 : vector<1xf32> to vector<1x1xf32>
    %367 = vector.broadcast %366 : vector<1x1xf32> to vector<1x16xf32>
    %368 = arith.subf %364, %367 : vector<1x16xf32>
    %369 = math.exp %368 : vector<1x16xf32>
    %cst_142 = arith.constant dense<0.000000e+00> : vector<1xf32>
    %370 = vector.multi_reduction <add>, %369, %cst_142 [1] : vector<1x16xf32> to vector<1xf32>
    %371 = vector.shape_cast %370 : vector<1xf32> to vector<1x1xf32>
    %372 = tpu.reciprocal %371 {approx = true} : vector<1x1xf32> -> vector<1x1xf32>
    %373 = vector.broadcast %372 : vector<1x1xf32> to vector<1x16xf32>
    %374 = arith.mulf %369, %373 : vector<1x16xf32>
    %cst_143 = arith.constant dense<0.000000e+00> : vector<1x8xf32>
    %375 = tpu.matmul %374, %359, %cst_143 {dimension_numbers = #tpu.dot_dimension_numbers<[1], [0], [0], [1], [0, 0, 1, 1], [], []>} : vector<1x16xf32>, vector<16x8xf32>, vector<1x8xf32> -> vector<1x8xf32>
    %376 = vector.extract_strided_slice %318 {offsets = [0, 24], sizes = [1, 8], strides = [1, 1]} : vector<1x32xf32> to vector<1x8xf32>
    %377 = vector.extract_strided_slice %316 {offsets = [0, 24], sizes = [16, 8], strides = [1, 1]} : vector<16x32xf32> to vector<16x8xf32>
    %378 = vector.extract_strided_slice %317 {offsets = [0, 24], sizes = [16, 8], strides = [1, 1]} : vector<16x32xf32> to vector<16x8xf32>
    %379 = tpu.transpose %377, [1, 0] : vector<16x8xf32> -> vector<8x16xf32>
    %cst_144 = arith.constant dense<0.000000e+00> : vector<1x16xf32>
    %380 = tpu.matmul %376, %379, %cst_144 {dimension_numbers = #tpu.dot_dimension_numbers<[1], [0], [0], [1], [0, 0, 1, 1], [], []>} : vector<1x8xf32>, vector<8x16xf32>, vector<1x16xf32> -> vector<1x16xf32>
    %cst_145 = arith.constant 0.353553385 : f32
    %381 = vector.broadcast %cst_145 : f32 to vector<1x16xf32>
    %382 = arith.mulf %380, %381 : vector<1x16xf32>
    %383 = arith.addf %382, %9 : vector<1x16xf32>
    %cst_146 = arith.constant dense<0xFF800000> : vector<1xf32>
    %384 = vector.multi_reduction <maximumf>, %383, %cst_146 [1] : vector<1x16xf32> to vector<1xf32>
    %385 = vector.shape_cast %384 : vector<1xf32> to vector<1x1xf32>
    %386 = vector.broadcast %385 : vector<1x1xf32> to vector<1x16xf32>
    %387 = arith.subf %383, %386 : vector<1x16xf32>
    %388 = math.exp %387 : vector<1x16xf32>
    %cst_147 = arith.constant dense<0.000000e+00> : vector<1xf32>
    %389 = vector.multi_reduction <add>, %388, %cst_147 [1] : vector<1x16xf32> to vector<1xf32>
    %390 = vector.shape_cast %389 : vector<1xf32> to vector<1x1xf32>
    %391 = tpu.reciprocal %390 {approx = true} : vector<1x1xf32> -> vector<1x1xf32>
    %392 = vector.broadcast %391 : vector<1x1xf32> to vector<1x16xf32>
    %393 = arith.mulf %388, %392 : vector<1x16xf32>
    %cst_148 = arith.constant dense<0.000000e+00> : vector<1x8xf32>
    %394 = tpu.matmul %393, %378, %cst_148 {dimension_numbers = #tpu.dot_dimension_numbers<[1], [0], [0], [1], [0, 0, 1, 1], [], []>} : vector<1x16xf32>, vector<16x8xf32>, vector<1x8xf32> -> vector<1x8xf32>
    %395 = tpu.concatenate %337, %356, %375, %394 in 1 : vector<1x8xf32>, vector<1x8xf32>, vector<1x8xf32>, vector<1x8xf32> -> vector<1x32xf32>
    %c0_149 = arith.constant 0 : index
    %c0_150 = arith.constant 0 : index
    %396 = vector.load %arg13[%c0_149, %c0_150] : memref<32x32xf32, #tpu.memory_space<vmem>>, vector<32x32xf32>
    %cst_151 = arith.constant dense<0.000000e+00> : vector<1x32xf32>
    %397 = tpu.matmul %395, %396, %cst_151 {dimension_numbers = #tpu.dot_dimension_numbers<[1], [0], [0], [1], [0, 0, 1, 1], [], []>} : vector<1x32xf32>, vector<32x32xf32>, vector<1x32xf32> -> vector<1x32xf32>
    %c0_152 = arith.constant 0 : index
    %c0_153 = arith.constant 0 : index
    %c0_154 = arith.constant 0 : index
    %398 = vector.load %arg14[%c0_152, %c0_153, %c0_154] : memref<1x1x32xf32, #tpu.memory_space<vmem>>, vector<1x1x32xf32>
    %399 = vector.shape_cast %398 : vector<1x1x32xf32> to vector<1x32xf32>
    %400 = vector.shape_cast %397 : vector<1x32xf32> to vector<1x1x32xf32>
    tpu.vector_store %arg14[%c0_152, %c0_153, %c0_154], %400 {strides = array<i32>} : memref<1x1x32xf32, #tpu.memory_space<vmem>>, vector<1x1x32xf32>,
    return
  }
  func.func @transform_0(%arg0: i32) -> (i32, i32, i32) {
    %c0_i32 = arith.constant 0 : i32
    %c0_i32_0 = arith.constant 0 : i32
    %c0_i32_1 = arith.constant 0 : i32
    return %arg0, %c0_i32, %c0_i32_0 : i32, i32, i32
  }
  func.func @transform_1(%arg0: i32) -> (i32, i32, i32) {
    %c0_i32 = arith.constant 0 : i32
    %c0_i32_0 = arith.constant 0 : i32
    %c0_i32_1 = arith.constant 0 : i32
    return %arg0, %c0_i32, %c0_i32_0 : i32, i32, i32
  }
  func.func @transform_2(%arg0: i32) -> (i32, i32, i32) {
    %c0_i32 = arith.constant 0 : i32
    %c0_i32_0 = arith.constant 0 : i32
    %c0_i32_1 = arith.constant 0 : i32
    %c0_i32_2 = arith.constant 0 : i32
    return %c0_i32, %c0_i32_0, %c0_i32_1 : i32, i32, i32
  }
  func.func @transform_3(%arg0: i32) -> (i32, i32, i32) {
    %c0_i32 = arith.constant 0 : i32
    %c0_i32_0 = arith.constant 0 : i32
    %c0_i32_1 = arith.constant 0 : i32
    %c0_i32_2 = arith.constant 0 : i32
    return %c0_i32, %c0_i32_0, %c0_i32_1 : i32, i32, i32
  }
  func.func @transform_4(%arg0: i32) -> (i32, i32, i32) {
    %c0_i32 = arith.constant 0 : i32
    %c0_i32_0 = arith.constant 0 : i32
    %c0_i32_1 = arith.constant 0 : i32
    %c0_i32_2 = arith.constant 0 : i32
    return %c0_i32, %c0_i32_0, %c0_i32_1 : i32, i32, i32
  }
  func.func @transform_5(%arg0: i32) -> (i32, i32, i32) {
    %c0_i32 = arith.constant 0 : i32
    %c0_i32_0 = arith.constant 0 : i32
    %c0_i32_1 = arith.constant 0 : i32
    %c0_i32_2 = arith.constant 0 : i32
    return %c0_i32, %c0_i32_0, %c0_i32_1 : i32, i32, i32
  }
  func.func @transform_6(%arg0: i32) -> (i32, i32, i32) {
    %c0_i32 = arith.constant 0 : i32
    %c0_i32_0 = arith.constant 0 : i32
    %c0_i32_1 = arith.constant 0 : i32
    %c0_i32_2 = arith.constant 0 : i32
    return %c0_i32, %c0_i32_0, %c0_i32_1 : i32, i32, i32
  }
  func.func @transform_7(%arg0: i32) -> (i32, i32, i32) {
    %c0_i32 = arith.constant 0 : i32
    %c0_i32_0 = arith.constant 0 : i32
    %c0_i32_1 = arith.constant 0 : i32
    %c0_i32_2 = arith.constant 0 : i32
    return %c0_i32, %c0_i32_0, %c0_i32_1 : i32, i32, i32
  }
  func.func @transform_8(%arg0: i32) -> (i32, i32, i32) {
    %c0_i32 = arith.constant 0 : i32
    %c0_i32_0 = arith.constant 0 : i32
    %c0_i32_1 = arith.constant 0 : i32
    %c0_i32_2 = arith.constant 0 : i32
    return %c0_i32, %c0_i32_0, %c0_i32_1 : i32, i32, i32
  }
  func.func @transform_9(%arg0: i32) -> (i32, i32, i32) {
    %c0_i32 = arith.constant 0 : i32
    %c0_i32_0 = arith.constant 0 : i32
    %c0_i32_1 = arith.constant 0 : i32
    %c0_i32_2 = arith.constant 0 : i32
    return %c0_i32, %c0_i32_0, %c0_i32_1 : i32, i32, i32
  }
  func.func @transform_10(%arg0: i32) -> (i32, i32) {
    %c0_i32 = arith.constant 0 : i32
    %c0_i32_0 = arith.constant 0 : i32
    %c0_i32_1 = arith.constant 0 : i32
    return %c0_i32, %c0_i32_0 : i32, i32
  }
  func.func @transform_11(%arg0: i32) -> (i32, i32) {
    %c0_i32 = arith.constant 0 : i32
    %c0_i32_0 = arith.constant 0 : i32
    %c0_i32_1 = arith.constant 0 : i32
    return %c0_i32, %c0_i32_0 : i32, i32
  }
  func.func @transform_12(%arg0: i32) -> (i32, i32) {
    %c0_i32 = arith.constant 0 : i32
    %c0_i32_0 = arith.constant 0 : i32
    %c0_i32_1 = arith.constant 0 : i32
    return %c0_i32, %c0_i32_0 : i32, i32
  }
  func.func @transform_13(%arg0: i32) -> (i32, i32, i32) {
    %c0_i32 = arith.constant 0 : i32
    %c0_i32_0 = arith.constant 0 : i32
    %c0_i32_1 = arith.constant 0 : i32
    return %arg0, %c0_i32, %c0_i32_0 : i32, i32, i32
  }
}

</mosaic_0001>

<bundles_post_ra>
// kernel: tpu_custom_call.1
= control target key start
LH: loop header
LB: loop body
LE: loop exit
PB: predicated region body
PF: predicated region fallthrough
CT: control target
= control target key end

     0   :  { %s6523_s0 = inlined_call_operand.hbm [shape: f32[2,16,32], index: 0, kind: input, shape index: {}]   ;;  %s6524_s1 = inlined_call_operand.hbm [shape: f32[2,16,16], index: 1, kind: input, shape index: {}]   ;;  %s6525_s2 = inlined_call_operand.vmem [shape: f32[2,32,96], index: 2, kind: input, shape index: {}]   ;;  %s6526_s3 = inlined_call_operand.vmem [shape: f32[2,32,32], index: 3, kind: input, shape index: {}]   ;;  %s6527_s4 = inlined_call_operand.vmem [shape: f32[2,1,32], index: 4, kind: input, shape index: {}]   ;;  %s6528_s5 = inlined_call_operand.hbm [shape: f32[2,1,32], index: 5, kind: input, shape index: {}]   ;;  %s6529_s6 = inlined_call_operand.vmem [shape: f32[2,32,64], index: 6, kind: input, shape index: {}]   ;;  %s6530_s7 = inlined_call_operand.hbm [shape: f32[2,1,64], index: 7, kind: input, shape index: {}]   ;;  %s6531_s8 = inlined_call_operand.vmem [shape: f32[2,64,32], index: 8, kind: input, shape index: {}]   ;;  %s6532_s9 = inlined_call_operand.hbm [shape: f32[2,1,32], index: 9, kind: input, shape index: {}]   ;;  %s6533_s10 = inlined_call_operand.vmem [shape: f32[1,32], index: 10, kind: input, shape index: {}]   ;;  %s6534_s11 = inlined_call_operand.vmem [shape: f32[32,64], index: 11, kind: input, shape index: {}]   ;;  %s6535_s12 = inlined_call_operand.hbm [shape: f32[32,32], index: 12, kind: input, shape index: {}]   ;;  %s6536_s13 = inlined_call_operand.hbm [shape: f32[2,1,32], index: 13, kind: output, shape index: {}]  }
   0x1   :  { %6569 = sst [smem:[#allocation22_spill]] %s6523_s0 }
   0x2   :  { %6570 = sst [smem:[#allocation23_spill]] %s6524_s1 }
   0x3   :  { %6571 = sst [smem:[#allocation24_spill]] %s6527_s4 }
   0x4   :  { %6572 = sst [smem:[#allocation25_spill]] %s6528_s5 }
   0x5   :  { %6573 = sst [smem:[#allocation26_spill]] %s6530_s7 }
   0x6   :  { %6574 = sst [smem:[#allocation27_spill]] %s6531_s8 }
   0x7   :  { %6575 = sst [smem:[#allocation28_spill]] %s6533_s10 }
   0x8   :  { %6576 = sst [smem:[#allocation29_spill]] %s6534_s11 }
   0x9   :  { %6577 = sst [smem:[#allocation30_spill]] %s6536_s13 }
   0xa   :  { %18 = vsyncpa [#allocation3], 0 }
   0xb   :  { %20 = vsyncpa [#allocation3 + $0x1], 0 }
   0xc   :  { %21 = vsyncpa [#allocation6], 0 }
   0xd   :  { %23 = vsyncpa [#allocation6 + $0x1], 0 }
   0xe   :  { %24 = vsyncpa [#allocation9], 0 }
   0xf   :  { %25 = vsyncpa [#allocation12], 0 }
  0x10   :  { %26 = vsyncpa [#allocation4], 0 }
  0x11   :  { %28 = vsyncpa [#allocation4 + $0x1], 0  ;;  %s5628_s25 = smov 0   ;;  %s5630_s26 = smov 0  }
  0x12   :  { %s5632_s27 = smov 0   ;;  %s5634_s28 = smov 0  }
  0x13 LB: > { %6578 = sst [smem:[#allocation20_spill]] %s5515_s25  ;;  %s5649_s29 = sadd.s32 4294967295, %s5527_s28   ;;  %s5527_s28 = sphi %s5634_s28, %s6629_s28   ;;  %s5523_s27 = sphi %s5632_s27, %s6628_s27   ;;  %s5519_s26 = sphi %s5630_s26, %s6627_s26   ;;  %s5515_s25 = sphi %s5628_s25, %s6626_s25  }
  0x14   : > { %s4160_s30 = sadd.s32 4294967294, %s5527_s28   ;;  %p54_p0 = scmp.ne.s32.totalorder %s5519_s26, %s5515_s25 }
  0x15   : > { %p6540_p1 = scmp.eq.s32.totalorder %s5649_s29, 0  ;;  %p341_p3 = scmp.eq.s32.totalorder %s4160_s30, 1 }
  0x16   : > { %p4161_p5 = scmp.ge.s32.totalorder %s5527_s28, 1  ;;  %p348_p7 = scmp.lt.s32.totalorder %s5527_s28, 3 }
  0x17   : > { %p5658_p4 = por %p6540_p1, %p54_p0  ;;  %p5663_p6 = por %p341_p3, %p54_p0 }
  0x18   : > { %p5668_p8 = pnand %p4161_p5, %p348_p7  ;;  %s5529_s17 = smov [#allocation7]  }
  0x19   : > { %s6579_s14 = scalar_select %p5658_p4, 1, 0 }
  0x1a   : > { %s6580_s15 = scalar_select %p5663_p6, 1, 0 }
  0x1b   : > { %s6582_s16 = scalar_select %p5668_p8, 1, 0 }
  0x1c   : > { %6581 = sst [smem:[#allocation21_spill]] %s6580_s15  ;;  %s369_s18 = sshll.u32 %s5529_s17, 4  ;;  %s5672_s18 = int_to_ptr.vmem [resolvable:$true] %s369_s18 }
  0x1d   : > { %p4970_p9 = pneg %p5668_p8  ;;  %s5530_s20 = smov [#allocation8]  }
  0x1e   : > { %s385_s21 = sshll.u32 %s5530_s20, 4  ;;  %s5531_s22 = smov [#allocation10]   ;;  %s5683_s21 = int_to_ptr.vmem [resolvable:$true] %s385_s21 }
  0x1f   : > { %p5679_p11 = pnand %p4970_p9, %p6540_p1  ;;  %s5685_s23 = sshll.u32 %s5531_s22, 4  ;;  %s402_s23 = int_to_ptr.vmem [resolvable:$true] %s5685_s23 }
  0x20   : > { %s6584_s5 = sld [smem:[#allocation25_spill]] }
  0x21   : > { %p5695_p13 = pneg %p5679_p11 }
  0x26   : > { %s5273_s17 = scalar_lea.hbm %s6584_s5, 32 }
  0x27   : > { %p5274_p12 = scmp.ne.s32.totalorder %s6584_s5, %s5273_s17  ;;  %p5280_p5 = scmp.lt.u32.totalorder %s5273_s17, %s6584_s5 }
  0x29   : > { %p5276_p0 = pnand %p5695_p13, %p5274_p12 }
  0x2b   : > { %p5277_p3 = pneg %p5276_p0 }
  0x2d   : > { %p5282_p7 = pnand %p5280_p5, %p5277_p3 }
  0x2f   : > { %5285 = shalt.err (!%p5282_p7)
}
  0x30   : > { %s5286_s25 = scalar_lea.vmem %s5672_s18, 32  ;;  %p5294_p2 = scmp.lt.s32.totalorder %s5672_s18, %s5672_s18 }
  0x31   : > { %p5287_p9 = scmp.ne.s32.totalorder %s5672_s18, %s5286_s25  ;;  %p5295_p6 = scmp.lt.s32.totalorder %s5286_s25, %s5286_s25 }
  0x33   : > { %p5289_p10 = pnand %p5287_p9, %p5695_p13  ;;  %p5296_p12 = por %p5295_p6, %p5294_p2 }
  0x35   : > { %p5290_p1 = pneg %p5289_p10 }
  0x37   : > { %p5297_p0 = pnand %p5296_p12, %p5290_p1 }
  0x39   : > { %5300 = shalt.err (!%p5297_p0)
}
  0x3a   : > { %s5532_s15 = smov 16   ;;  %s5533_s24 = smov 1  }
  0x3b   : > { %4973 = dma.hbm_to_vmem [thread:$0]  (!%p5679_p11), %s6584_s5, 32, %s5672_s18, [#allocation6], %s5532_s15, %s5532_s15, %s5533_s24  }
  0x3c   : > { %s6586_s7 = sld [smem:[#allocation26_spill]] }
  0x42   : > { %s5301_s25 = scalar_lea.hbm %s6586_s7, 32 }
  0x43   : > { %p5302_p1 = scmp.ne.s32.totalorder %s6586_s7, %s5301_s25  ;;  %p5308_p10 = scmp.lt.u32.totalorder %s5301_s25, %s6586_s7 }
  0x45   : > { %p5304_p2 = pnand %p5302_p1, %p5695_p13 }
  0x47   : > { %p5305_p6 = pneg %p5304_p2 }
  0x49   : > { %p5310_p3 = pnand %p5308_p10, %p5305_p6 }
  0x4b   : > { %5313 = shalt.err (!%p5310_p3)
}
  0x4c   : > { %s5314_s18 = scalar_lea.vmem %s5683_s21, 32  ;;  %p5322_p12 = scmp.lt.s32.totalorder %s5683_s21, %s5683_s21 }
  0x4d   : > { %p5315_p5 = scmp.ne.s32.totalorder %s5683_s21, %s5314_s18  ;;  %p5323_p0 = scmp.lt.s32.totalorder %s5314_s18, %s5314_s18 }
  0x4f   : > { %p5317_p7 = pnand %p5315_p5, %p5695_p13  ;;  %p5324_p1 = por %p5323_p0, %p5322_p12 }
  0x51   : > { %p5318_p9 = pneg %p5317_p7 }
  0x53   : > { %p5325_p2 = pnand %p5324_p1, %p5318_p9 }
  0x55   : > { %5328 = shalt.err (!%p5325_p2)
}
  0x56   : > { %4976 = dma.hbm_to_vmem [thread:$0]  (!%p5679_p11), %s6586_s7, 32, %s5683_s21, [#allocation9], %s5532_s15, %s5532_s15, %s5533_s24  }
  0x57   : > { %s5329_s30 = scalar_lea.hbm %s6532_s9, 32 }
  0x58   : > { %p5330_p6 = scmp.ne.s32.totalorder %s6532_s9, %s5329_s30  ;;  %p5336_p5 = scmp.lt.u32.totalorder %s5329_s30, %s6532_s9 }
  0x5a   : > { %p5332_p10 = pnand %p5330_p6, %p5695_p13 }
  0x5c   : > { %p5333_p3 = pneg %p5332_p10 }
  0x5e   : > { %p5338_p7 = pnand %p5336_p5, %p5333_p3 }
  0x60   : > { %5341 = shalt.err (!%p5338_p7)
}
  0x61   : > { %s5342_s18 = scalar_lea.vmem %s402_s23, 32  ;;  %p5350_p1 = scmp.lt.s32.totalorder %s402_s23, %s402_s23 }
  0x62   : > { %p5343_p9 = scmp.ne.s32.totalorder %s402_s23, %s5342_s18  ;;  %p5351_p2 = scmp.lt.s32.totalorder %s5342_s18, %s5342_s18 }
  0x64   : > { %p5345_p12 = pnand %p5343_p9, %p5695_p13  ;;  %p5352_p4 = por %p5351_p2, %p5350_p1 }
  0x66   : > { %p5346_p0 = pneg %p5345_p12 }
  0x68   : > { %p5353_p8 = pnand %p5352_p4, %p5346_p0 }
  0x6a   : > { %5356 = shalt.err (!%p5353_p8)
}
  0x6b   : > { %4979 = dma.hbm_to_vmem [thread:$0]  (!%p5679_p11), %s6532_s9, 32, %s402_s23, [#allocation9], %s5532_s15, %s5532_s15, %s5533_s24  }
  0x6c   : > { %s5534_s8 = smov [#allocation11]   ;;  %s5357_s17 = scalar_lea.hbm %s6535_s12, 512 }
  0x6d   : > { %s420_s10 = sshll.u32 %s5534_s8, 4  ;;  %p5358_p4 = scmp.ne.s32.totalorder %s6535_s12, %s5357_s17  ;;  %s421_s10 = int_to_ptr.vmem [resolvable:$true] %s420_s10 }
  0x6e   : > { %p5364_p10 = scmp.lt.u32.totalorder %s5357_s17, %s6535_s12 }
  0x6f   : > { %p5360_p8 = pnand %p5358_p4, %p5695_p13 }
  0x71   : > { %p5361_p6 = pneg %p5360_p8 }
  0x73   : > { %p5366_p3 = pnand %p5364_p10, %p5361_p6 }
  0x75   : > { %5369 = shalt.err (!%p5366_p3)
}
  0x76   : > { %s5370_s23 = scalar_lea.vmem %s421_s10, 512  ;;  %p5378_p12 = scmp.lt.s32.totalorder %s421_s10, %s421_s10 }
  0x77   : > { %p5371_p5 = scmp.ne.s32.totalorder %s421_s10, %s5370_s23  ;;  %p5379_p0 = scmp.lt.s32.totalorder %s5370_s23, %s5370_s23 }
  0x79   : > { %p5373_p7 = pnand %p5371_p5, %p5695_p13  ;;  %p5380_p1 = por %p5379_p0, %p5378_p12 }
  0x7b   : > { %p5374_p9 = pneg %p5373_p7 }
  0x7d   : > { %p5381_p2 = pnand %p5380_p1, %p5374_p9 }
  0x7f   : > { %5384 = shalt.err (!%p5381_p2)
}
  0x80   : > { %s6546_s15 = smov 128   ;;  %s6548_s13 = smov 8  }
  0x81   : > { %4982 = dma.hbm_to_vmem [thread:$0]  (!%p5679_p11), %s6535_s12, 512, %s421_s10, [#allocation12], %s6546_s15, %s6546_s15, %s6548_s13  }
  0x82   : > { %s5789_s4 = sadd.s32 1, %s5527_s28   ;;  %s41_s11 = sadd.s32 1, %s5523_s27 }
  0x83   : > { %s38_s8 = ssub.s32 %s5527_s28, %s5789_s4  ;;  %p48_p4 = scmp.ne.s32.totalorder %s5523_s27, %s5519_s26 }
  0x84   : > { %p39_p13 = scmp.eq.s32.totalorder %s38_s8, 0  ;;  %p49_p8 = scmp.eq.s32.totalorder %s5527_s28, 0 }
  0x85   : > { %p6587_p10 = scmp.eq.s32.totalorder %s5649_s29, 1  ;;  %p4998_p5 = scmp.lt.s32.totalorder %s5527_s28, 2 }
  0x86   : > { %s5798_s30 = scalar_select %p39_p13, %s5523_s27, %s41_s11  }
  0x87   : > { %p50_p6 = por %p49_p8, %p48_p4  ;;  %p5802_p3 = por %p6587_p10, %p48_p4 }
  0x88   : > { %s434_s17 = sand.u32 1, %s5523_s27   ;;  %s4295_s10 = sshll.u32 %s5527_s28, 8 }
  0x89   : > { %s4167_s20 = sshll.u32 %s434_s17, 4  ;;  %s6589_s0 = sld [smem:[#allocation22_spill]] }
  0x8a   : > { %s438_s23 = scalar_lea.vmem [#allocation2], %s4167_s20  ;;  %p5816_p11 = pnand %p4998_p5, %p50_p6 }
  0x8b   : > { %s445_s24 = sshll.u32 %s438_s23, 4  ;;  %s6591_s1 = sld [smem:[#allocation23_spill]]  ;;  %s5814_s24 = int_to_ptr.vmem [resolvable:$true] %s445_s24 }
  0x8c   : > { %s459_s25 = scalar_lea.vmem [#allocation5], %s4167_s20  ;;  %s5827_s13 = scalar_lea.sflag [#allocation3], %s434_s17 }
  0x8d   : > { %s5825_s15 = sshll.u32 %s459_s25, 4  ;;  %p5387_p9 = pneg %p5816_p11  ;;  %s5859_s15 = int_to_ptr.vmem [resolvable:$true] %s5825_s15 }
  0x8f   : > { %s5812_s18 = scalar_lea.hbm %s6589_s0, %s4295_s10  ;;  %s5390_s8 = scalar_lea.hbm %s6589_s0, 512 }
  0x90   : > { %s5385_s23 = scalar_lea.hbm %s5812_s18, 256  ;;  %p5391_p1 = scmp.lt.u32.totalorder %s5812_s18, %s6589_s0 }
  0x91   : > { %s5823_s22 = scalar_lea.hbm %s6591_s1, %s4295_s10  ;;  %p5386_p7 = scmp.ne.s32.totalorder %s5812_s18, %s5385_s23 }
  0x92   : > { %p5392_p2 = scmp.lt.u32.totalorder %s5390_s8, %s5385_s23  ;;  %p5394_p4 = scmp.lt.u32.totalorder %s5385_s23, %s5812_s18 }
  0x93   : > { %p5388_p12 = pnand %p5387_p9, %p5386_p7 }
  0x94   : > { %p5393_p13 = por %p5392_p2, %p5391_p1 }
  0x95   : > { %p5389_p0 = pneg %p5388_p12 }
  0x96   : > { %p5395_p8 = por %p5394_p4, %p5393_p13 }
  0x98   : > { %p5396_p6 = pnand %p5395_p8, %p5389_p0 }
  0x9a   : > { %5399 = shalt.err (!%p5396_p6)
}
  0x9b   : > { %s5400_s17 = scalar_lea.vmem %s5814_s24, 256  ;;  %s5537_s5 = smov [#allocation2]  }
  0x9c   : > { %p5401_p10 = scmp.ne.s32.totalorder %s5814_s24, %s5400_s17  ;;  %s5405_s7 = sshll.u32 %s5537_s5, 4  ;;  %s5406_s7 = int_to_ptr.vmem [resolvable:$false] %s5405_s7 }
  0x9d   : > { %s5407_s20 = scalar_lea.vmem %s5406_s7, 512  ;;  %p5408_p12 = scmp.lt.s32.totalorder %s5814_s24, %s5406_s7 }
  0x9e   : > { %p5403_p5 = pnand %p5401_p10, %p5387_p9  ;;  %p5409_p1 = scmp.lt.s32.totalorder %s5407_s20, %s5400_s17 }
  0xa0   : > { %p5404_p7 = pneg %p5403_p5  ;;  %p5410_p2 = por %p5409_p1, %p5408_p12 }
  0xa2   : > { %p5411_p13 = pnand %p5410_p2, %p5404_p7 }
  0xa4   : > { %5414 = shalt.err (!%p5411_p13)
}
  0xa5   : > { %s6592_s25 = smov 8   ;;  %s6593_s23 = smov 128  }
  0xa6   : > { %4986 = dma.hbm_to_vmem [thread:$0]  (!%p5816_p11), %s5812_s18, 256, %s5814_s24, %s5827_s13, %s6593_s23, %s6593_s23, %s6592_s25  }
  0xa7   : > { %s455_s8 = sand.u32 1, %s5527_s28   ;;  %s5415_s10 = scalar_lea.hbm %s5823_s22, 256 }
  0xa8   : > { %s5862_s11 = scalar_lea.sflag [#allocation6], %s455_s8  ;;  %p5416_p0 = scmp.ne.s32.totalorder %s5823_s22, %s5415_s10 }
  0xa9   : > { %s5420_s7 = scalar_lea.hbm %s6591_s1, 512  ;;  %p5421_p6 = scmp.lt.u32.totalorder %s5823_s22, %s6591_s1 }
  0xaa   : > { %p5418_p4 = pnand %p5416_p0, %p5387_p9  ;;  %p5422_p10 = scmp.lt.u32.totalorder %s5420_s7, %s5415_s10 }
  0xab   : > { %p5424_p7 = scmp.lt.u32.totalorder %s5415_s10, %s5823_s22 }
  0xac   : > { %p5419_p8 = pneg %p5418_p4  ;;  %p5423_p5 = por %p5422_p10, %p5421_p6 }
  0xae   : > { %p5425_p12 = por %p5424_p7, %p5423_p5 }
  0xb0   : > { %p5426_p1 = pnand %p5425_p12, %p5419_p8 }
  0xb2   : > { %5429 = shalt.err (!%p5426_p1)
}
  0xb3   : > { %s5430_s13 = scalar_lea.vmem %s5859_s15, 256  ;;  %s5538_s18 = smov [#allocation5]  }
  0xb4   : > { %p5431_p2 = scmp.ne.s32.totalorder %s5859_s15, %s5430_s13  ;;  %s5435_s24 = sshll.u32 %s5538_s18, 4  ;;  %s5436_s24 = int_to_ptr.vmem [resolvable:$false] %s5435_s24 }
  0xb5   : > { %s5437_s0 = scalar_lea.vmem %s5436_s24, 512  ;;  %p5438_p4 = scmp.lt.s32.totalorder %s5859_s15, %s5436_s24 }
  0xb6   : > { %p5433_p13 = pnand %p5431_p2, %p5387_p9  ;;  %p5439_p6 = scmp.lt.s32.totalorder %s5437_s0, %s5430_s13 }
  0xb8   : > { %p5434_p0 = pneg %p5433_p13  ;;  %p5440_p10 = por %p5439_p6, %p5438_p4 }
  0xba   : > { %p5441_p5 = pnand %p5440_p10, %p5434_p0 }
  0xbc   : > { %5444 = shalt.err (!%p5441_p5)
}
  0xbd   : > { %4989 = dma.hbm_to_vmem [thread:$0]  (!%p5816_p11), %s5823_s22, 256, %s5859_s15, %s5862_s11, %s6593_s23, %s6593_s23, %s6592_s25  }
  0xbe   : > { %p6594_p9 = scmp.ne.s32.totalorder %s6582_s16, 0 }
  0xbf   : > { %s5894_s8 = sand.u32 (!%p6594_p9), 1, %s5519_s26   ;;  %p6595_p8 = scmp.ne.s32.totalorder (!%p6594_p9), %s6579_s14, 0 }
  0xc0   : > { %478 = sbr.rel (%p6594_p9) target bundleno = 10463 (0x28df), region = 72  ;;  %s4174_s10 = sshll.u32 (!%p6594_p9), %s5894_s8, 4 }
  0xc1   : > { %s481_s17 = scalar_lea.sflag (!%p6594_p9), [#allocation3], %s5894_s8  ;;  %s484_s5 = scalar_lea.vmem (!%p6594_p9), [#allocation2], %s4174_s10 }
  0xc7   : > { %5490 = dma.done.wait (%p6595_p8), %s481_s17, 256  }
  0xc8   : > { %5492 = vsyncadd (%p6595_p8), %s481_s17, 4294967040  ;;  %s489_s15 = sand.u32 1, %s5649_s29   ;;  %s5903_s16 = scalar_lea.vmem [#allocation5], %s4174_s10 }
  0xc9   : > { %s490_s21 = scalar_lea.sflag [#allocation6], %s489_s15 }
  0xca   : > { %5494 = dma.done.wait (%p6595_p8), %s490_s21, 256  }
  0xcb   : > { %5496 = vsyncadd (%p6595_p8), %s490_s21, 4294967040  ;;  %p6596_p11 = scmp.eq.s32.totalorder %s5649_s29, 0 }
  0xcd   : > { %5498 = dma.done.wait (%p6596_p11), [#allocation6], 32   ;;  %p6597_p7 = pmov %p6596_p11 }
  0xcf   : > { %5500 = vsyncadd (%p6597_p7), [#allocation6], 4294967264  ;;  %p6598_p12 = pmov %p6597_p7 }
  0xd0   : > { %p6599_p1 = pmov %p6597_p7 }
  0xd1   : > { %5502 = dma.done.wait (%p6598_p12), [#allocation9], 64  }
  0xd2   : > { %5504 = vsyncadd (%p6599_p1), [#allocation9], 4294967232  ;;  %p6600_p2 = pmov %p6599_p1 }
  0xd3   : > { %p6601_p13 = pmov %p6599_p1 }
  0xd4   : > { %5506 = dma.done.wait (%p6600_p2), [#allocation12], 512  }
  0xd5   : > { %5508 = vsyncadd (%p6601_p13), [#allocation12], 4294966784  ;;  %vm570_vm0 = vcmask 261120   ;;  %v566_v0 = vld [vmem:[%s6525_s2] sm:$0xff]  ;;  %v567_v1 = vld [vmem:[%s6525_s2 + $0x8] sm:$0xff]  ;;  %vm658_vm1 = vcmask 64512  }
  0xd6   : > { %v568_v2 = vld [vmem:[%s6525_s2 + $0x10] sm:$0xff]  ;;  %v4746_v3 = vpack.c.bf16 %v567_v1, %v566_v0  ;;  %v569_v4 = vld [vmem:[%s6525_s2 + $0x18] sm:$0xff]  ;;  %s6566_s18 = smov 96   ;;  %vm5955_vm2 = vmpackc.low %vm658_vm1, %vm658_vm1  ;;  %v5540_v19 = vmov -1e+09   ;;  %vm746_vm5 = vcmask 130048  }
  0xd7   : > { %v5933_v5 = vld [vmem:[%s484_s5] sm:$0xff]  ;;  %v4750_v6 = vpack.c.bf16 %v569_v4, %v568_v2  ;;  %v5937_v7 = vld [vmem:[%s484_s5 + $0x8] sm:$0xff]  ;;  %s5541_s24 = smov 64   ;;  %s6565_s0 = smov 88   ;;  %vm1496_vm6 = vcmask 195584   ;;  %vm1738_vm7 = vcmask 523264  }
  0xd8   : > { %4460 = vmatprep.mubr.msk.f32.mxu0 %vm570_vm0, %v5933_v5  ;;  %4747 = vmatprep.subr.bf16.mxu0 %v4746_v3  ;;  %v559_v16 = vld [vmem:[%s5903_s16 + $0x8] sm:$0xff]  ;;  %v558_v17 = vld [vmem:[%s5903_s16] sm:$0xff]  ;;  %s6567_s10 = smov 120   ;;  %s5544_s17 = smov 56   ;;  %vm5555_vm8 = vmmov 0   ;;  %vm3309_vm9 = vcmask 122880  }
  0xd9   : > { %4749 = vmatpush3.bf16.msra.mxu0 %v4746_v3  ;;  %vm561_vm3 = vcmp.gt.f32.partialorder %v559_v16, 0.0  ;;  %vm560_vm4 = vcmp.gt.f32.partialorder %v558_v17, 0.0  ;;  %s6564_s5 = smov 80   ;;  %s6562_s15 = smov 112   ;;  %vm4018_vm10 = vcmask 253952  }
  0xda   : > { %4751 = vmatprep.subr.bf16.mxu0 %v4750_v6  ;;  %v5967_v20 = vsel %vm561_vm3, 0.0, %v5540_v19  ;;  %v5969_v23 = vsel %vm560_vm4, 0.0, %v5540_v19  ;;  %s6560_s21 = smov 72   ;;  %s6558_s16 = smov 104  }
  0xdb   : > { %s6555_s14 = smov 48   ;;  %s6553_s22 = smov 8  }
  0xdc   : > { %s6552_s25 = smov 40   ;;  %s6550_s23 = smov 16  }
  0xdd   : > { %4753 = vmatpush3.bf16.msra.mxu0 %v4750_v6  ;;  %s6556_s11 = smov 24   ;;  %s6609_s13 = smov 104  }
  0xde   : > { %s6618_s1 = smov 96   ;;  %s6621_s7 = sld [smem:[#allocation30_spill]] }
  0xe0   : > { %4461 = vmatmul.mubr.msk.f32.vlgmr.msra.gmra.mrb[0].mxu0 %vm570_vm0, %v5937_v7 }
 0x1b3   : > { %v5941_v8 = vpop.f32.mrb[0].mxu0 }
 0x1b4   : > { %v5943_v9 = vpop.f32.mrb[1].mxu0 }
 0x1b5   : > { %4467 = vmatprep.mubr.msk.f32.mxu1 %vm658_vm1, %v5943_v9  ;;  %v5949_v10 = vpack.i.bf16 %v5941_v8, %v5943_v9 }
 0x1b7   : > { %5063 = vrot.lane.b32.xlu0 %v5949_v10, %s6566_s18 }
 0x229   : > { %v5064_v11 = vpop.permute.xlu0 %5063 }
 0x22a   : > { %v5066_v12 = vunpack.i.h.bf16 %v5064_v11  ;;  %v5065_v13 = vunpack.i.l.bf16 %v5064_v11 }
 0x22c   : > { %v4754_v15 = vpack.c.bf16 %v5066_v12, %v5065_v13 }
 0x22e   : > { %4756 = vmatprep.subr.msk.bf16.mxu1 %vm5955_vm2, %v4754_v15 }
 0x22f   : > { %4759 = vmatpush3.bf16.xpose.msk.msra.mxu1 %vm5955_vm2, %v4754_v15 }
 0x236   : > { %4468 = vmatmul.mubr.msk.f32.vlgmr.msra.gmra.mrb[0].mxu1 %vm658_vm1, %v5941_v8 }
 0x309   : > { %v4469_v18 = vpop.f32.mrb[0].mxu1 }
 0x30a   : > { %v743_v21 = vmul.f32 0.35355338, %v4469_v18  ;;  %v733_v22 = vpop.f32.mrb[1].mxu1 }
 0x30b   : > { %v742_v24 = vmul.f32 0.35355338, %v733_v22 }
 0x30c   : > { %v745_v25 = vadd.f32 %v743_v21, %v5967_v20 }
 0x30d   : > { %v744_v26 = vadd.f32 %v742_v24, %v5969_v23 }
 0x30e   : > { %v750_v27 = vsel %vm746_vm5, %v745_v25, -inf }
 0x30f   : > { %751 = vmax.xlane.f32.xlu1 %v750_v27  ;;  %v747_v28 = vsel %vm746_vm5, %v744_v26, -inf }
 0x310   : > { %748 = vmax.xlane.f32.xlu0 %v747_v28 }
 0x320   : > { %5068 = vrot.lane.b32.xlu1 %v5949_v10, %s5541_s24 }
 0x324   : > { %5073 = vrot.lane.b32.xlu1 %v5949_v10, %s6565_s0 }
 0x326   : > { %858 = vrot.lane.b32.xlu0 %v5941_v8, %s6567_s10 }
 0x39c   : > { %v752_v29 = vpop.xlane.xlu1 %751 }
 0x39d   : > { %v754_v30 = vsub.f32 %v745_v25, %v752_v29  ;;  %v749_v31 = vpop.xlane.xlu0 %748 }
 0x39e   : > { %v753_v32 = vsub.f32 %v744_v26, %v749_v31 }
 0x39f   : > { %v757_v33 = vmul.f32 1.442695, %v754_v30 }
 0x3a0   : > { %v755_v34 = vmul.f32 1.442695, %v753_v32  ;;  %v5069_v35 = vpop.permute.xlu1 %5068 }
 0x3a1   : > { %5177 = vpow2.f32 %v757_v33  ;;  %v5071_v36 = vunpack.i.h.bf16 %v5069_v35  ;;  %v5070_v37 = vunpack.i.l.bf16 %v5069_v35  ;;  %v859_v54 = vpop.permute.xlu0 %858 }
 0x3a2   : > { %5179 = vpow2.f32 %v755_v34 }
 0x3a3   : > { %v4760_v38 = vpack.c.bf16 %v5071_v36, %v5070_v37 }
 0x3a4   : > { %v5074_v39 = vpop.permute.xlu1 %5073 }
 0x3a5   : > { %v5076_v40 = vunpack.i.h.bf16 %v5074_v39  ;;  %v5075_v41 = vunpack.i.l.bf16 %v5074_v39  ;;  %4761 = vmatprep.subr.bf16.mxu1 %v4760_v38 }
 0x3a6   : > { %4763 = vmatpush3.bf16.msra.mxu1 %v4760_v38 }
 0x3a7   : > { %v4764_v42 = vpack.c.bf16 %v5076_v40, %v5075_v41 }
 0x3a9   : > { %4766 = vmatprep.subr.msk.bf16.mxu1 %vm5955_vm2, %v4764_v42 }
 0x3ab   : > { %v5178_v43 = vpop.eup %5177 }
 0x3ac   : > { %v762_v44 = vsel %vm746_vm5, %v5178_v43, 0.0  ;;  %v5180_v45 = vpop.eup %5179 }
 0x3ad   : > { %763 = vadd.xlane.f32.xlu1 %v762_v44  ;;  %v759_v46 = vsel %vm746_vm5, %v5180_v45, 0.0 }
 0x3b1   : > { %760 = vadd.xlane.f32.xlu1 %v759_v46 }
 0x3c2   : > { %856 = vrot.lane.b32.xlu1 %v5943_v9, %s6567_s10 }
 0x43a   : > { %v764_v47 = vpop.xlane.xlu1 %763 }
 0x43b   : > { %5181 = vrcp.f32 %v764_v47 }
 0x43e   : > { %v761_v48 = vpop.xlane.xlu1 %760 }
 0x43f   : > { %5183 = vrcp.f32 %v761_v48 }
 0x442   : > { %v857_v53 = vpop.permute.xlu1 %856 }
 0x445   : > { %v5182_v49 = vpop.eup %5181 }
 0x446   : > { %v768_v52 = vmul.f32 %v5182_v49, %v5178_v43 }
 0x449   : > { %v5184_v50 = vpop.eup %5183 }
 0x44a   : > { %v767_v51 = vmul.f32 %v5184_v50, %v5180_v45 }
 0x44c   : > { %4474 = vmatprep.mubr.msk.f32.mxu1 %vm746_vm5, %v767_v51 }
 0x44d   : > { %4475 = vmatmul.mubr.msk.f32.vlgmr.msra.gmra.mrb[2].mxu1 %vm746_vm5, %v768_v52 }
 0x44e   : > { %4769 = vmatpush3.bf16.xpose.msk.msra.mxu1 %vm5955_vm2, %v4764_v42  ;;  %4481 = vmatprep.mubr.msk.f32.mxu1 %vm658_vm1, %v857_v53 }
 0x455   : > { %4482 = vmatmul.mubr.msk.f32.vlgmr.msra.gmra.mrb[4].mxu1 %vm658_vm1, %v859_v54 }
 0x520   : > { %v5993_v55 = vpop.f32.mrb[2].mxu1 }
 0x521   : > { %v5995_v56 = vpop.f32.mrb[3].mxu1 }
 0x528   : > { %v4483_v57 = vpop.f32.mrb[4].mxu1 }
 0x529   : > { %v948_v58 = vmul.f32 0.35355338, %v4483_v57  ;;  %v938_v59 = vpop.f32.mrb[5].mxu1 }
 0x52a   : > { %v947_v60 = vmul.f32 0.35355338, %v938_v59 }
 0x52b   : > { %v950_v61 = vadd.f32 %v948_v58, %v5967_v20 }
 0x52c   : > { %v949_v62 = vadd.f32 %v947_v60, %v5969_v23 }
 0x52d   : > { %v954_v63 = vsel %vm746_vm5, %v950_v61, -inf }
 0x52e   : > { %955 = vmax.xlane.f32.xlu0 %v954_v63  ;;  %v951_v0 = vsel %vm746_vm5, %v949_v62, -inf }
 0x52f   : > { %952 = vmax.xlane.f32.xlu1 %v951_v0 }
 0x540   : > { %5078 = vrot.lane.b32.xlu1 %v5949_v10, %s5544_s17 }
 0x544   : > { %5083 = vrot.lane.b32.xlu0 %v5949_v10, %s6564_s5  ;;  %1060 = vrot.lane.b32.xlu1 %v5943_v9, %s6562_s15 }
 0x5bb   : > { %v956_v1 = vpop.xlane.xlu0 %955 }
 0x5bc   : > { %v958_v2 = vsub.f32 %v950_v61, %v956_v1  ;;  %v953_v3 = vpop.xlane.xlu1 %952 }
 0x5bd   : > { %v957_v4 = vsub.f32 %v949_v62, %v953_v3 }
 0x5be   : > { %v961_v6 = vmul.f32 1.442695, %v958_v2 }
 0x5bf   : > { %v959_v11 = vmul.f32 1.442695, %v957_v4  ;;  %v5084_v12 = vpop.permute.xlu0 %5083 }
 0x5c0   : > { %5185 = vpow2.f32 %v961_v6  ;;  %v5079_v13 = vpop.permute.xlu1 %5078  ;;  %v5086_v15 = vunpack.i.h.bf16 %v5084_v12  ;;  %v5085_v16 = vunpack.i.l.bf16 %v5084_v12 }
 0x5c1   : > { %v5081_v17 = vunpack.i.h.bf16 %v5079_v13  ;;  %v5080_v18 = vunpack.i.l.bf16 %v5079_v13  ;;  %5187 = vpow2.f32 %v959_v11 }
 0x5c2   : > { %v4774_v21 = vpack.c.bf16 %v5086_v15, %v5085_v16 }
 0x5c3   : > { %v4770_v19 = vpack.c.bf16 %v5081_v17, %v5080_v18 }
 0x5c4   : > { %v1061_v27 = vpop.permute.xlu1 %1060 }
 0x5c5   : > { %4771 = vmatprep.subr.bf16.mxu0 %v4770_v19 }
 0x5c6   : > { %4773 = vmatpush3.bf16.msra.mxu0 %v4770_v19 }
 0x5c7   : > { %4776 = vmatprep.subr.msk.bf16.mxu0 %vm5955_vm2, %v4774_v21 }
 0x5ca   : > { %v5186_v22 = vpop.eup %5185 }
 0x5cb   : > { %v966_v24 = vsel %vm746_vm5, %v5186_v22, 0.0  ;;  %v5188_v25 = vpop.eup %5187 }
 0x5cc   : > { %967 = vadd.xlane.f32.xlu1 %v966_v24  ;;  %v963_v26 = vsel %vm746_vm5, %v5188_v25, 0.0 }
 0x5d0   : > { %964 = vadd.xlane.f32.xlu1 %v963_v26 }
 0x5e1   : > { %1062 = vrot.lane.b32.xlu1 %v5941_v8, %s6562_s15  ;;  %s6612_s15 = smov 40  }
 0x659   : > { %v968_v28 = vpop.xlane.xlu1 %967 }
 0x65a   : > { %5189 = vrcp.f32 %v968_v28 }
 0x65d   : > { %v965_v29 = vpop.xlane.xlu1 %964 }
 0x65e   : > { %5191 = vrcp.f32 %v965_v29 }
 0x661   : > { %v1063_v34 = vpop.permute.xlu1 %1062 }
 0x664   : > { %v5190_v30 = vpop.eup %5189 }
 0x665   : > { %v972_v33 = vmul.f32 %v5190_v30, %v5186_v22 }
 0x668   : > { %v5192_v31 = vpop.eup %5191 }
 0x669   : > { %v971_v32 = vmul.f32 %v5192_v31, %v5188_v25 }
 0x66b   : > { %4488 = vmatprep.mubr.msk.f32.mxu0 %vm746_vm5, %v971_v32 }
 0x66c   : > { %4489 = vmatmul.mubr.msk.f32.vlgmr.msra.gmra.mrb[2].mxu0 %vm746_vm5, %v972_v33 }
 0x66d   : > { %4779 = vmatpush3.bf16.xpose.msk.msra.mxu0 %vm5955_vm2, %v4774_v21  ;;  %4495 = vmatprep.mubr.msk.f32.mxu0 %vm658_vm1, %v1061_v27 }
 0x674   : > { %4496 = vmatmul.mubr.msk.f32.vlgmr.msra.gmra.mrb[4].mxu0 %vm658_vm1, %v1063_v34 }
 0x73f   : > { %v6019_v35 = vpop.f32.mrb[2].mxu0 }
 0x740   : > { %v6021_v36 = vpop.f32.mrb[3].mxu0 }
 0x747   : > { %v4497_v37 = vpop.f32.mrb[4].mxu0 }
 0x748   : > { %v1152_v38 = vmul.f32 0.35355338, %v4497_v37  ;;  %v1142_v39 = vpop.f32.mrb[5].mxu0 }
 0x749   : > { %v1151_v40 = vmul.f32 0.35355338, %v1142_v39 }
 0x74a   : > { %v1154_v41 = vadd.f32 %v1152_v38, %v5967_v20 }
 0x74b   : > { %v1153_v42 = vadd.f32 %v1151_v40, %v5969_v23 }
 0x74c   : > { %v1158_v43 = vsel %vm746_vm5, %v1154_v41, -inf }
 0x74d   : > { %1159 = vmax.xlane.f32.xlu0 %v1158_v43  ;;  %v1155_v44 = vsel %vm746_vm5, %v1153_v42, -inf }
 0x74e   : > { %1156 = vmax.xlane.f32.xlu1 %v1155_v44 }
 0x7da   : > { %v1160_v45 = vpop.xlane.xlu0 %1159 }
 0x7db   : > { %v1162_v46 = vsub.f32 %v1154_v41, %v1160_v45  ;;  %v1157_v47 = vpop.xlane.xlu1 %1156  ;;  %v1500_v45 = vld [vmem:[%s6526_s3 + $0x8] sm:$0xff] }
 0x7dc   : > { %v1161_v48 = vsub.f32 %v1153_v42, %v1157_v47 }
 0x7dd   : > { %v1165_v49 = vmul.f32 1.442695, %v1162_v46  ;;  %v1501_v46 = vld [vmem:[%s6526_s3 + $0x10] sm:$0xff] }
 0x7de   : > { %v1163_v50 = vmul.f32 1.442695, %v1161_v48  ;;  %v1502_v48 = vld [vmem:[%s6526_s3 + $0x18] sm:$0xff] }
 0x7df   : > { %5193 = vpow2.f32 %v1165_v49  ;;  %v4798_v49 = vpack.c.bf16 %v1502_v48, %v1501_v46 }
 0x7e0   : > { %5195 = vpow2.f32 %v1163_v50 }
 0x7e9   : > { %v5194_v51 = vpop.eup %5193 }
 0x7ea   : > { %v5196_v52 = vpop.eup %5195  ;;  %v1170_v53 = vsel %vm746_vm5, %v5194_v51, 0.0 }
 0x7eb   : > { %1171 = vadd.xlane.f32.xlu1 %v1170_v53  ;;  %v1167_v54 = vsel %vm746_vm5, %v5196_v52, 0.0 }
 0x7ec   : > { %1168 = vadd.xlane.f32.xlu0 %v1167_v54 }
 0x7fc   : > { %5093 = vrot.lane.b32.xlu1 %v5949_v10, %s6560_s21  ;;  %s6613_s21 = smov 16  }
 0x800   : > { %1264 = vrot.lane.b32.xlu1 %v5943_v9, %s6558_s16 }
 0x802   : > { %5088 = vrot.lane.b32.xlu0 %v5949_v10, %s6555_s14  ;;  %s6610_s14 = smov 48  }
 0x806   : > { %1266 = vrot.lane.b32.xlu0 %v5941_v8, %s6558_s16  ;;  %s6604_s16 = sld [smem:[#allocation27_spill]] }
 0x878   : > { %v1172_v57 = vpop.xlane.xlu1 %1171 }
 0x879   : > { %5197 = vrcp.f32 %v1172_v57  ;;  %v1169_v58 = vpop.xlane.xlu0 %1168 }
 0x87a   : > { %5199 = vrcp.f32 %v1169_v58 }
 0x87c   : > { %v5094_v59 = vpop.permute.xlu1 %5093 }
 0x87d   : > { %v5089_v60 = vpop.permute.xlu0 %5088  ;;  %v5096_v61 = vunpack.i.h.bf16 %v5094_v59  ;;  %v5095_v62 = vunpack.i.l.bf16 %v5094_v59 }
 0x87e   : > { %v5091_v63 = vunpack.i.h.bf16 %v5089_v60  ;;  %v5090_v0 = vunpack.i.l.bf16 %v5089_v60 }
 0x87f   : > { %v4784_v2 = vpack.c.bf16 %v5096_v61, %v5095_v62 }
 0x880   : > { %v4780_v1 = vpack.c.bf16 %v5091_v63, %v5090_v0  ;;  %v1265_v6 = vpop.permute.xlu1 %1264 }
 0x881   : > { %v1267_v11 = vpop.permute.xlu0 %1266 }
 0x882   : > { %4781 = vmatprep.subr.bf16.mxu1 %v4780_v1 }
 0x883   : > { %v5198_v9 = vpop.eup %5197  ;;  %4783 = vmatpush3.bf16.msra.mxu1 %v4780_v1 }
 0x884   : > { %v5200_v3 = vpop.eup %5199  ;;  %4786 = vmatprep.subr.msk.bf16.mxu1 %vm5955_vm2, %v4784_v2  ;;  %v1176_v4 = vmul.f32 %v5198_v9, %v5194_v51 }
 0x885   : > { %v1175_v8 = vmul.f32 %v5200_v3, %v5196_v52 }
 0x887   : > { %4502 = vmatprep.mubr.msk.f32.mxu1 %vm746_vm5, %v1175_v8 }
 0x888   : > { %4503 = vmatmul.mubr.msk.f32.vlgmr.msra.gmra.mrb[6].mxu1 %vm746_vm5, %v1176_v4 }
 0x889   : > { %4509 = vmatprep.mubr.msk.f32.mxu1 %vm658_vm1, %v1265_v6 }
 0x88c   : > { %4789 = vmatpush3.bf16.xpose.msk.msra.mxu1 %vm5955_vm2, %v4784_v2 }
 0x893   : > { %4510 = vmatmul.mubr.msk.f32.vlgmr.msra.gmra.mrb[8].mxu1 %vm658_vm1, %v1267_v11 }
 0x95b   : > { %v4504_v12 = vpop.f32.mrb[6].mxu1 }
 0x95c   : > { %v1255_v13 = vpop.f32.mrb[7].mxu1 }
 0x966   : > { %v4511_v15 = vpop.f32.mrb[8].mxu1 }
 0x967   : > { %v1356_v16 = vmul.f32 0.35355338, %v4511_v15  ;;  %v1346_v17 = vpop.f32.mrb[9].mxu1 }
 0x968   : > { %v1355_v18 = vmul.f32 0.35355338, %v1346_v17 }
 0x969   : > { %v1358_v19 = vadd.f32 %v1356_v16, %v5967_v20 }
 0x96a   : > { %v1357_v21 = vadd.f32 %v1355_v18, %v5969_v23 }
 0x96b   : > { %v1362_v22 = vsel %vm746_vm5, %v1358_v19, -inf }
 0x96c   : > { %1363 = vmax.xlane.f32.xlu0 %v1362_v22  ;;  %v1359_v24 = vsel %vm746_vm5, %v1357_v21, -inf  ;;  %v1631_v22 = vld [vmem:[%s6529_s6 + $0x10] sm:$0xff] }
 0x96d   : > { %1360 = vmax.xlane.f32.xlu1 %v1359_v24  ;;  %v1632_v24 = vld [vmem:[%s6529_s6 + $0x18] sm:$0xff] }
 0x9f9   : > { %v1364_v25 = vpop.xlane.xlu0 %1363 }
 0x9fa   : > { %v1366_v26 = vsub.f32 %v1358_v19, %v1364_v25  ;;  %v1361_v27 = vpop.xlane.xlu1 %1360  ;;  %v1630_v19 = vld [vmem:[%s6529_s6 + $0x8] sm:$0xff]  ;;  %v4806_v25 = vpack.c.bf16 %v1632_v24, %v1631_v22  ;;  %v4220_v22 = vld [vmem:[%s6525_s2 + $0x38] sm:$0xff] }
 0x9fb   : > { %v1365_v28 = vsub.f32 %v1357_v21, %v1361_v27  ;;  %v1724_v27 = vld [vmem:[%s6604_s16 + $0x8] sm:$0xff] }
 0x9fc   : > { %v1369_v29 = vmul.f32 1.442695, %v1366_v26  ;;  %v1723_v26 = vld [vmem:[%s6604_s16] sm:$0xff] }
 0x9fd   : > { %v1367_v30 = vmul.f32 1.442695, %v1365_v28  ;;  %v1725_v28 = vld [vmem:[%s6604_s16 + $0x10] sm:$0xff] }
 0x9fe   : > { %5201 = vpow2.f32 %v1369_v29  ;;  %v4810_v29 = vpack.c.bf16 %v1724_v27, %v1723_v26 }
 0x9ff   : > { %5203 = vpow2.f32 %v1367_v30  ;;  %v1726_v30 = vld [vmem:[%s6604_s16 + $0x18] sm:$0xff] }
 0xa08   : > { %v5202_v31 = vpop.eup %5201 }
 0xa09   : > { %v5204_v32 = vpop.eup %5203  ;;  %v1374_v33 = vsel %vm746_vm5, %v5202_v31, 0.0 }
 0xa0a   : > { %1375 = vadd.xlane.f32.xlu1 %v1374_v33  ;;  %v1371_v34 = vsel %vm746_vm5, %v5204_v32, 0.0  ;;  %v1728_v33 = vld [vmem:[%s6604_s16 + $0x28] sm:$0xff] }
 0xa0b   : > { %1372 = vadd.xlane.f32.xlu0 %v1371_v34 }
 0xa1b   : > { %1470 = vrot.lane.b32.xlu1 %v6021_v36, %s6553_s22 }
 0xa1f   : > { %1472 = vrot.lane.b32.xlu1 %v6019_v35, %s6553_s22  ;;  %s6611_s22 = smov 8  }
 0xa21   : > { %5098 = vrot.lane.b32.xlu0 %v5949_v10, %s6552_s25  ;;  %v1499_v10 = vld [vmem:[%s6526_s3] sm:$0xff]  ;;  %s6605_s25 = sld [smem:[#allocation24_spill]] }
 0xa22   : > { %v4794_v47 = vpack.c.bf16 %v1500_v45, %v1499_v10 }
 0xa23   : > { %1480 = vrot.lane.b32.xlu1 %v4504_v12, %s6550_s23 }
 0xa25   : > { %1478 = vrot.lane.b32.xlu0 %v1255_v13, %s6550_s23 }
 0xa27   : > { %s6606_s23 = smov %s6605_s25 }
 0xa97   : > { %v1376_v37 = vpop.xlane.xlu1 %1375 }
 0xa98   : > { %5205 = vrcp.f32 %v1376_v37  ;;  %v1373_v38 = vpop.xlane.xlu0 %1372 }
 0xa99   : > { %5207 = vrcp.f32 %v1373_v38 }
 0xa9b   : > { %v1471_v52 = vpop.permute.xlu1 %1470 }
 0xa9c   : > { %v5099_v39 = vpop.permute.xlu0 %5098  ;;  %v1492_v58 = vsel %vm658_vm1, %v5995_v56, %v1471_v52 }
 0xa9d   : > { %v5101_v40 = vunpack.i.h.bf16 %v5099_v39  ;;  %v5100_v41 = vunpack.i.l.bf16 %v5099_v39 }
 0xa9f   : > { %v4790_v36 = vpack.c.bf16 %v5101_v40, %v5100_v41  ;;  %v1473_v53 = vpop.permute.xlu1 %1472 }
 0xaa0   : > { %v1479_v57 = vpop.permute.xlu0 %1478  ;;  %v1493_v60 = vsel %vm658_vm1, %v5993_v55, %v1473_v53  ;;  %v4210_v53 = vld [vmem:[#allocation8] ss:$0 sm:$0xff] }
 0xaa1   : > { %4791 = vmatprep.subr.bf16.mxu0 %v4790_v36  ;;  %v1494_v61 = vsel %vm746_vm5, %v1492_v58, %v1479_v57 }
 0xaa2   : > { %v5206_v42 = vpop.eup %5205  ;;  %4793 = vmatpush3.bf16.msra.mxu0 %v4790_v36 }
 0xaa3   : > { %v5208_v35 = vpop.eup %5207  ;;  %v1380_v44 = vmul.f32 %v5206_v42, %v5202_v31  ;;  %4795 = vmatprep.subr.bf16.mxu0 %v4794_v47  ;;  %v1481_v54 = vpop.permute.xlu1 %1480  ;;  %v4814_v31 = vpack.c.bf16 %v1726_v30, %v1725_v28 }
 0xaa4   : > { %v1379_v43 = vmul.f32 %v5208_v35, %v5204_v32  ;;  %v1495_v63 = vsel %vm746_vm5, %v1493_v60, %v1481_v54  ;;  %v1727_v32 = vld [vmem:[%s6604_s16 + $0x20] sm:$0xff] }
 0xaa5   : > { %v4818_v34 = vpack.c.bf16 %v1728_v33, %v1727_v32  ;;  %v6124_v35 = vld [vmem:[%s6605_s25] ss:$0 sm:$0xff]  ;;  %s6614_s25 = smov 24  }
 0xaa6   : > { %4516 = vmatprep.mubr.msk.f32.mxu0 %vm746_vm5, %v1379_v43 }
 0xaa7   : > { %4517 = vmatmul.mubr.msk.f32.vlgmr.msra.gmra.mrb[6].mxu0 %vm746_vm5, %v1380_v44  ;;  %v6126_v44 = vld [vmem:[#allocation7] ss:$0 sm:$0xff] }
 0xaa8   : > { %4797 = vmatpush3.bf16.msra.mxu0 %v4794_v47 }
 0xaa9   : > { %4799 = vmatprep.subr.bf16.mxu0 %v4798_v49 }
 0xaac   : > { %4801 = vmatpush3.bf16.msra.mxu0 %v4798_v49 }
 0xaad   : > { %4811 = vmatprep.subr.bf16.mxu0 %v4810_v29 }
 0xb7a   : > { %v4518_v50 = vpop.f32.mrb[6].mxu0 }
 0xb7b   : > { %1488 = vrot.lane.b32.xlu1 %v4518_v50, %s6556_s11  ;;  %v1459_v51 = vpop.f32.mrb[7].mxu0  ;;  %v1729_v50 = vld [vmem:[%s6604_s16 + $0x30] sm:$0xff] }
 0xb7c   : > { %1486 = vrot.lane.b32.xlu0 %v1459_v51, %s6556_s11  ;;  %v1730_v51 = vld [vmem:[%s6604_s16 + $0x38] sm:$0xff]  ;;  %s4021_s11 = scalar_lea.sflag [#allocation4], %s5894_s8 }
 0xb7d   : > { %v4822_v52 = vpack.c.bf16 %v1730_v51, %v1729_v50 }
 0xbed   : > { %v1489_v59 = vpop.permute.xlu1 %1488 }
 0xbee   : > { %v1487_v62 = vpop.permute.xlu0 %1486  ;;  %v1498_v1 = vsel %vm1496_vm6, %v1495_v63, %v1489_v59 }
 0xbef   : > { %v1497_v0 = vsel %vm1496_vm6, %v1494_v61, %v1487_v62  ;;  %v4213_v62 = vld [vmem:[#allocation10] ss:$0 sm:$0xff] }
 0xbf0   : > { %4527 = vmatprep.mubr.msk.f32.mxu0 %vm570_vm0, %v1497_v0 }
 0xbf1   : > { %4528 = vmatmul.mubr.msk.f32.vlgmr.msra.gmra.mrb[8].mxu0 %vm570_vm0, %v1498_v1 }
 0xbf2   : > { %4813 = vmatpush3.bf16.msra.mxu0 %v4810_v29 }
 0xbf3   : > { %4815 = vmatprep.subr.bf16.mxu0 %v4814_v31 }
 0xbf6   : > { %4817 = vmatpush3.bf16.msra.mxu0 %v4814_v31 }
 0xbf7   : > { %4819 = vmatprep.subr.bf16.mxu0 %v4818_v34 }
 0xbfa   : > { %4821 = vmatpush3.bf16.msra.mxu0 %v4818_v34 }
 0xbfb   : > { %4823 = vmatprep.subr.bf16.mxu0 %v4822_v52 }
 0xbfe   : > { %4825 = vmatpush3.bf16.msra.mxu0 %v4822_v52 }
 0xcc4   : > { %v4529_v2 = vpop.f32.mrb[8].mxu0 }
 0xcc5   : > { %v1585_v56 = vadd.f32 %v4529_v2, %v5937_v7  ;;  %v1575_v9 = vpop.f32.mrb[9].mxu0 }
 0xcc6   : > { %v1584_v3 = vadd.f32 %v1575_v9, %v5933_v5  ;;  %v1629_v5 = vld [vmem:[%s6529_s6] sm:$0xff] }
 0xcc7   : > { %v1589_v55 = vsel %vm570_vm0, %v1585_v56, 0.0  ;;  %v4802_v21 = vpack.c.bf16 %v1630_v19, %v1629_v5  ;;  %v4218_v5 = vld [vmem:[%s6525_s2 + $0x28] sm:$0xff] }
 0xcc8   : > { %1590 = vadd.xlane.f32.xlu1 %v1589_v55  ;;  %v1586_v8 = vsel %vm570_vm0, %v1584_v3, 0.0 }
 0xcc9   : > { %1587 = vadd.xlane.f32.xlu0 %v1586_v8  ;;  %4803 = vmatprep.subr.bf16.mxu1 %v4802_v21 }
 0xcca   : > { %4805 = vmatpush3.bf16.msra.mxu1 %v4802_v21  ;;  %v4219_v21 = vld [vmem:[%s6525_s2 + $0x30] sm:$0xff] }
 0xccb   : > { %4807 = vmatprep.subr.bf16.mxu1 %v4806_v25  ;;  %v4830_v24 = vpack.c.bf16 %v4220_v22, %v4219_v21 }
 0xcce   : > { %4809 = vmatpush3.bf16.msra.mxu1 %v4806_v25 }
 0xd55   : > { %v1591_v4 = vpop.xlane.xlu1 %1590 }
 0xd56   : > { %v1594_v6 = vmul.f32 0.03125, %v1591_v4  ;;  %v1588_v11 = vpop.xlane.xlu0 %1587 }
 0xd57   : > { %v1593_v12 = vmul.f32 0.03125, %v1588_v11 }
 0xd58   : > { %v1596_v13 = vsub.f32 %v1585_v56, %v1594_v6 }
 0xd59   : > { %v1595_v15 = vsub.f32 %v1584_v3, %v1593_v12 }
 0xd5a   : > { %v1598_v18 = vmul.f32 %v1596_v13, %v1596_v13 }
 0xd5b   : > { %v1597_v16 = vmul.f32 %v1595_v15, %v1595_v15 }
 0xd5c   : > { %v1602_v7 = vsel %vm570_vm0, %v1598_v18, 0.0 }
 0xd5d   : > { %v1599_v17 = vsel %vm570_vm0, %v1597_v16, 0.0 }
 0xd5e   : > { %1600 = vadd.xlane.f32.xlu0 %v1599_v17 }
 0xd62   : > { %1603 = vadd.xlane.f32.xlu0 %v1602_v7  ;;  %v4217_v7 = vld [vmem:[%s6525_s2 + $0x20] sm:$0xff] }
 0xd63   : > { %v4826_v19 = vpack.c.bf16 %v4218_v5, %v4217_v7 }
 0xd65   : > { %4827 = vmatprep.subr.bf16.mxu1 %v4826_v19 }
 0xdeb   : > { %v1601_v37 = vpop.xlane.xlu0 %1600 }
 0xdec   : > { %v1605_v38 = vmul.f32 0.03125, %v1601_v37 }
 0xdee   : > { %v1607_v39 = vadd.f32 1e-05, %v1605_v38 }
 0xdef   : > { %v1604_v40 = vpop.xlane.xlu0 %1603 }
 0xdf0   : > { %5209 = vrsqrt.f32 %v1607_v39  ;;  %v1606_v41 = vmul.f32 0.03125, %v1604_v40 }
 0xdf2   : > { %v1608_v36 = vadd.f32 1e-05, %v1606_v41 }
 0xdf4   : > { %5211 = vrsqrt.f32 %v1608_v36 }
 0xdfa   : > { %v5210_v42 = vpop.eup %5209 }
 0xdfb   : > { %v1611_v43 = vmul.f32 %v5210_v42, %v1595_v15 }
 0xdfd   : > { %v1619_v10 = vmul.f32 %v6124_v35, %v1611_v43 }
 0xdfe   : > { %v5212_v45 = vpop.eup %5211 }
 0xdff   : > { %v1612_v46 = vmul.f32 %v5212_v45, %v1596_v13  ;;  %v1627_v47 = vadd.f32 %v6126_v44, %v1619_v10 }
 0xe01   : > { %4538 = vmatprep.mubr.msk.f32.mxu1 %vm570_vm0, %v1627_v47  ;;  %v1620_v48 = vmul.f32 %v6124_v35, %v1612_v46 }
 0xe03   : > { %v1628_v49 = vadd.f32 %v6126_v44, %v1620_v48 }
 0xe05   : > { %4539 = vmatmul.mubr.msk.f32.vlgmr.msra.gmra.mrb[10].mxu1 %vm570_vm0, %v1628_v49 }
 0xe06   : > { %4829 = vmatpush3.bf16.msra.mxu1 %v4826_v19 }
 0xe07   : > { %4831 = vmatprep.subr.bf16.mxu1 %v4830_v24 }
 0xe0a   : > { %4833 = vmatpush3.bf16.msra.mxu1 %v4830_v24 }
 0xed8   : > { %v4540_v54 = vpop.f32.mrb[10].mxu1 }
 0xed9   : > { %v1718_v57 = vadd.f32 %v4540_v54, %v4210_v53  ;;  %v1712_v58 = vpop.f32.mrb[11].mxu1 }
 0xeda   : > { %v1713_v59 = vadd.f32 %v4210_v53, %v1712_v58 }
 0xedb   : > { %v1722_v61 = vmax.f32 %v1718_v57, 0.0 }
 0xedc   : > { %v1721_v60 = vmax.f32 %v1713_v59, 0.0 }
 0xede   : > { %4557 = vmatprep.mubr.msk.f32.mxu0 %vm1738_vm7, %v1721_v60 }
 0xedf   : > { %4558 = vmatmul.mubr.msk.f32.vlgmr.msra.gmra.mrb[10].mxu0 %vm1738_vm7, %v1722_v61 }
 0xfb2   : > { %v4559_v63 = vpop.f32.mrb[10].mxu0 }
 0xfb3   : > { %v1817_v0 = vadd.f32 %v4559_v63, %v4213_v62  ;;  %v1811_v1 = vpop.f32.mrb[11].mxu0 }
 0xfb4   : > { %v1812_v2 = vadd.f32 %v4213_v62, %v1811_v1 }
 0xfb5   : > { %v1821_v56 = vadd.f32 %v1817_v0, %v1628_v49 }
 0xfb6   : > { %v1820_v9 = vadd.f32 %v1812_v2, %v1627_v47 }
 0xfb7   : > { %v1825_v3 = vsel %vm570_vm0, %v1821_v56, 0.0 }
 0xfb8   : > { %1826 = vadd.xlane.f32.xlu0 %v1825_v3  ;;  %v1822_v55 = vsel %vm570_vm0, %v1820_v9, 0.0 }
 0xfb9   : > { %1823 = vadd.xlane.f32.xlu1 %v1822_v55 }
0x1045   : > { %v1827_v8 = vpop.xlane.xlu0 %1826 }
0x1046   : > { %v1829_v4 = vmul.f32 0.03125, %v1827_v8  ;;  %v1824_v6 = vpop.xlane.xlu1 %1823 }
0x1047   : > { %v1828_v11 = vmul.f32 0.03125, %v1824_v6 }
0x1048   : > { %v1831_v12 = vsub.f32 %v1821_v56, %v1829_v4 }
0x1049   : > { %v1830_v13 = vsub.f32 %v1820_v9, %v1828_v11 }
0x104a   : > { %v1833_v15 = vmul.f32 %v1831_v12, %v1831_v12 }
0x104b   : > { %v1832_v16 = vmul.f32 %v1830_v13, %v1830_v13 }
0x104c   : > { %v1837_v17 = vsel %vm570_vm0, %v1833_v15, 0.0 }
0x104d   : > { %1838 = vadd.xlane.f32.xlu0 %v1837_v17  ;;  %v1834_v18 = vsel %vm570_vm0, %v1832_v16, 0.0 }
0x104e   : > { %1835 = vadd.xlane.f32.xlu1 %v1834_v18 }
0x10da   : > { %v1839_v25 = vpop.xlane.xlu0 %1838 }
0x10db   : > { %v1841_v26 = vmul.f32 0.03125, %v1839_v25  ;;  %v1836_v27 = vpop.xlane.xlu1 %1835 }
0x10dc   : > { %v1840_v28 = vmul.f32 0.03125, %v1836_v27 }
0x10dd   : > { %v1843_v29 = vadd.f32 1e-05, %v1841_v26 }
0x10de   : > { %v1842_v30 = vadd.f32 1e-05, %v1840_v28 }
0x10df   : > { %5213 = vrsqrt.f32 %v1843_v29 }
0x10e0   : > { %5215 = vrsqrt.f32 %v1842_v30 }
0x10e9   : > { %v5214_v31 = vpop.eup %5213 }
0x10ea   : > { %v5216_v32 = vpop.eup %5215  ;;  %v1847_v33 = vmul.f32 %v5214_v31, %v1831_v12 }
0x10eb   : > { %v1846_v34 = vmul.f32 %v5216_v32, %v1830_v13 }
0x10ec   : > { %v1849_v37 = vmul.f32 %v6124_v35, %v1847_v33 }
0x10ed   : > { %v1848_v38 = vmul.f32 %v6124_v35, %v1846_v34 }
0x10ee   : > { %v6164_v40 = vadd.f32 %v6126_v44, %v1849_v37 }
0x10ef   : > { %v6161_v39 = vadd.f32 %v6126_v44, %v1848_v38 }
0x10f1   : > { %4568 = vmatprep.mubr.msk.f32.mxu1 %vm570_vm0, %v6161_v39 }
0x10f2   : > { %4569 = vmatmul.mubr.msk.f32.vlgmr.msra.gmra.mrb[12].mxu1 %vm570_vm0, %v6164_v40 }
0x11c5   : > { %v6170_v41 = vpop.f32.mrb[12].mxu1 }
0x11c6   : > { %v6172_v36 = vpop.f32.mrb[13].mxu1 }
0x11c7   : > { %4575 = vmatprep.mubr.msk.f32.mxu1 %vm658_vm1, %v6172_v36  ;;  %v6178_v42 = vpack.i.bf16 %v6170_v41, %v6172_v36 }
0x11c9   : > { %5108 = vrot.lane.b32.xlu0 %v6178_v42, %s6565_s0  ;;  %5103 = vrot.lane.b32.xlu1 %v6178_v42, %s6566_s18  ;;  %s6615_s0 = sld [smem:[#allocation29_spill]] }
0x11cd   : > { %2144 = vrot.lane.b32.xlu1 %v6172_v36, %s6567_s10 }
0x11d1   : > { %2146 = vrot.lane.b32.xlu1 %v6170_v41, %s6567_s10  ;;  %s6619_s10 = smov 88  }
0x123b   : > { %v5109_v35 = vpop.permute.xlu0 %5108  ;;  %v5104_v43 = vpop.permute.xlu1 %5103 }
0x123c   : > { %v5111_v44 = vunpack.i.h.bf16 %v5109_v35  ;;  %v5110_v10 = vunpack.i.l.bf16 %v5109_v35  ;;  %v5106_v45 = vunpack.i.h.bf16 %v5104_v43  ;;  %v5105_v46 = vunpack.i.l.bf16 %v5104_v43 }
0x123e   : > { %v4834_v47 = vpack.c.bf16 %v5106_v45, %v5105_v46  ;;  %v4844_v48 = vpack.c.bf16 %v5111_v44, %v5110_v10 }
0x123f   : > { %v2145_v49 = vpop.permute.xlu1 %2144 }
0x1240   : > { %4836 = vmatprep.subr.msk.bf16.mxu1 %vm5955_vm2, %v4834_v47 }
0x1241   : > { %4839 = vmatpush3.bf16.xpose.msk.msra.mxu1 %vm5955_vm2, %v4834_v47 }
0x1242   : > { %4846 = vmatprep.subr.msk.bf16.mxu1 %vm5955_vm2, %v4844_v48 }
0x1243   : > { %v2147_v50 = vpop.permute.xlu1 %2146 }
0x1248   : > { %4576 = vmatmul.mubr.msk.f32.vlgmr.msra.gmra.mrb[14].mxu1 %vm658_vm1, %v6170_v41 }
0x1249   : > { %4849 = vmatpush3.bf16.xpose.msk.msra.mxu1 %vm5955_vm2, %v4844_v48  ;;  %4589 = vmatprep.mubr.msk.f32.mxu1 %vm658_vm1, %v2145_v49 }
0x1250   : > { %4590 = vmatmul.mubr.msk.f32.vlgmr.msra.gmra.mrb[16].mxu1 %vm658_vm1, %v2147_v50 }
0x131b   : > { %v4577_v51 = vpop.f32.mrb[14].mxu1 }
0x131c   : > { %v2032_v52 = vmul.f32 0.35355338, %v4577_v51  ;;  %v2022_v53 = vpop.f32.mrb[15].mxu1 }
0x131d   : > { %v2031_v54 = vmul.f32 0.35355338, %v2022_v53 }
0x131e   : > { %v2034_v57 = vadd.f32 %v2032_v52, %v5967_v20 }
0x131f   : > { %v2033_v58 = vadd.f32 %v2031_v54, %v5969_v23 }
0x1320   : > { %v2038_v59 = vsel %vm746_vm5, %v2034_v57, -inf }
0x1321   : > { %2039 = vmax.xlane.f32.xlu1 %v2038_v59  ;;  %v2035_v60 = vsel %vm746_vm5, %v2033_v58, -inf }
0x1322   : > { %2036 = vmax.xlane.f32.xlu0 %v2035_v60 }
0x1323   : > { %v4591_v61 = vpop.f32.mrb[16].mxu1 }
0x1324   : > { %v2226_v62 = vpop.f32.mrb[17].mxu1  ;;  %v2236_v63 = vmul.f32 0.35355338, %v4591_v61 }
0x1325   : > { %v2235_v0 = vmul.f32 0.35355338, %v2226_v62 }
0x1326   : > { %v2238_v56 = vadd.f32 %v2236_v63, %v5967_v20 }
0x1327   : > { %v2237_v1 = vadd.f32 %v2235_v0, %v5969_v23 }
0x1328   : > { %v2242_v9 = vsel %vm746_vm5, %v2238_v56, -inf }
0x1329   : > { %v2239_v2 = vsel %vm746_vm5, %v2237_v1, -inf }
0x132a   : > { %2240 = vmax.xlane.f32.xlu0 %v2239_v2 }
0x132e   : > { %2243 = vmax.xlane.f32.xlu0 %v2242_v9 }
0x1332   : > { %5113 = vrot.lane.b32.xlu1 %v6178_v42, %s5541_s24  ;;  %s6607_s24 = smov 112  }
0x13ae   : > { %v2040_v3 = vpop.xlane.xlu1 %2039 }
0x13af   : > { %v2042_v55 = vsub.f32 %v2034_v57, %v2040_v3  ;;  %v2037_v8 = vpop.xlane.xlu0 %2036 }
0x13b0   : > { %v2041_v4 = vsub.f32 %v2033_v58, %v2037_v8 }
0x13b1   : > { %v2045_v6 = vmul.f32 1.442695, %v2042_v55 }
0x13b2   : > { %v2043_v11 = vmul.f32 1.442695, %v2041_v4  ;;  %v5114_v12 = vpop.permute.xlu1 %5113 }
0x13b3   : > { %5217 = vpow2.f32 %v2045_v6  ;;  %v5116_v13 = vunpack.i.h.bf16 %v5114_v12  ;;  %v5115_v15 = vunpack.i.l.bf16 %v5114_v12 }
0x13b4   : > { %5219 = vpow2.f32 %v2043_v11 }
0x13b5   : > { %v4840_v16 = vpack.c.bf16 %v5116_v13, %v5115_v15 }
0x13b7   : > { %4841 = vmatprep.subr.bf16.mxu0 %v4840_v16  ;;  %v2241_v17 = vpop.xlane.xlu0 %2240 }
0x13b8   : > { %4843 = vmatpush3.bf16.msra.mxu0 %v4840_v16  ;;  %v2245_v27 = vsub.f32 %v2237_v1, %v2241_v17 }
0x13ba   : > { %v2247_v28 = vmul.f32 1.442695, %v2245_v27 }
0x13bb   : > { %v2244_v18 = vpop.xlane.xlu0 %2243 }
0x13bc   : > { %v2246_v7 = vsub.f32 %v2238_v56, %v2244_v18 }
0x13bd   : > { %v5218_v5 = vpop.eup %5217 }
0x13be   : > { %v5220_v19 = vpop.eup %5219  ;;  %v2249_v21 = vmul.f32 1.442695, %v2246_v7  ;;  %v2050_v22 = vsel %vm746_vm5, %v5218_v5, 0.0 }
0x13bf   : > { %2051 = vadd.xlane.f32.xlu0 %v2050_v22  ;;  %v2047_v24 = vsel %vm746_vm5, %v5220_v19, 0.0 }
0x13c0   : > { %5221 = vpow2.f32 %v2249_v21  ;;  %2048 = vadd.xlane.f32.xlu1 %v2047_v24 }
0x13c1   : > { %5223 = vpow2.f32 %v2247_v28 }
0x13ca   : > { %v5222_v25 = vpop.eup %5221 }
0x13cb   : > { %v2254_v26 = vsel %vm746_vm5, %v5222_v25, 0.0  ;;  %v5224_v29 = vpop.eup %5223 }
0x13cc   : > { %2255 = vadd.xlane.f32.xlu0 %v2254_v26  ;;  %v2251_v30 = vsel %vm746_vm5, %v5224_v29, 0.0 }
0x13d1   : > { %5123 = vrot.lane.b32.xlu1 %v6178_v42, %s6564_s5  ;;  %s6617_s5 = smov 120  }
0x13e2   : > { %5118 = vrot.lane.b32.xlu0 %v6178_v42, %s5544_s17  ;;  %s6608_s17 = smov 72  }
0x13e6   : > { %2350 = vrot.lane.b32.xlu0 %v6170_v41, %s6607_s24 }
0x13f5   : > { %2252 = vadd.xlane.f32.xlu1 %v2251_v30 }
0x1406   : > { %2348 = vrot.lane.b32.xlu1 %v6172_v36, %s6607_s24 }
0x144c   : > { %v2052_v31 = vpop.xlane.xlu0 %2051 }
0x144d   : > { %5225 = vrcp.f32 %v2052_v31  ;;  %v2049_v32 = vpop.xlane.xlu1 %2048 }
0x144e   : > { %5227 = vrcp.f32 %v2049_v32 }
0x1451   : > { %v5124_v43 = vpop.permute.xlu1 %5123 }
0x1452   : > { %v5126_v10 = vunpack.i.h.bf16 %v5124_v43  ;;  %v5125_v45 = vunpack.i.l.bf16 %v5124_v43 }
0x1454   : > { %v4854_v49 = vpack.c.bf16 %v5126_v10, %v5125_v45 }
0x1457   : > { %v5226_v33 = vpop.eup %5225 }
0x1458   : > { %v5228_v34 = vpop.eup %5227  ;;  %v2056_v35 = vmul.f32 %v5226_v33, %v5218_v5 }
0x1459   : > { %v2256_v37 = vpop.xlane.xlu0 %2255  ;;  %v2055_v38 = vmul.f32 %v5228_v34, %v5220_v19 }
0x145a   : > { %5229 = vrcp.f32 %v2256_v37 }
0x145b   : > { %4582 = vmatprep.mubr.msk.f32.mxu0 %vm746_vm5, %v2055_v38 }
0x145c   : > { %4583 = vmatmul.mubr.msk.f32.vlgmr.msra.gmra.mrb[12].mxu0 %vm746_vm5, %v2056_v35 }
0x145d   : > { %v5119_v44 = vpop.permute.xlu0 %5118 }
0x145e   : > { %v5121_v46 = vunpack.i.h.bf16 %v5119_v44  ;;  %v5120_v47 = vunpack.i.l.bf16 %v5119_v44 }
0x1460   : > { %v4850_v48 = vpack.c.bf16 %v5121_v46, %v5120_v47 }
0x1461   : > { %v2351_v58 = vpop.permute.xlu0 %2350 }
0x1462   : > { %4851 = vmatprep.subr.bf16.mxu0 %v4850_v48 }
0x1463   : > { %4853 = vmatpush3.bf16.msra.mxu0 %v4850_v48 }
0x1464   : > { %4856 = vmatprep.subr.msk.bf16.mxu0 %vm5955_vm2, %v4854_v49  ;;  %v5230_v51 = vpop.eup %5229 }
0x1465   : > { %v2260_v54 = vmul.f32 %v5230_v51, %v5222_v25 }
0x1482   : > { %v2253_v50 = vpop.xlane.xlu1 %2252 }
0x1483   : > { %5231 = vrcp.f32 %v2253_v50 }
0x1486   : > { %v2349_v57 = vpop.permute.xlu1 %2348 }
0x148d   : > { %v5232_v52 = vpop.eup %5231 }
0x148e   : > { %v2259_v53 = vmul.f32 %v5232_v52, %v5224_v29 }
0x1490   : > { %4596 = vmatprep.mubr.msk.f32.mxu0 %vm746_vm5, %v2259_v53 }
0x1491   : > { %4597 = vmatmul.mubr.msk.f32.vlgmr.msra.gmra.mrb[14].mxu0 %vm746_vm5, %v2260_v54 }
0x1492   : > { %4859 = vmatpush3.bf16.xpose.msk.msra.mxu0 %vm5955_vm2, %v4854_v49  ;;  %4603 = vmatprep.mubr.msk.f32.mxu0 %vm658_vm1, %v2349_v57 }
0x1499   : > { %4604 = vmatmul.mubr.msk.f32.vlgmr.msra.gmra.mrb[16].mxu0 %vm658_vm1, %v2351_v58 }
0x152f   : > { %v6232_v59 = vpop.f32.mrb[12].mxu0 }
0x1530   : > { %v6234_v60 = vpop.f32.mrb[13].mxu0 }
0x1564   : > { %v6236_v61 = vpop.f32.mrb[14].mxu0 }
0x1565   : > { %v6238_v62 = vpop.f32.mrb[15].mxu0 }
0x156c   : > { %v4605_v63 = vpop.f32.mrb[16].mxu0 }
0x156d   : > { %v2440_v0 = vmul.f32 0.35355338, %v4605_v63  ;;  %v2430_v1 = vpop.f32.mrb[17].mxu0 }
0x156e   : > { %v2439_v2 = vmul.f32 0.35355338, %v2430_v1 }
0x156f   : > { %v2442_v56 = vadd.f32 %v2440_v0, %v5967_v20 }
0x1570   : > { %v2441_v9 = vadd.f32 %v2439_v2, %v5969_v23 }
0x1571   : > { %v2446_v3 = vsel %vm746_vm5, %v2442_v56, -inf }
0x1572   : > { %2447 = vmax.xlane.f32.xlu0 %v2446_v3  ;;  %v2443_v55 = vsel %vm746_vm5, %v2441_v9, -inf }
0x1573   : > { %2444 = vmax.xlane.f32.xlu1 %v2443_v55  ;;  %v4248_v55 = vld [vmem:[%s6526_s3 + $0x28] sm:$0xff] }
0x15ff   : > { %v2448_v8 = vpop.xlane.xlu0 %2447 }
0x1600   : > { %v2450_v4 = vsub.f32 %v2442_v56, %v2448_v8  ;;  %v2445_v6 = vpop.xlane.xlu1 %2444  ;;  %v4249_v8 = vld [vmem:[%s6526_s3 + $0x30] sm:$0xff] }
0x1601   : > { %v2449_v11 = vsub.f32 %v2441_v9, %v2445_v6  ;;  %v4250_v6 = vld [vmem:[%s6526_s3 + $0x38] sm:$0xff] }
0x1602   : > { %v2453_v12 = vmul.f32 1.442695, %v2450_v4 }
0x1603   : > { %v2451_v13 = vmul.f32 1.442695, %v2449_v11  ;;  %v4878_v11 = vpack.c.bf16 %v4250_v6, %v4249_v8 }
0x1604   : > { %5233 = vpow2.f32 %v2453_v12 }
0x1605   : > { %5235 = vpow2.f32 %v2451_v13 }
0x160e   : > { %v5234_v15 = vpop.eup %5233 }
0x160f   : > { %v5236_v16 = vpop.eup %5235  ;;  %v2458_v17 = vsel %vm746_vm5, %v5234_v15, 0.0 }
0x1610   : > { %2459 = vadd.xlane.f32.xlu1 %v2458_v17  ;;  %v2455_v18 = vsel %vm746_vm5, %v5236_v16, 0.0 }
0x1611   : > { %2456 = vadd.xlane.f32.xlu0 %v2455_v18 }
0x1621   : > { %5133 = vrot.lane.b32.xlu1 %v6178_v42, %s6608_s17 }
0x1625   : > { %2552 = vrot.lane.b32.xlu1 %v6172_v36, %s6609_s13 }
0x1627   : > { %5128 = vrot.lane.b32.xlu0 %v6178_v42, %s6610_s14 }
0x162b   : > { %2554 = vrot.lane.b32.xlu0 %v6170_v41, %s6609_s13 }
0x169d   : > { %v2460_v7 = vpop.xlane.xlu1 %2459 }
0x169e   : > { %5237 = vrcp.f32 %v2460_v7  ;;  %v2457_v5 = vpop.xlane.xlu0 %2456 }
0x169f   : > { %5239 = vrcp.f32 %v2457_v5 }
0x16a1   : > { %v5134_v19 = vpop.permute.xlu1 %5133 }
0x16a2   : > { %v5129_v21 = vpop.permute.xlu0 %5128  ;;  %v5136_v22 = vunpack.i.h.bf16 %v5134_v19  ;;  %v5135_v24 = vunpack.i.l.bf16 %v5134_v19 }
0x16a3   : > { %v5131_v25 = vunpack.i.h.bf16 %v5129_v21  ;;  %v5130_v26 = vunpack.i.l.bf16 %v5129_v21 }
0x16a4   : > { %v4864_v28 = vpack.c.bf16 %v5136_v22, %v5135_v24 }
0x16a5   : > { %v4860_v27 = vpack.c.bf16 %v5131_v25, %v5130_v26  ;;  %v2553_v31 = vpop.permute.xlu1 %2552 }
0x16a6   : > { %v2555_v32 = vpop.permute.xlu0 %2554 }
0x16a7   : > { %4861 = vmatprep.subr.bf16.mxu1 %v4860_v27 }
0x16a8   : > { %v5238_v36 = vpop.eup %5237  ;;  %4863 = vmatpush3.bf16.msra.mxu1 %v4860_v27 }
0x16a9   : > { %v5240_v29 = vpop.eup %5239  ;;  %4866 = vmatprep.subr.msk.bf16.mxu1 %vm5955_vm2, %v4864_v28  ;;  %v2464_v30 = vmul.f32 %v5238_v36, %v5234_v15 }
0x16aa   : > { %v2463_v41 = vmul.f32 %v5240_v29, %v5236_v16 }
0x16ac   : > { %4610 = vmatprep.mubr.msk.f32.mxu1 %vm746_vm5, %v2463_v41 }
0x16ad   : > { %4611 = vmatmul.mubr.msk.f32.vlgmr.msra.gmra.mrb[18].mxu1 %vm746_vm5, %v2464_v30 }
0x16ae   : > { %4617 = vmatprep.mubr.msk.f32.mxu1 %vm658_vm1, %v2553_v31 }
0x16b1   : > { %4869 = vmatpush3.bf16.xpose.msk.msra.mxu1 %vm5955_vm2, %v4864_v28 }
0x16b8   : > { %4618 = vmatmul.mubr.msk.f32.vlgmr.msra.gmra.mrb[20].mxu1 %vm658_vm1, %v2555_v32 }
0x1780   : > { %v4612_v33 = vpop.f32.mrb[18].mxu1 }
0x1781   : > { %v2543_v34 = vpop.f32.mrb[19].mxu1 }
0x178b   : > { %v4619_v37 = vpop.f32.mrb[20].mxu1 }
0x178c   : > { %v2644_v38 = vmul.f32 0.35355338, %v4619_v37  ;;  %v2634_v35 = vpop.f32.mrb[21].mxu1 }
0x178d   : > { %v2643_v43 = vmul.f32 0.35355338, %v2634_v35 }
0x178e   : > { %v2646_v44 = vadd.f32 %v2644_v38, %v5967_v20 }
0x178f   : > { %v2645_v10 = vadd.f32 %v2643_v43, %v5969_v23  ;;  %v4256_v43 = vld [vmem:[%s6529_s6 + $0x28] sm:$0xff] }
0x1790   : > { %v2650_v45 = vsel %vm746_vm5, %v2646_v44, -inf }
0x1791   : > { %2651 = vmax.xlane.f32.xlu0 %v2650_v45  ;;  %v2647_v46 = vsel %vm746_vm5, %v2645_v10, -inf  ;;  %v4258_v45 = vld [vmem:[%s6529_s6 + $0x38] sm:$0xff] }
0x1792   : > { %2648 = vmax.xlane.f32.xlu1 %v2647_v46 }
0x181e   : > { %v2652_v47 = vpop.xlane.xlu0 %2651 }
0x181f   : > { %v2654_v48 = vsub.f32 %v2646_v44, %v2652_v47  ;;  %v2649_v49 = vpop.xlane.xlu1 %2648  ;;  %v4262_v47 = vld [vmem:[%s6604_s16 + $0x40] sm:$0xff] }
0x1820   : > { %v2653_v50 = vsub.f32 %v2645_v10, %v2649_v49  ;;  %v4257_v10 = vld [vmem:[%s6529_s6 + $0x30] sm:$0xff] }
0x1821   : > { %v2657_v51 = vmul.f32 1.442695, %v2654_v48  ;;  %v4886_v46 = vpack.c.bf16 %v4258_v45, %v4257_v10  ;;  %v4263_v48 = vld [vmem:[%s6604_s16 + $0x48] sm:$0xff]  ;;  %v4264_v49 = vld [vmem:[%s6604_s16 + $0x50] sm:$0xff] }
0x1822   : > { %v2655_v52 = vmul.f32 1.442695, %v2653_v50  ;;  %v4890_v50 = vpack.c.bf16 %v4263_v48, %v4262_v47 }
0x1823   : > { %5241 = vpow2.f32 %v2657_v51  ;;  %v4265_v51 = vld [vmem:[%s6604_s16 + $0x58] sm:$0xff] }
0x1824   : > { %5243 = vpow2.f32 %v2655_v52  ;;  %v4894_v52 = vpack.c.bf16 %v4265_v51, %v4264_v49 }
0x182d   : > { %v5242_v53 = vpop.eup %5241 }
0x182e   : > { %v5244_v54 = vpop.eup %5243  ;;  %v2662_v57 = vsel %vm746_vm5, %v5242_v53, 0.0 }
0x182f   : > { %2663 = vadd.xlane.f32.xlu1 %v2662_v57  ;;  %v2659_v23 = vsel %vm746_vm5, %v5244_v54, 0.0 }
0x1830   : > { %2660 = vadd.xlane.f32.xlu0 %v2659_v23 }
0x1840   : > { %2758 = vrot.lane.b32.xlu1 %v6238_v62, %s6611_s22 }
0x1844   : > { %2760 = vrot.lane.b32.xlu1 %v6236_v61, %s6611_s22 }
0x1846   : > { %5138 = vrot.lane.b32.xlu0 %v6178_v42, %s6612_s15  ;;  %v4247_v42 = vld [vmem:[%s6526_s3 + $0x20] sm:$0xff]  ;;  %s6616_s15 = sld [smem:[#allocation28_spill]] }
0x1847   : > { %v4874_v4 = vpack.c.bf16 %v4248_v55, %v4247_v42 }
0x1848   : > { %2768 = vrot.lane.b32.xlu1 %v4612_v33, %s6613_s21 }
0x184a   : > { %2766 = vrot.lane.b32.xlu0 %v2543_v34, %s6613_s21 }
0x18bc   : > { %v2664_v58 = vpop.xlane.xlu1 %2663 }
0x18bd   : > { %5245 = vrcp.f32 %v2664_v58  ;;  %v2661_v63 = vpop.xlane.xlu0 %2660 }
0x18be   : > { %5247 = vrcp.f32 %v2661_v63 }
0x18c0   : > { %v2759_v15 = vpop.permute.xlu1 %2758 }
0x18c1   : > { %v5139_v0 = vpop.permute.xlu0 %5138  ;;  %v2780_v7 = vsel %vm658_vm1, %v6234_v60, %v2759_v15  ;;  %v4259_v15 = vld [vmem:[#allocation8 + $0x1] ss:$0 sm:$0xff] }
0x18c2   : > { %v5141_v1 = vunpack.i.h.bf16 %v5139_v0  ;;  %v5140_v2 = vunpack.i.l.bf16 %v5139_v0 }
0x18c4   : > { %v4870_v56 = vpack.c.bf16 %v5141_v1, %v5140_v2  ;;  %v2761_v16 = vpop.permute.xlu1 %2760 }
0x18c5   : > { %v2767_v18 = vpop.permute.xlu0 %2766  ;;  %v2781_v19 = vsel %vm658_vm1, %v6232_v59, %v2761_v16 }
0x18c6   : > { %4871 = vmatprep.subr.bf16.mxu0 %v4870_v56  ;;  %v2782_v21 = vsel %vm746_vm5, %v2780_v7, %v2767_v18 }
0x18c7   : > { %v5246_v62 = vpop.eup %5245  ;;  %4873 = vmatpush3.bf16.msra.mxu0 %v4870_v56 }
0x18c8   : > { %v5248_v9 = vpop.eup %5247  ;;  %v2668_v3 = vmul.f32 %v5246_v62, %v5242_v53  ;;  %4875 = vmatprep.subr.bf16.mxu0 %v4874_v4  ;;  %v2769_v17 = vpop.permute.xlu1 %2768  ;;  %v4266_v53 = vld [vmem:[%s6604_s16 + $0x60] sm:$0xff] }
0x18c9   : > { %v2667_v61 = vmul.f32 %v5248_v9, %v5244_v54  ;;  %v2783_v24 = vsel %vm746_vm5, %v2781_v19, %v2769_v17  ;;  %v4267_v54 = vld [vmem:[%s6604_s16 + $0x68] sm:$0xff]  ;;  %v6341_v62 = vld [vmem:[%s6606_s23 + $0x1] ss:$0 sm:$0xff] }
0x18ca   : > { %v4898_v57 = vpack.c.bf16 %v4267_v54, %v4266_v53 }
0x18cb   : > { %4624 = vmatprep.mubr.msk.f32.mxu0 %vm746_vm5, %v2667_v61  ;;  %v6343_v61 = vld [vmem:[#allocation7 + $0x1] ss:$0 sm:$0xff] }
0x18cc   : > { %4625 = vmatmul.mubr.msk.f32.vlgmr.msra.gmra.mrb[18].mxu0 %vm746_vm5, %v2668_v3 }
0x18cd   : > { %4877 = vmatpush3.bf16.msra.mxu0 %v4874_v4 }
0x18ce   : > { %4879 = vmatprep.subr.bf16.mxu0 %v4878_v11 }
0x18d1   : > { %4881 = vmatpush3.bf16.msra.mxu0 %v4878_v11  ;;  %v4268_v11 = vld [vmem:[%s6604_s16 + $0x70] sm:$0xff] }
0x18d2   : > { %4891 = vmatprep.subr.bf16.mxu0 %v4890_v50 }
0x199f   : > { %v4626_v12 = vpop.f32.mrb[18].mxu0 }
0x19a0   : > { %2776 = vrot.lane.b32.xlu1 %v4626_v12, %s6614_s25  ;;  %v2747_v13 = vpop.f32.mrb[19].mxu0  ;;  %v4269_v12 = vld [vmem:[%s6604_s16 + $0x78] sm:$0xff] }
0x19a1   : > { %2774 = vrot.lane.b32.xlu0 %v2747_v13, %s6614_s25  ;;  %v4902_v13 = vpack.c.bf16 %v4269_v12, %v4268_v11 }
0x1a12   : > { %v2777_v5 = vpop.permute.xlu1 %2776 }
0x1a13   : > { %v2775_v22 = vpop.permute.xlu0 %2774  ;;  %v2785_v26 = vsel %vm1496_vm6, %v2783_v24, %v2777_v5 }
0x1a14   : > { %v2784_v25 = vsel %vm1496_vm6, %v2782_v21, %v2775_v22  ;;  %v4270_v21 = vld [vmem:[#allocation10 + $0x1] ss:$0 sm:$0xff] }
0x1a15   : > { %4635 = vmatprep.mubr.msk.f32.mxu0 %vm570_vm0, %v2784_v25 }
0x1a16   : > { %4636 = vmatmul.mubr.msk.f32.vlgmr.msra.gmra.mrb[20].mxu0 %vm570_vm0, %v2785_v26 }
0x1a17   : > { %4893 = vmatpush3.bf16.msra.mxu0 %v4890_v50 }
0x1a18   : > { %4895 = vmatprep.subr.bf16.mxu0 %v4894_v52 }
0x1a1b   : > { %4897 = vmatpush3.bf16.msra.mxu0 %v4894_v52 }
0x1a1c   : > { %4899 = vmatprep.subr.bf16.mxu0 %v4898_v57 }
0x1a1f   : > { %4901 = vmatpush3.bf16.msra.mxu0 %v4898_v57 }
0x1a20   : > { %4903 = vmatprep.subr.bf16.mxu0 %v4902_v13 }
0x1a23   : > { %4905 = vmatpush3.bf16.msra.mxu0 %v4902_v13 }
0x1ae9   : > { %v4637_v27 = vpop.f32.mrb[20].mxu0 }
0x1aea   : > { %v2873_v60 = vadd.f32 %v4637_v27, %v6164_v40  ;;  %v2863_v28 = vpop.f32.mrb[21].mxu0 }
0x1aeb   : > { %v2872_v36 = vadd.f32 %v2863_v28, %v6161_v39  ;;  %v4255_v39 = vld [vmem:[%s6529_s6 + $0x20] sm:$0xff] }
0x1aec   : > { %v2877_v59 = vsel %vm570_vm0, %v2873_v60, 0.0  ;;  %v4882_v44 = vpack.c.bf16 %v4256_v43, %v4255_v39  ;;  %v3144_v43 = vld [vmem:[%s6615_s0 + $0x10] sm:$0xff] }
0x1aed   : > { %2878 = vadd.xlane.f32.xlu1 %v2877_v59  ;;  %v2874_v29 = vsel %vm570_vm0, %v2872_v36, 0.0 }
0x1aee   : > { %2875 = vadd.xlane.f32.xlu0 %v2874_v29  ;;  %4883 = vmatprep.subr.bf16.mxu1 %v4882_v44 }
0x1aef   : > { %4885 = vmatpush3.bf16.msra.mxu1 %v4882_v44  ;;  %v3145_v44 = vld [vmem:[%s6615_s0 + $0x18] sm:$0xff] }
0x1af0   : > { %4887 = vmatprep.subr.bf16.mxu1 %v4886_v46  ;;  %v4910_v10 = vpack.c.bf16 %v3145_v44, %v3144_v43 }
0x1af3   : > { %4889 = vmatpush3.bf16.msra.mxu1 %v4886_v46 }
0x1b7a   : > { %v2879_v41 = vpop.xlane.xlu1 %2878 }
0x1b7b   : > { %v2881_v30 = vmul.f32 0.03125, %v2879_v41  ;;  %v2876_v31 = vpop.xlane.xlu0 %2875 }
0x1b7c   : > { %v2880_v32 = vmul.f32 0.03125, %v2876_v31 }
0x1b7d   : > { %v2883_v33 = vsub.f32 %v2873_v60, %v2881_v30 }
0x1b7e   : > { %v2882_v34 = vsub.f32 %v2872_v36, %v2880_v32 }
0x1b7f   : > { %v2885_v35 = vmul.f32 %v2883_v33, %v2883_v33 }
0x1b80   : > { %v2884_v37 = vmul.f32 %v2882_v34, %v2882_v34 }
0x1b81   : > { %v2889_v40 = vsel %vm570_vm0, %v2885_v35, 0.0  ;;  %v3142_v35 = vld [vmem:[%s6615_s0] sm:$0xff] }
0x1b82   : > { %v2886_v38 = vsel %vm570_vm0, %v2884_v37, 0.0 }
0x1b83   : > { %2887 = vadd.xlane.f32.xlu0 %v2886_v38 }
0x1b87   : > { %2890 = vadd.xlane.f32.xlu0 %v2889_v40  ;;  %v3143_v40 = vld [vmem:[%s6615_s0 + $0x8] sm:$0xff] }
0x1b88   : > { %v4906_v39 = vpack.c.bf16 %v3143_v40, %v3142_v35 }
0x1b8a   : > { %4907 = vmatprep.subr.bf16.mxu1 %v4906_v39 }
0x1c10   : > { %v2888_v23 = vpop.xlane.xlu0 %2887 }
0x1c11   : > { %v2892_v58 = vmul.f32 0.03125, %v2888_v23 }
0x1c13   : > { %v2894_v63 = vadd.f32 1e-05, %v2892_v58 }
0x1c14   : > { %v2891_v0 = vpop.xlane.xlu0 %2890 }
0x1c15   : > { %5249 = vrsqrt.f32 %v2894_v63  ;;  %v2893_v1 = vmul.f32 0.03125, %v2891_v0  ;;  %v5554_v0 = vmov 0.0|0.0  }
0x1c16   : > { %4918 = vmatprep.subr.bf16.mxu0 %v5554_v0 }
0x1c17   : > { %v2895_v2 = vadd.f32 1e-05, %v2893_v1  ;;  %v5556_v1 = vmov 0.0  }
0x1c19   : > { %5251 = vrsqrt.f32 %v2895_v2  ;;  %v3400_v2 = vlaneseq }
0x1c1f   : > { %v5250_v56 = vpop.eup %5249 }
0x1c20   : > { %v2898_v9 = vmul.f32 %v5250_v56, %v2882_v34  ;;  %v3401_v56 = vshrl.u32 %v3400_v2, 7 }
0x1c22   : > { %v2906_v3 = vmul.f32 %v6341_v62, %v2898_v9  ;;  %v3227_v9 = vld [vmem:[%s6616_s15] sm:$0x1] }
0x1c23   : > { %v5252_v42 = vpop.eup %5251 }
0x1c24   : > { %v2899_v55 = vmul.f32 %v5252_v42, %v2883_v33  ;;  %v2914_v8 = vadd.f32 %v6343_v61, %v2906_v3 }
0x1c26   : > { %4646 = vmatprep.mubr.msk.f32.mxu1 %vm570_vm0, %v2914_v8  ;;  %v2907_v4 = vmul.f32 %v6341_v62, %v2899_v55 }
0x1c28   : > { %v2915_v6 = vadd.f32 %v6343_v61, %v2907_v4 }
0x1c2a   : > { %4647 = vmatmul.mubr.msk.f32.vlgmr.msra.gmra.mrb[22].mxu1 %vm570_vm0, %v2915_v6 }
0x1c2b   : > { %4909 = vmatpush3.bf16.msra.mxu1 %v4906_v39 }
0x1c2c   : > { %4911 = vmatprep.subr.bf16.mxu1 %v4910_v10 }
0x1c2f   : > { %4913 = vmatpush3.bf16.msra.mxu1 %v4910_v10 }
0x1c30   : > { %4914 = vmatprep.subr.bf16.mxu1 %v5554_v0 }
0x1cfd   : > { %v4648_v16 = vpop.f32.mrb[22].mxu1 }
0x1cfe   : > { %v3007_v17 = vadd.f32 %v4648_v16, %v4259_v15  ;;  %v3001_v18 = vpop.f32.mrb[23].mxu1 }
0x1cff   : > { %v3002_v7 = vadd.f32 %v4259_v15, %v3001_v18 }
0x1d00   : > { %v3011_v19 = vmax.f32 %v3007_v17, 0.0 }
0x1d01   : > { %v3010_v5 = vmax.f32 %v3002_v7, 0.0 }
0x1d03   : > { %4665 = vmatprep.mubr.msk.f32.mxu0 %vm1738_vm7, %v3010_v5 }
0x1d04   : > { %4666 = vmatmul.mubr.msk.f32.vlgmr.msra.gmra.mrb[22].mxu0 %vm1738_vm7, %v3011_v19 }
0x1d05   : > { %4690 = vmatprep.mubr.msk.f32.mxu0 %vm5555_vm8, %v5556_v1 }
0x1dd7   : > { %v4667_v22 = vpop.f32.mrb[22].mxu0 }
0x1dd8   : > { %v3107_v24 = vadd.f32 %v4667_v22, %v4270_v21  ;;  %v3101_v25 = vpop.f32.mrb[23].mxu0 }
0x1dd9   : > { %v3102_v26 = vadd.f32 %v4270_v21, %v3101_v25 }
0x1dda   : > { %v3111_v27 = vadd.f32 %v3107_v24, %v2915_v6 }
0x1ddb   : > { %v3110_v60 = vadd.f32 %v3102_v26, %v2914_v8 }
0x1ddc   : > { %v3115_v28 = vsel %vm570_vm0, %v3111_v27, 0.0 }
0x1ddd   : > { %3116 = vadd.xlane.f32.xlu0 %v3115_v28  ;;  %v3112_v36 = vsel %vm570_vm0, %v3110_v60, 0.0 }
0x1dde   : > { %3113 = vadd.xlane.f32.xlu1 %v3112_v36 }
0x1e6a   : > { %v3117_v59 = vpop.xlane.xlu0 %3116 }
0x1e6b   : > { %v3119_v29 = vmul.f32 0.03125, %v3117_v59  ;;  %v3114_v41 = vpop.xlane.xlu1 %3113 }
0x1e6c   : > { %v3118_v30 = vmul.f32 0.03125, %v3114_v41 }
0x1e6d   : > { %v3121_v31 = vsub.f32 %v3111_v27, %v3119_v29 }
0x1e6e   : > { %v3120_v32 = vsub.f32 %v3110_v60, %v3118_v30 }
0x1e6f   : > { %v3123_v33 = vmul.f32 %v3121_v31, %v3121_v31 }
0x1e70   : > { %v3122_v34 = vmul.f32 %v3120_v32, %v3120_v32 }
0x1e71   : > { %v3127_v37 = vsel %vm570_vm0, %v3123_v33, 0.0 }
0x1e72   : > { %3128 = vadd.xlane.f32.xlu0 %v3127_v37  ;;  %v3124_v38 = vsel %vm570_vm0, %v3122_v34, 0.0 }
0x1e73   : > { %3125 = vadd.xlane.f32.xlu1 %v3124_v38 }
0x1eff   : > { %v3129_v45 = vpop.xlane.xlu0 %3128 }
0x1f00   : > { %v3131_v46 = vmul.f32 0.03125, %v3129_v45  ;;  %v3126_v47 = vpop.xlane.xlu1 %3125 }
0x1f01   : > { %v3130_v48 = vmul.f32 0.03125, %v3126_v47 }
0x1f02   : > { %v3133_v49 = vadd.f32 1e-05, %v3131_v46 }
0x1f03   : > { %v3132_v50 = vadd.f32 1e-05, %v3130_v48 }
0x1f04   : > { %5253 = vrsqrt.f32 %v3133_v49 }
0x1f05   : > { %5255 = vrsqrt.f32 %v3132_v50 }
0x1f0e   : > { %v5254_v51 = vpop.eup %5253 }
0x1f0f   : > { %v5256_v52 = vpop.eup %5255  ;;  %v3137_v53 = vmul.f32 %v5254_v51, %v3121_v31 }
0x1f10   : > { %v3136_v54 = vmul.f32 %v5256_v52, %v3120_v32 }
0x1f11   : > { %v3139_v57 = vmul.f32 %v6341_v62, %v3137_v53 }
0x1f12   : > { %v3138_v23 = vmul.f32 %v6341_v62, %v3136_v54  ;;  %v3402_v62 = vsub.s32 0, %v3401_v56 }
0x1f13   : > { %v3141_v63 = vadd.f32 %v6343_v61, %v3139_v57 }
0x1f14   : > { %v3140_v58 = vadd.f32 %v6343_v61, %v3138_v23  ;;  %v6390_v61 = vrot.slane %v3227_v9, %v3402_v62 }
0x1f16   : > { %4676 = vmatprep.mubr.msk.f32.mxu1 %vm570_vm0, %v3140_v58  ;;  %3404 = vrot.lane.b32.xlu0 %v6390_v61, %s6617_s5 }
0x1f17   : > { %4677 = vmatmul.mubr.msk.f32.vlgmr.msra.gmra.mrb[24].mxu1 %vm570_vm0, %v3141_v63 }
0x1f18   : > { %4683 = vmatprep.mubr.msk.f32.mxu1 %vm5555_vm8, %v5556_v1 }
0x1f88   : > { %v3405_v13 = vpop.permute.xlu0 %3404 }
0x1fea   : > { %v4678_v3 = vpop.f32.mrb[24].mxu1 }
0x1feb   : > { %v3218_v42 = vpop.f32.mrb[25].mxu1 }
0x1fec   : > { %v6394_v55 = vpack.i.bf16 %v4678_v3, %v3218_v42  ;;  %v4915_v8 = vpack.c.bf16 %v4678_v3, %v3218_v42 }
0x1fee   : > { %5143 = vrot.lane.b32.xlu1 %v6394_v55, %s6617_s5  ;;  %4917 = vmatpush3.bf16.xpose.msk.msra.mxu1 %vm5955_vm2, %v4915_v8 }
0x1fef   : > { %4921 = vmatprep.subr.bf16.mxu1 %v5554_v0 }
0x1ff5   : > { %4684 = vmatmul.mubr.msk.f32.vlgmr.msra.gmra.mrb[26].mxu1 %vm658_vm1, %v3227_v9 }
0x1ff6   : > { %4697 = vmatprep.mubr.msk.f32.mxu1 %vm5555_vm8, %v5556_v1 }
0x2060   : > { %v5144_v4 = vpop.permute.xlu1 %5143 }
0x2061   : > { %v5146_v6 = vunpack.i.h.bf16 %v5144_v4  ;;  %v5145_v11 = vunpack.i.l.bf16 %v5144_v4 }
0x2063   : > { %v4922_v12 = vpack.c.bf16 %v5146_v6, %v5145_v11 }
0x2065   : > { %4924 = vmatpush3.bf16.xpose.msk.msra.mxu1 %vm5955_vm2, %v4922_v12 }
0x2066   : > { %4932 = vmatprep.subr.bf16.mxu1 %v5554_v0 }
0x206c   : > { %4698 = vmatmul.mubr.msk.f32.vlgmr.msra.gmra.mrb[28].mxu1 %vm658_vm1, %v3405_v13 }
0x206d   : > { %4718 = vmatprep.mubr.msk.f32.mxu1 %vm5555_vm8, %v5556_v1 }
0x20c8   : > { %v3303_v15 = vpop.f32.mrb[26].mxu1 }
0x20c9   : > { %v3307_v16 = vmul.f32 0.35355338, %v3303_v15  ;;  %v4685_v17 = vpop.f32.mrb[27].mxu1 }
0x20cb   : > { %v3308_v18 = vadd.f32 %v3307_v16, %v5967_v20 }
0x20cd   : > { %v3310_v7 = vsel %vm3309_vm9, %v3308_v18, -inf }
0x20ce   : > { %3311 = vmax.xlane.f32.xlu1 %v3310_v7 }
0x20df   : > { %5148 = vrot.lane.b32.xlu1 %v6394_v55, %s6618_s1 }
0x213f   : > { %v3482_v5 = vpop.f32.mrb[28].mxu1 }
0x2140   : > { %v3486_v19 = vmul.f32 0.35355338, %v3482_v5  ;;  %v4699_v21 = vpop.f32.mrb[29].mxu1 }
0x2142   : > { %v3487_v22 = vadd.f32 %v3486_v19, %v5967_v20 }
0x2144   : > { %v3488_v24 = vsel %vm3309_vm9, %v3487_v22, -inf }
0x2145   : > { %3489 = vmax.xlane.f32.xlu0 %v3488_v24 }
0x215b   : > { %v3312_v25 = vpop.xlane.xlu1 %3311 }
0x215c   : > { %v3313_v26 = vsub.f32 %v3308_v18, %v3312_v25 }
0x215e   : > { %v3314_v27 = vmul.f32 1.442695, %v3313_v26 }
0x215f   : > { %v5149_v60 = vpop.permute.xlu1 %5148 }
0x2160   : > { %5257 = vpow2.f32 %v3314_v27  ;;  %v5151_v28 = vunpack.i.h.bf16 %v5149_v60  ;;  %v5150_v36 = vunpack.i.l.bf16 %v5149_v60 }
0x2162   : > { %v4919_v59 = vpack.c.bf16 %v5151_v28, %v5150_v36 }
0x2164   : > { %4920 = vmatpush3.bf16.msra.mxu0 %v4919_v59 }
0x2165   : > { %4925 = vmatprep.subr.bf16.mxu0 %v5554_v0 }
0x216a   : > { %v5258_v29 = vpop.eup %5257 }
0x216b   : > { %v3316_v41 = vsel %vm3309_vm9, %v5258_v29, 0.0 }
0x216c   : > { %3317 = vadd.xlane.f32.xlu1 %v3316_v41 }
0x217d   : > { %5158 = vrot.lane.b32.xlu1 %v6394_v55, %s6607_s24 }
0x2181   : > { %3578 = vrot.lane.b32.xlu1 %v6390_v61, %s6607_s24  ;;  %s6620_s24 = smov 80  }
0x21d2   : > { %v3490_v30 = vpop.xlane.xlu0 %3489 }
0x21d3   : > { %v3491_v31 = vsub.f32 %v3487_v22, %v3490_v30 }
0x21d5   : > { %v3492_v32 = vmul.f32 1.442695, %v3491_v31 }
0x21d7   : > { %5259 = vpow2.f32 %v3492_v32 }
0x21e1   : > { %v5260_v33 = vpop.eup %5259 }
0x21e2   : > { %v3494_v34 = vsel %vm3309_vm9, %v5260_v33, 0.0 }
0x21e3   : > { %3495 = vadd.xlane.f32.xlu0 %v3494_v34  ;;  %v3941_v34 = vld [vmem:[#allocation11] sm:$0xff] }
0x21f9   : > { %v3318_v37 = vpop.xlane.xlu1 %3317  ;;  %5153 = vrot.lane.b32.xlu0 %v6394_v55, %s6619_s10 }
0x21fa   : > { %5261 = vrcp.f32 %v3318_v37  ;;  %v3942_v37 = vld [vmem:[#allocation11 + $0x8] sm:$0xff] }
0x21fd   : > { %v5159_v45 = vpop.permute.xlu1 %5158 }
0x21fe   : > { %v5161_v47 = vunpack.i.h.bf16 %v5159_v45  ;;  %v5160_v48 = vunpack.i.l.bf16 %v5159_v45 }
0x2200   : > { %v4929_v50 = vpack.c.bf16 %v5161_v47, %v5160_v48 }
0x2201   : > { %v3579_v51 = vpop.permute.xlu1 %3578 }
0x2204   : > { %v5262_v38 = vpop.eup %5261 }
0x2205   : > { %v3320_v35 = vmul.f32 %v5262_v38, %v5258_v29  ;;  %v3943_v38 = vld [vmem:[#allocation11 + $0x10] sm:$0xff] }
0x2207   : > { %4691 = vmatmul.mubr.msk.f32.vlgmr.msra.gmra.mrb[24].mxu0 %vm746_vm5, %v3320_v35  ;;  %v3944_v35 = vld [vmem:[#allocation11 + $0x18] sm:$0xff] }
0x2208   : > { %4704 = vmatprep.mubr.msk.f32.mxu0 %vm5555_vm8, %v5556_v1 }
0x2270   : > { %v3496_v40 = vpop.xlane.xlu0 %3495 }
0x2271   : > { %5263 = vrcp.f32 %v3496_v40  ;;  %v4946_v40 = vpack.c.bf16 %v3944_v35, %v3943_v38 }
0x2274   : > { %v5154_v39 = vpop.permute.xlu0 %5153 }
0x2275   : > { %v5156_v43 = vunpack.i.h.bf16 %v5154_v39  ;;  %v5155_v44 = vunpack.i.l.bf16 %v5154_v39 }
0x2277   : > { %v4926_v10 = vpack.c.bf16 %v5156_v43, %v5155_v44 }
0x2279   : > { %4927 = vmatpush3.bf16.msra.mxu0 %v4926_v10 }
0x227a   : > { %4928 = vmatprep.subr.bf16.mxu0 %v5554_v0 }
0x227b   : > { %v5264_v46 = vpop.eup %5263 }
0x227c   : > { %v3498_v49 = vmul.f32 %v5264_v46, %v5260_v33 }
0x227e   : > { %4705 = vmatmul.mubr.msk.f32.vlgmr.msra.gmra.mrb[26].mxu0 %vm746_vm5, %v3498_v49 }
0x227f   : > { %4711 = vmatprep.mubr.msk.f32.mxu0 %vm5555_vm8, %v5556_v1 }
0x2282   : > { %4931 = vmatpush3.bf16.xpose.msk.msra.mxu0 %vm5955_vm2, %v4929_v50 }
0x2283   : > { %4939 = vmatprep.subr.bf16.mxu0 %v5554_v0 }
0x2289   : > { %4712 = vmatmul.mubr.msk.f32.vlgmr.msra.gmra.mrb[28].mxu0 %vm658_vm1, %v3579_v51 }
0x228a   : > { %4732 = vmatprep.mubr.msk.f32.mxu0 %vm5555_vm8, %v5556_v1 }
0x22da   : > { %v6438_v52 = vpop.f32.mrb[24].mxu0 }
0x22db   : > { %v4692_v53 = vpop.f32.mrb[25].mxu0 }
0x2351   : > { %v3574_v54 = vpop.f32.mrb[26].mxu0 }
0x2352   : > { %v4706_v57 = vpop.f32.mrb[27].mxu0 }
0x235c   : > { %v3656_v23 = vpop.f32.mrb[28].mxu0 }
0x235d   : > { %v3660_v58 = vmul.f32 0.35355338, %v3656_v23  ;;  %v4713_v63 = vpop.f32.mrb[29].mxu0 }
0x235f   : > { %v3661_v2 = vadd.f32 %v3660_v58, %v5967_v20 }
0x2361   : > { %v3662_v56 = vsel %vm3309_vm9, %v3661_v2, -inf }
0x2362   : > { %3663 = vmax.xlane.f32.xlu0 %v3662_v56 }
0x2378   : > { %5163 = vrot.lane.b32.xlu0 %v6394_v55, %s6620_s24 }
0x237c   : > { %3752 = vrot.lane.b32.xlu0 %v6390_v61, %s6609_s13 }
0x23ef   : > { %v3664_v62 = vpop.xlane.xlu0 %3663 }
0x23f0   : > { %v3665_v9 = vsub.f32 %v3661_v2, %v3664_v62 }
0x23f2   : > { %v3666_v3 = vmul.f32 1.442695, %v3665_v9 }
0x23f3   : > { %v5164_v42 = vpop.permute.xlu0 %5163 }
0x23f4   : > { %5265 = vpow2.f32 %v3666_v3  ;;  %v5166_v8 = vunpack.i.h.bf16 %v5164_v42  ;;  %v5165_v4 = vunpack.i.l.bf16 %v5164_v42 }
0x23f6   : > { %v4933_v6 = vpack.c.bf16 %v5166_v8, %v5165_v4 }
0x23f7   : > { %v3753_v5 = vpop.permute.xlu0 %3752 }
0x23f8   : > { %4934 = vmatpush3.bf16.msra.mxu1 %v4933_v6 }
0x23f9   : > { %4935 = vmatprep.subr.bf16.mxu1 %v5554_v0 }
0x23fe   : > { %v5266_v11 = vpop.eup %5265 }
0x23ff   : > { %v3668_v12 = vsel %vm3309_vm9, %v5266_v11, 0.0 }
0x2400   : > { %3669 = vadd.xlane.f32.xlu1 %v3668_v12 }
0x2411   : > { %5168 = vrot.lane.b32.xlu1 %v6394_v55, %s6609_s13  ;;  %s555_s13 = scalar_lea.vmem [#allocation13], %s5894_s8 }
0x248d   : > { %v3670_v13 = vpop.xlane.xlu1 %3669 }
0x248e   : > { %5267 = vrcp.f32 %v3670_v13 }
0x2491   : > { %v5169_v61 = vpop.permute.xlu1 %5168 }
0x2492   : > { %v5171_v15 = vunpack.i.h.bf16 %v5169_v61  ;;  %v5170_v16 = vunpack.i.l.bf16 %v5169_v61 }
0x2494   : > { %v4936_v7 = vpack.c.bf16 %v5171_v15, %v5170_v16 }
0x2498   : > { %v5268_v17 = vpop.eup %5267 }
0x2499   : > { %v3672_v18 = vmul.f32 %v5268_v17, %v5266_v11 }
0x249b   : > { %4719 = vmatmul.mubr.msk.f32.vlgmr.msra.gmra.mrb[30].mxu1 %vm746_vm5, %v3672_v18 }
0x249c   : > { %4938 = vmatpush3.bf16.xpose.msk.msra.mxu1 %vm5955_vm2, %v4936_v7  ;;  %4725 = vmatprep.mubr.msk.f32.mxu1 %vm5555_vm8, %v5556_v1 }
0x24a3   : > { %4726 = vmatmul.mubr.msk.f32.vlgmr.msra.gmra.mrb[32].mxu1 %vm658_vm1, %v3753_v5 }
0x256e   : > { %v3748_v19 = vpop.f32.mrb[30].mxu1 }
0x256f   : > { %v4720_v21 = vpop.f32.mrb[31].mxu1 }
0x2576   : > { %v3830_v22 = vpop.f32.mrb[32].mxu1 }
0x2577   : > { %v3834_v24 = vmul.f32 0.35355338, %v3830_v22  ;;  %v4727_v25 = vpop.f32.mrb[33].mxu1 }
0x2579   : > { %v3835_v26 = vadd.f32 %v3834_v24, %v5967_v20 }
0x257b   : > { %v3836_v27 = vsel %vm3309_vm9, %v3835_v26, -inf }
0x257c   : > { %3837 = vmax.xlane.f32.xlu1 %v3836_v27 }
0x258d   : > { %3927 = vrot.lane.b32.xlu1 %v3574_v54, %s6611_s22  ;;  %s4033_s22 = sshll.u32 %s555_s13, 4  ;;  %s6481_s22 = int_to_ptr.vmem [resolvable:$true] %s4033_s22 }
0x258e   : > { %s5445_s14 = scalar_lea.vmem %s6481_s22, 16 }
0x258f   : > { %p5446_p0 = scmp.ne.s32.totalorder %s6481_s22, %s5445_s14 }
0x2591   : > { %3931 = vrot.lane.b32.xlu1 %v3748_v19, %s6613_s21  ;;  %p5447_p4 = pnand %p5446_p0, %p5802_p3 }
0x2593   : > { %p5448_p6 = pneg %p5447_p4 }
0x2609   : > { %v3838_v14 = vpop.xlane.xlu1 %3837 }
0x260a   : > { %v3839_v60 = vsub.f32 %v3835_v26, %v3838_v14 }
0x260c   : > { %v3840_v28 = vmul.f32 1.442695, %v3839_v60 }
0x260d   : > { %v3928_v44 = vpop.permute.xlu1 %3927 }
0x260e   : > { %5269 = vpow2.f32 %v3840_v28 }
0x2611   : > { %v3932_v10 = vpop.permute.xlu1 %3931 }
0x2618   : > { %v5270_v36 = vpop.eup %5269 }
0x2619   : > { %v3842_v59 = vsel %vm3309_vm9, %v5270_v36, 0.0 }
0x261a   : > { %3843 = vadd.xlane.f32.xlu0 %v3842_v59 }
0x2630   : > { %5173 = vrot.lane.b32.xlu0 %v6394_v55, %s6608_s17  ;;  %v4943_v55 = vpack.c.bf16 %v3942_v37, %v3941_v34  ;;  %s4292_s17 = sshll.u32 %s5649_s29, 4  ;;  %s5557_s29 = smov [#allocation13]  }
0x2631   : > { %s6479_s20 = scalar_lea.hbm %s6621_s7, %s4292_s17  ;;  %s5449_s18 = sshll.u32 %s5557_s29, 4  ;;  %s5450_s18 = int_to_ptr.vmem [resolvable:$false] %s5449_s18 }
0x2632   : > { %s5451_s15 = scalar_lea.vmem %s5450_s18, 32  ;;  %p5452_p10 = scmp.lt.s32.totalorder %s6481_s22, %s5450_s18 }
0x2633   : > { %p5453_p5 = scmp.lt.s32.totalorder %s5451_s15, %s5445_s14 }
0x2635   : > { %p5454_p9 = por %p5453_p5, %p5452_p10 }
0x2637   : > { %p5455_p8 = pnand %p5454_p9, %p5448_p6 }
0x26a7   : > { %v3844_v29 = vpop.xlane.xlu0 %3843 }
0x26a8   : > { %5271 = vrcp.f32 %v3844_v29 }
0x26ab   : > { %v5174_v20 = vpop.permute.xlu0 %5173 }
0x26ac   : > { %v5176_v41 = vunpack.i.h.bf16 %v5174_v20  ;;  %v5175_v30 = vunpack.i.l.bf16 %v5174_v20 }
0x26ae   : > { %v4940_v31 = vpack.c.bf16 %v5176_v41, %v5175_v30 }
0x26b0   : > { %4941 = vmatpush3.bf16.msra.mxu0 %v4940_v31 }
0x26b1   : > { %4942 = vmatprep.subr.bf16.mxu0 %v5554_v0 }
0x26b2   : > { %v5272_v32 = vpop.eup %5271 }
0x26b3   : > { %v3846_v33 = vmul.f32 %v5272_v32, %v5270_v36 }
0x26b5   : > { %4733 = vmatmul.mubr.msk.f32.vlgmr.msra.gmra.mrb[30].mxu0 %vm746_vm5, %v3846_v33 }
0x26b6   : > { %4743 = vmatprep.mubr.msk.f32.mxu0 %vm5555_vm8, %v5556_v1  ;;  %4944 = vmatpush3.bf16.msra.mxu0 %v4943_v55  ;;  %v3938_v1 = vsel %vm658_vm1, %v6438_v52, %v3928_v44 }
0x26b7   : > { %4945 = vmatprep.subr.bf16.mxu0 %v5554_v0  ;;  %v3939_v45 = vsel %vm746_vm5, %v3938_v1, %v3932_v10 }
0x26ba   : > { %4947 = vmatpush3.bf16.msra.mxu0 %v4946_v40 }
0x2788   : > { %v3922_v39 = vpop.f32.mrb[30].mxu0 }
0x2789   : > { %3935 = vrot.lane.b32.xlu0 %v3922_v39, %s6614_s25  ;;  %v4734_v43 = vpop.f32.mrb[31].mxu0 }
0x27fb   : > { %v3936_v46 = vpop.permute.xlu0 %3935 }
0x27fc   : > { %v3940_v47 = vsel %vm1496_vm6, %v3939_v45, %v3936_v46 }
0x27fd   : > { %4744 = vmatmul.mubr.msk.f32.vlgmr.msra.gmra.mrb[32].mxu0 %vm570_vm0, %v3940_v47 }
0x28d0   : > { %v4014_v0 = vpop.f32.mrb[32].mxu0 }
0x28d1   : > { %4019 = vst.msk [vmem:[%s555_s13] sm:$0x1] %vm4018_vm10, %v4014_v0  ;;  %v4745_v48 = vpop.f32.mrb[33].mxu0 }
0x28d2   : > { %5458 = shalt.err (!%p5455_p8)
}
0x28d3   : > { %s5459_s8 = scalar_lea.hbm %s6479_s20, 16  ;;  %s5463_s10 = scalar_lea.hbm %s6621_s7, 32 }
0x28d4   : > { %p5460_p11 = scmp.ne.s32.totalorder %s6479_s20, %s5459_s8  ;;  %p5464_p1 = scmp.lt.u32.totalorder %s6479_s20, %s6621_s7 }
0x28d5   : > { %p5465_p2 = scmp.lt.u32.totalorder %s5463_s10, %s5459_s8  ;;  %p5467_p0 = scmp.lt.u32.totalorder %s5459_s8, %s6479_s20 }
0x28d6   : > { %p5461_p7 = pnand %p5460_p11, %p5802_p3 }
0x28d7   : > { %p5466_p13 = por %p5465_p2, %p5464_p1 }
0x28d8   : > { %p5462_p12 = pneg %p5461_p7 }
0x28d9   : > { %p5468_p4 = por %p5467_p0, %p5466_p13 }
0x28db   : > { %p5469_p6 = pnand %p5468_p4, %p5462_p12 }
0x28dd   : > { %5472 = shalt.err (!%p5469_p6)
}
0x28de   : > { %4968 = dma.vmem_to_hbm [thread:$0]  (%p5802_p3), %s6481_s22, 16, %s6479_s20, %s4021_s11  }
0x28df PF: > { %s6622_s13 = sld [smem:[#allocation20_spill]]  ;;  %s6623_s21 = sld [smem:[#allocation21_spill]] }
0x28e0   : > { %p6625_p5 = scmp.ge.s32.totalorder %s5527_s28, 2 }
0x28e5   : > { %s4045_s25 = sand.u32 1, %s6622_s13   ;;  %p6624_p10 = scmp.ne.s32.totalorder %s6623_s21, 0 }
0x28e6   : > { %s4046_s14 = scalar_lea.sflag [#allocation4], %s4045_s25 }
0x28e7   : > { %p4991_p9 = pnand %p6625_p5, %p6624_p10 }
0x28e9   : > { %5510 = dma.done.wait (!%p4991_p9), %s4046_s14, 16  }
0x28ea   : > { %5512 = vsyncadd (!%p4991_p9), %s4046_s14, 4294967280  ;;  %p31_p8 = scmp.ge.s32.totalorder %s5789_s4, 4   ;;  %s6626_s25 = smov %s5519_s26 }
0x28eb   : > { %s6627_s26 = smov %s5523_s27  ;;  %s6628_s27 = smov %s5798_s30 }
0x28ec   : > { %s6629_s28 = smov %s5789_s4  ;;  %33 = sbr.rel (!%p31_p8) target bundleno = 19 (0x13), region = 154 }
0x28f3   :  { %4050 = vsyncpa [#allocation3], 1 }
0x28f4   :  { %4052 = vsyncpa [#allocation3 + $0x1], 1 }
0x28f5   :  { %4053 = vsyncpa [#allocation6], 1 }
0x28f6   :  { %4055 = vsyncpa [#allocation6 + $0x1], 1 }
0x28f7   :  { %4056 = vsyncpa [#allocation9], 1 }
0x28f8   :  { %4057 = vsyncpa [#allocation12], 1 }
0x28f9   :  { %4058 = vsyncpa [#allocation4], 1 }
0x28fa   :  { %4060 = vsyncpa [#allocation4 + $0x1], 1 }

</bundles_post_ra>
